<compile_context>
chip_gen: v6e
topology: v6e:2x2x1
jax: 0.10.0
libtpu: 0.0.40
codegen_flags: <defaults>
</compile_context>

<pallas_src>
import functools

import jax
import jax.numpy as jnp
from jax import lax
from jax.experimental import pallas as pl
from jax.experimental.pallas import tpu as pltpu


def _conv2d_kernel(x_ref, w_ref, b_ref, o_ref, slab_ref, *,
                   kh_size, kw_size, img_w, ho, wo):
    # x_ref:    (N, Cin, H*W)     raw input, NCHW with HW flattened
    # w_ref:    (Cout, KKC)       weights, tap-major flatten: k = (kh*KW+kw)*Cin + c
    # b_ref:    (Cout, 1)         bias
    # o_ref:    (N, Cout, Ho*Wo)  output, lane-dense spatial axis
    # slab_ref: (KKC, Ho*Wo)      VMEM scratch: im2col patch slab
    n_batch, cin, _ = x_ref.shape
    cout, _ = w_ref.shape
    p = ho * wo

    wmat = w_ref[...]                                                   # (Cout, KKC)
    bias_tile = jnp.broadcast_to(b_ref[...].astype(jnp.float32), (cout, p))  # hoisted

    for n in range(n_batch):                       # static, tiny (N = 2)
        # ---- in-kernel im2col: fill the patch slab from the raw input ----
        # slab[(kh*KW+kw)*Cin + c, i*Wo + j] = x[n, c, (i+kh)*W + (j+kw)]
        for kh in range(kh_size):
            for kw in range(kw_size):
                row0 = (kh * kw_size + kw) * cin
                for i in range(ho):
                    src = (i + kh) * img_w + kw
                    slab_ref[row0:row0 + cin, pl.ds(i * wo, wo)] = (
                        x_ref[n, :, pl.ds(src, wo)])
        # ---- one lane-dense MXU matmul (f32 accumulate) + bias ----
        acc = jnp.dot(wmat, slab_ref[...], preferred_element_type=jnp.float32)
        o_ref[n] = (acc + bias_tile).astype(o_ref.dtype)


@functools.partial(jax.jit, static_argnames=("kh_size", "kw_size"))
def conv2d_pallas(x_nchw, w2d, bias2d, *, kh_size, kw_size):
    """x_nchw: (N, Cin, H, W); w2d: (Cout, KH*KW*Cin) tap-major; bias2d: (Cout, 1)."""
    n, cin, h, w = x_nchw.shape
    cout, kkc = w2d.shape
    assert kkc == kh_size * kw_size * cin
    ho, wo = h - kh_size + 1, w - kw_size + 1
    p = ho * wo

    # Contiguous reshape only (bitcast; no HBM copy, no extra fused producer).
    x_flat = x_nchw.reshape(n, cin, h * w)

    kernel = functools.partial(_conv2d_kernel, kh_size=kh_size, kw_size=kw_size,
                               img_w=w, ho=ho, wo=wo)

    out_flat = pl.pallas_call(
        kernel,
        out_shape=jax.ShapeDtypeStruct((n, cout, p), x_nchw.dtype),
        grid=(1,),  # single fused step: whole problem fits VMEM with huge margin
        in_specs=[
            pl.BlockSpec((n, cin, h * w), lambda i: (0, 0, 0)),
            pl.BlockSpec((cout, kkc), lambda i: (0, 0)),
            pl.BlockSpec((cout, 1), lambda i: (0, 0)),
        ],
        out_specs=pl.BlockSpec((n, cout, p), lambda i: (0, 0, 0)),
        scratch_shapes=[pltpu.VMEM((kkc, p), jnp.float32)],
    )(x_flat, w2d, bias2d)

    # Contiguous (free) reshape: (N, Cout, Ho*Wo) -> (N, Cout, Ho, Wo)  [NCHW]
    return out_flat.reshape(n, cout, ho, wo)


def prepare_conv_params(weight, bias):
    """One-time parameter preprocessing (kept OUT of the per-call jitted path)."""
    cout, cin, kh, kw = weight.shape
    # Tap-major flatten to match the in-kernel slab row ordering.
    w2d = jnp.transpose(weight, (0, 2, 3, 1)).reshape(cout, kh * kw * cin)
    b2d = bias.reshape(cout, 1)
    return w2d, b2d


if __name__ == "__main__":
    # Module config: in_channels=4, out_channels=8, kernel_size=3
    N, Cin, H, W = 2, 4, 16, 16
    Cout, K = 8, 3

    key = jax.random.PRNGKey(0)
    kx, kw_, kb = jax.random.split(key, 3)
    x = jax.random.normal(kx, (N, Cin, H, W), dtype=jnp.float32)
    # Deterministic Conv2d-style init (uniform in +/- 1/sqrt(fan_in))
    fan_in = Cin * K * K
    bound = 1.0 / (fan_in ** 0.5)
    weight = jax.random.uniform(kw_, (Cout, Cin, K, K), jnp.float32, -bound, bound)
    bias = jax.random.uniform(kb, (Cout,), jnp.float32, -bound, bound)

    # Weight/bias flattening done once, outside the jitted hot path.
    w2d, b2d = prepare_conv_params(weight, bias)

    out = conv2d_pallas(x, w2d, b2d, kh_size=K, kw_size=K)
    jax.block_until_ready(out)

    # Cross-check against XLA's conv for correctness.
    ref = lax.conv_general_dilated(
        x, weight, window_strides=(1, 1), padding="VALID",
        dimension_numbers=("NCHW", "OIHW", "NCHW")) + bias.reshape(1, Cout, 1, 1)
    assert out.shape == (N, Cout, H - K + 1, W - K + 1)
    assert jnp.allclose(out, ref, atol=1e-3, rtol=1e-3)

    print("KERNEL_OK")
</pallas_src>

<mosaic_0001>
module attributes {stable_mosaic.version = 11 : i64} {
  func.func @_conv2d_kernel(%arg0: i32, %arg1: memref<2x4x256xf32, #tpu.memory_space<vmem>>, %arg2: memref<8x36xf32, #tpu.memory_space<vmem>>, %arg3: memref<8x1xf32, #tpu.memory_space<vmem>>, %arg4: memref<2x8x196xf32, #tpu.memory_space<vmem>>, %arg5: memref<36x196xf32, #tpu.memory_space<vmem>>) attributes {dimension_semantics = [#tpu.dimension_semantics<arbitrary>], iteration_bounds = array<i64: 1>, scalar_prefetch = 0 : i64, scratch_operands = 1 : i64, tpu.core_type = #tpu.core_type<tc>, window_params = [{pipeline_mode = #tpu.pipeline_mode<synchronous>, transform_indices = @transform_0, window_bounds = array<i64: 2, 4, 256>}, {pipeline_mode = #tpu.pipeline_mode<synchronous>, transform_indices = @transform_1, window_bounds = array<i64: 8, 36>}, {pipeline_mode = #tpu.pipeline_mode<synchronous>, transform_indices = @transform_2, window_bounds = array<i64: 8, 1>}, {pipeline_mode = #tpu.pipeline_mode<synchronous>, transform_indices = @transform_3, window_bounds = array<i64: 2, 8, 196>}]} {
    %c0 = arith.constant 0 : index
    %c0_0 = arith.constant 0 : index
    %0 = vector.load %arg2[%c0, %c0_0] : memref<8x36xf32, #tpu.memory_space<vmem>>, vector<8x36xf32>
    %c0_1 = arith.constant 0 : index
    %c0_2 = arith.constant 0 : index
    %1 = vector.load %arg3[%c0_1, %c0_2] : memref<8x1xf32, #tpu.memory_space<vmem>>, vector<8x1xf32>
    %2 = vector.shape_cast %1 : vector<8x1xf32> to vector<8x1xf32>
    %3 = vector.broadcast %2 : vector<8x1xf32> to vector<8x196xf32>
    %c0_3 = arith.constant 0 : index
    %c0_4 = arith.constant 0 : index
    %c0_5 = arith.constant 0 : index
    %4 = vector.load %arg1[%c0_3, %c0_4, %c0_5] : memref<2x4x256xf32, #tpu.memory_space<vmem>>, vector<1x4x14xf32>
    %5 = vector.shape_cast %4 : vector<1x4x14xf32> to vector<4x14xf32>
    %c0_6 = arith.constant 0 : index
    %c0_7 = arith.constant 0 : index
    %6 = vector.load %arg5[%c0_6, %c0_7] : memref<36x196xf32, #tpu.memory_space<vmem>>, vector<4x14xf32>
    tpu.vector_store %arg5[%c0_6, %c0_7], %5 {strides = array<i32>} : memref<36x196xf32, #tpu.memory_space<vmem>>, vector<4x14xf32>,
    %c0_8 = arith.constant 0 : index
    %c0_9 = arith.constant 0 : index
    %c16 = arith.constant 16 : index
    %7 = vector.load %arg1[%c0_8, %c0_9, %c16] : memref<2x4x256xf32, #tpu.memory_space<vmem>>, vector<1x4x14xf32>
    %8 = vector.shape_cast %7 : vector<1x4x14xf32> to vector<4x14xf32>
    %c0_10 = arith.constant 0 : index
    %c14 = arith.constant 14 : index
    %9 = vector.load %arg5[%c0_10, %c14] : memref<36x196xf32, #tpu.memory_space<vmem>>, vector<4x14xf32>
    tpu.vector_store %arg5[%c0_10, %c14], %8 {strides = array<i32>} : memref<36x196xf32, #tpu.memory_space<vmem>>, vector<4x14xf32>,
    %c0_11 = arith.constant 0 : index
    %c0_12 = arith.constant 0 : index
    %c32 = arith.constant 32 : index
    %10 = vector.load %arg1[%c0_11, %c0_12, %c32] : memref<2x4x256xf32, #tpu.memory_space<vmem>>, vector<1x4x14xf32>
    %11 = vector.shape_cast %10 : vector<1x4x14xf32> to vector<4x14xf32>
    %c0_13 = arith.constant 0 : index
    %c28 = arith.constant 28 : index
    %12 = vector.load %arg5[%c0_13, %c28] : memref<36x196xf32, #tpu.memory_space<vmem>>, vector<4x14xf32>
    tpu.vector_store %arg5[%c0_13, %c28], %11 {strides = array<i32>} : memref<36x196xf32, #tpu.memory_space<vmem>>, vector<4x14xf32>,
    %c0_14 = arith.constant 0 : index
    %c0_15 = arith.constant 0 : index
    %c48 = arith.constant 48 : index
    %13 = vector.load %arg1[%c0_14, %c0_15, %c48] : memref<2x4x256xf32, #tpu.memory_space<vmem>>, vector<1x4x14xf32>
    %14 = vector.shape_cast %13 : vector<1x4x14xf32> to vector<4x14xf32>
    %c0_16 = arith.constant 0 : index
    %c42 = arith.constant 42 : index
    %15 = vector.load %arg5[%c0_16, %c42] : memref<36x196xf32, #tpu.memory_space<vmem>>, vector<4x14xf32>
    tpu.vector_store %arg5[%c0_16, %c42], %14 {strides = array<i32>} : memref<36x196xf32, #tpu.memory_space<vmem>>, vector<4x14xf32>,
    %c0_17 = arith.constant 0 : index
    %c0_18 = arith.constant 0 : index
    %c64 = arith.constant 64 : index
    %16 = vector.load %arg1[%c0_17, %c0_18, %c64] : memref<2x4x256xf32, #tpu.memory_space<vmem>>, vector<1x4x14xf32>
    %17 = vector.shape_cast %16 : vector<1x4x14xf32> to vector<4x14xf32>
    %c0_19 = arith.constant 0 : index
    %c56 = arith.constant 56 : index
    %18 = vector.load %arg5[%c0_19, %c56] : memref<36x196xf32, #tpu.memory_space<vmem>>, vector<4x14xf32>
    tpu.vector_store %arg5[%c0_19, %c56], %17 {strides = array<i32>} : memref<36x196xf32, #tpu.memory_space<vmem>>, vector<4x14xf32>,
    %c0_20 = arith.constant 0 : index
    %c0_21 = arith.constant 0 : index
    %c80 = arith.constant 80 : index
    %19 = vector.load %arg1[%c0_20, %c0_21, %c80] : memref<2x4x256xf32, #tpu.memory_space<vmem>>, vector<1x4x14xf32>
    %20 = vector.shape_cast %19 : vector<1x4x14xf32> to vector<4x14xf32>
    %c0_22 = arith.constant 0 : index
    %c70 = arith.constant 70 : index
    %21 = vector.load %arg5[%c0_22, %c70] : memref<36x196xf32, #tpu.memory_space<vmem>>, vector<4x14xf32>
    tpu.vector_store %arg5[%c0_22, %c70], %20 {strides = array<i32>} : memref<36x196xf32, #tpu.memory_space<vmem>>, vector<4x14xf32>,
    %c0_23 = arith.constant 0 : index
    %c0_24 = arith.constant 0 : index
    %c96 = arith.constant 96 : index
    %22 = vector.load %arg1[%c0_23, %c0_24, %c96] : memref<2x4x256xf32, #tpu.memory_space<vmem>>, vector<1x4x14xf32>
    %23 = vector.shape_cast %22 : vector<1x4x14xf32> to vector<4x14xf32>
    %c0_25 = arith.constant 0 : index
    %c84 = arith.constant 84 : index
    %24 = vector.load %arg5[%c0_25, %c84] : memref<36x196xf32, #tpu.memory_space<vmem>>, vector<4x14xf32>
    tpu.vector_store %arg5[%c0_25, %c84], %23 {strides = array<i32>} : memref<36x196xf32, #tpu.memory_space<vmem>>, vector<4x14xf32>,
    %c0_26 = arith.constant 0 : index
    %c0_27 = arith.constant 0 : index
    %c112 = arith.constant 112 : index
    %25 = vector.load %arg1[%c0_26, %c0_27, %c112] : memref<2x4x256xf32, #tpu.memory_space<vmem>>, vector<1x4x14xf32>
    %26 = vector.shape_cast %25 : vector<1x4x14xf32> to vector<4x14xf32>
    %c0_28 = arith.constant 0 : index
    %c98 = arith.constant 98 : index
    %27 = vector.load %arg5[%c0_28, %c98] : memref<36x196xf32, #tpu.memory_space<vmem>>, vector<4x14xf32>
    tpu.vector_store %arg5[%c0_28, %c98], %26 {strides = array<i32>} : memref<36x196xf32, #tpu.memory_space<vmem>>, vector<4x14xf32>,
    %c0_29 = arith.constant 0 : index
    %c0_30 = arith.constant 0 : index
    %c128 = arith.constant 128 : index
    %28 = vector.load %arg1[%c0_29, %c0_30, %c128] : memref<2x4x256xf32, #tpu.memory_space<vmem>>, vector<1x4x14xf32>
    %29 = vector.shape_cast %28 : vector<1x4x14xf32> to vector<4x14xf32>
    %c0_31 = arith.constant 0 : index
    %c112_32 = arith.constant 112 : index
    %30 = vector.load %arg5[%c0_31, %c112_32] : memref<36x196xf32, #tpu.memory_space<vmem>>, vector<4x14xf32>
    tpu.vector_store %arg5[%c0_31, %c112_32], %29 {strides = array<i32>} : memref<36x196xf32, #tpu.memory_space<vmem>>, vector<4x14xf32>,
    %c0_33 = arith.constant 0 : index
    %c0_34 = arith.constant 0 : index
    %c144 = arith.constant 144 : index
    %31 = vector.load %arg1[%c0_33, %c0_34, %c144] : memref<2x4x256xf32, #tpu.memory_space<vmem>>, vector<1x4x14xf32>
    %32 = vector.shape_cast %31 : vector<1x4x14xf32> to vector<4x14xf32>
    %c0_35 = arith.constant 0 : index
    %c126 = arith.constant 126 : index
    %33 = vector.load %arg5[%c0_35, %c126] : memref<36x196xf32, #tpu.memory_space<vmem>>, vector<4x14xf32>
    tpu.vector_store %arg5[%c0_35, %c126], %32 {strides = array<i32>} : memref<36x196xf32, #tpu.memory_space<vmem>>, vector<4x14xf32>,
    %c0_36 = arith.constant 0 : index
    %c0_37 = arith.constant 0 : index
    %c160 = arith.constant 160 : index
    %34 = vector.load %arg1[%c0_36, %c0_37, %c160] : memref<2x4x256xf32, #tpu.memory_space<vmem>>, vector<1x4x14xf32>
    %35 = vector.shape_cast %34 : vector<1x4x14xf32> to vector<4x14xf32>
    %c0_38 = arith.constant 0 : index
    %c140 = arith.constant 140 : index
    %36 = vector.load %arg5[%c0_38, %c140] : memref<36x196xf32, #tpu.memory_space<vmem>>, vector<4x14xf32>
    tpu.vector_store %arg5[%c0_38, %c140], %35 {strides = array<i32>} : memref<36x196xf32, #tpu.memory_space<vmem>>, vector<4x14xf32>,
    %c0_39 = arith.constant 0 : index
    %c0_40 = arith.constant 0 : index
    %c176 = arith.constant 176 : index
    %37 = vector.load %arg1[%c0_39, %c0_40, %c176] : memref<2x4x256xf32, #tpu.memory_space<vmem>>, vector<1x4x14xf32>
    %38 = vector.shape_cast %37 : vector<1x4x14xf32> to vector<4x14xf32>
    %c0_41 = arith.constant 0 : index
    %c154 = arith.constant 154 : index
    %39 = vector.load %arg5[%c0_41, %c154] : memref<36x196xf32, #tpu.memory_space<vmem>>, vector<4x14xf32>
    tpu.vector_store %arg5[%c0_41, %c154], %38 {strides = array<i32>} : memref<36x196xf32, #tpu.memory_space<vmem>>, vector<4x14xf32>,
    %c0_42 = arith.constant 0 : index
    %c0_43 = arith.constant 0 : index
    %c192 = arith.constant 192 : index
    %40 = vector.load %arg1[%c0_42, %c0_43, %c192] : memref<2x4x256xf32, #tpu.memory_space<vmem>>, vector<1x4x14xf32>
    %41 = vector.shape_cast %40 : vector<1x4x14xf32> to vector<4x14xf32>
    %c0_44 = arith.constant 0 : index
    %c168 = arith.constant 168 : index
    %42 = vector.load %arg5[%c0_44, %c168] : memref<36x196xf32, #tpu.memory_space<vmem>>, vector<4x14xf32>
    tpu.vector_store %arg5[%c0_44, %c168], %41 {strides = array<i32>} : memref<36x196xf32, #tpu.memory_space<vmem>>, vector<4x14xf32>,
    %c0_45 = arith.constant 0 : index
    %c0_46 = arith.constant 0 : index
    %c208 = arith.constant 208 : index
    %43 = vector.load %arg1[%c0_45, %c0_46, %c208] : memref<2x4x256xf32, #tpu.memory_space<vmem>>, vector<1x4x14xf32>
    %44 = vector.shape_cast %43 : vector<1x4x14xf32> to vector<4x14xf32>
    %c0_47 = arith.constant 0 : index
    %c182 = arith.constant 182 : index
    %45 = vector.load %arg5[%c0_47, %c182] : memref<36x196xf32, #tpu.memory_space<vmem>>, vector<4x14xf32>
    tpu.vector_store %arg5[%c0_47, %c182], %44 {strides = array<i32>} : memref<36x196xf32, #tpu.memory_space<vmem>>, vector<4x14xf32>,
    %c0_48 = arith.constant 0 : index
    %c0_49 = arith.constant 0 : index
    %c1 = arith.constant 1 : index
    %46 = vector.load %arg1[%c0_48, %c0_49, %c1] : memref<2x4x256xf32, #tpu.memory_space<vmem>>, vector<1x4x14xf32>
    %47 = vector.shape_cast %46 : vector<1x4x14xf32> to vector<4x14xf32>
    %c4 = arith.constant 4 : index
    %c0_50 = arith.constant 0 : index
    %48 = vector.load %arg5[%c4, %c0_50] : memref<36x196xf32, #tpu.memory_space<vmem>>, vector<4x14xf32>
    tpu.vector_store %arg5[%c4, %c0_50], %47 {strides = array<i32>} : memref<36x196xf32, #tpu.memory_space<vmem>>, vector<4x14xf32>,
    %c0_51 = arith.constant 0 : index
    %c0_52 = arith.constant 0 : index
    %c17 = arith.constant 17 : index
    %49 = vector.load %arg1[%c0_51, %c0_52, %c17] : memref<2x4x256xf32, #tpu.memory_space<vmem>>, vector<1x4x14xf32>
    %50 = vector.shape_cast %49 : vector<1x4x14xf32> to vector<4x14xf32>
    %c4_53 = arith.constant 4 : index
    %c14_54 = arith.constant 14 : index
    %51 = vector.load %arg5[%c4_53, %c14_54] : memref<36x196xf32, #tpu.memory_space<vmem>>, vector<4x14xf32>
    tpu.vector_store %arg5[%c4_53, %c14_54], %50 {strides = array<i32>} : memref<36x196xf32, #tpu.memory_space<vmem>>, vector<4x14xf32>,
    %c0_55 = arith.constant 0 : index
    %c0_56 = arith.constant 0 : index
    %c33 = arith.constant 33 : index
    %52 = vector.load %arg1[%c0_55, %c0_56, %c33] : memref<2x4x256xf32, #tpu.memory_space<vmem>>, vector<1x4x14xf32>
    %53 = vector.shape_cast %52 : vector<1x4x14xf32> to vector<4x14xf32>
    %c4_57 = arith.constant 4 : index
    %c28_58 = arith.constant 28 : index
    %54 = vector.load %arg5[%c4_57, %c28_58] : memref<36x196xf32, #tpu.memory_space<vmem>>, vector<4x14xf32>
    tpu.vector_store %arg5[%c4_57, %c28_58], %53 {strides = array<i32>} : memref<36x196xf32, #tpu.memory_space<vmem>>, vector<4x14xf32>,
    %c0_59 = arith.constant 0 : index
    %c0_60 = arith.constant 0 : index
    %c49 = arith.constant 49 : index
    %55 = vector.load %arg1[%c0_59, %c0_60, %c49] : memref<2x4x256xf32, #tpu.memory_space<vmem>>, vector<1x4x14xf32>
    %56 = vector.shape_cast %55 : vector<1x4x14xf32> to vector<4x14xf32>
    %c4_61 = arith.constant 4 : index
    %c42_62 = arith.constant 42 : index
    %57 = vector.load %arg5[%c4_61, %c42_62] : memref<36x196xf32, #tpu.memory_space<vmem>>, vector<4x14xf32>
    tpu.vector_store %arg5[%c4_61, %c42_62], %56 {strides = array<i32>} : memref<36x196xf32, #tpu.memory_space<vmem>>, vector<4x14xf32>,
    %c0_63 = arith.constant 0 : index
    %c0_64 = arith.constant 0 : index
    %c65 = arith.constant 65 : index
    %58 = vector.load %arg1[%c0_63, %c0_64, %c65] : memref<2x4x256xf32, #tpu.memory_space<vmem>>, vector<1x4x14xf32>
    %59 = vector.shape_cast %58 : vector<1x4x14xf32> to vector<4x14xf32>
    %c4_65 = arith.constant 4 : index
    %c56_66 = arith.constant 56 : index
    %60 = vector.load %arg5[%c4_65, %c56_66] : memref<36x196xf32, #tpu.memory_space<vmem>>, vector<4x14xf32>
    tpu.vector_store %arg5[%c4_65, %c56_66], %59 {strides = array<i32>} : memref<36x196xf32, #tpu.memory_space<vmem>>, vector<4x14xf32>,
    %c0_67 = arith.constant 0 : index
    %c0_68 = arith.constant 0 : index
    %c81 = arith.constant 81 : index
    %61 = vector.load %arg1[%c0_67, %c0_68, %c81] : memref<2x4x256xf32, #tpu.memory_space<vmem>>, vector<1x4x14xf32>
    %62 = vector.shape_cast %61 : vector<1x4x14xf32> to vector<4x14xf32>
    %c4_69 = arith.constant 4 : index
    %c70_70 = arith.constant 70 : index
    %63 = vector.load %arg5[%c4_69, %c70_70] : memref<36x196xf32, #tpu.memory_space<vmem>>, vector<4x14xf32>
    tpu.vector_store %arg5[%c4_69, %c70_70], %62 {strides = array<i32>} : memref<36x196xf32, #tpu.memory_space<vmem>>, vector<4x14xf32>,
    %c0_71 = arith.constant 0 : index
    %c0_72 = arith.constant 0 : index
    %c97 = arith.constant 97 : index
    %64 = vector.load %arg1[%c0_71, %c0_72, %c97] : memref<2x4x256xf32, #tpu.memory_space<vmem>>, vector<1x4x14xf32>
    %65 = vector.shape_cast %64 : vector<1x4x14xf32> to vector<4x14xf32>
    %c4_73 = arith.constant 4 : index
    %c84_74 = arith.constant 84 : index
    %66 = vector.load %arg5[%c4_73, %c84_74] : memref<36x196xf32, #tpu.memory_space<vmem>>, vector<4x14xf32>
    tpu.vector_store %arg5[%c4_73, %c84_74], %65 {strides = array<i32>} : memref<36x196xf32, #tpu.memory_space<vmem>>, vector<4x14xf32>,
    %c0_75 = arith.constant 0 : index
    %c0_76 = arith.constant 0 : index
    %c113 = arith.constant 113 : index
    %67 = vector.load %arg1[%c0_75, %c0_76, %c113] : memref<2x4x256xf32, #tpu.memory_space<vmem>>, vector<1x4x14xf32>
    %68 = vector.shape_cast %67 : vector<1x4x14xf32> to vector<4x14xf32>
    %c4_77 = arith.constant 4 : index
    %c98_78 = arith.constant 98 : index
    %69 = vector.load %arg5[%c4_77, %c98_78] : memref<36x196xf32, #tpu.memory_space<vmem>>, vector<4x14xf32>
    tpu.vector_store %arg5[%c4_77, %c98_78], %68 {strides = array<i32>} : memref<36x196xf32, #tpu.memory_space<vmem>>, vector<4x14xf32>,
    %c0_79 = arith.constant 0 : index
    %c0_80 = arith.constant 0 : index
    %c129 = arith.constant 129 : index
    %70 = vector.load %arg1[%c0_79, %c0_80, %c129] : memref<2x4x256xf32, #tpu.memory_space<vmem>>, vector<1x4x14xf32>
    %71 = vector.shape_cast %70 : vector<1x4x14xf32> to vector<4x14xf32>
    %c4_81 = arith.constant 4 : index
    %c112_82 = arith.constant 112 : index
    %72 = vector.load %arg5[%c4_81, %c112_82] : memref<36x196xf32, #tpu.memory_space<vmem>>, vector<4x14xf32>
    tpu.vector_store %arg5[%c4_81, %c112_82], %71 {strides = array<i32>} : memref<36x196xf32, #tpu.memory_space<vmem>>, vector<4x14xf32>,
    %c0_83 = arith.constant 0 : index
    %c0_84 = arith.constant 0 : index
    %c145 = arith.constant 145 : index
    %73 = vector.load %arg1[%c0_83, %c0_84, %c145] : memref<2x4x256xf32, #tpu.memory_space<vmem>>, vector<1x4x14xf32>
    %74 = vector.shape_cast %73 : vector<1x4x14xf32> to vector<4x14xf32>
    %c4_85 = arith.constant 4 : index
    %c126_86 = arith.constant 126 : index
    %75 = vector.load %arg5[%c4_85, %c126_86] : memref<36x196xf32, #tpu.memory_space<vmem>>, vector<4x14xf32>
    tpu.vector_store %arg5[%c4_85, %c126_86], %74 {strides = array<i32>} : memref<36x196xf32, #tpu.memory_space<vmem>>, vector<4x14xf32>,
    %c0_87 = arith.constant 0 : index
    %c0_88 = arith.constant 0 : index
    %c161 = arith.constant 161 : index
    %76 = vector.load %arg1[%c0_87, %c0_88, %c161] : memref<2x4x256xf32, #tpu.memory_space<vmem>>, vector<1x4x14xf32>
    %77 = vector.shape_cast %76 : vector<1x4x14xf32> to vector<4x14xf32>
    %c4_89 = arith.constant 4 : index
    %c140_90 = arith.constant 140 : index
    %78 = vector.load %arg5[%c4_89, %c140_90] : memref<36x196xf32, #tpu.memory_space<vmem>>, vector<4x14xf32>
    tpu.vector_store %arg5[%c4_89, %c140_90], %77 {strides = array<i32>} : memref<36x196xf32, #tpu.memory_space<vmem>>, vector<4x14xf32>,
    %c0_91 = arith.constant 0 : index
    %c0_92 = arith.constant 0 : index
    %c177 = arith.constant 177 : index
    %79 = vector.load %arg1[%c0_91, %c0_92, %c177] : memref<2x4x256xf32, #tpu.memory_space<vmem>>, vector<1x4x14xf32>
    %80 = vector.shape_cast %79 : vector<1x4x14xf32> to vector<4x14xf32>
    %c4_93 = arith.constant 4 : index
    %c154_94 = arith.constant 154 : index
    %81 = vector.load %arg5[%c4_93, %c154_94] : memref<36x196xf32, #tpu.memory_space<vmem>>, vector<4x14xf32>
    tpu.vector_store %arg5[%c4_93, %c154_94], %80 {strides = array<i32>} : memref<36x196xf32, #tpu.memory_space<vmem>>, vector<4x14xf32>,
    %c0_95 = arith.constant 0 : index
    %c0_96 = arith.constant 0 : index
    %c193 = arith.constant 193 : index
    %82 = vector.load %arg1[%c0_95, %c0_96, %c193] : memref<2x4x256xf32, #tpu.memory_space<vmem>>, vector<1x4x14xf32>
    %83 = vector.shape_cast %82 : vector<1x4x14xf32> to vector<4x14xf32>
    %c4_97 = arith.constant 4 : index
    %c168_98 = arith.constant 168 : index
    %84 = vector.load %arg5[%c4_97, %c168_98] : memref<36x196xf32, #tpu.memory_space<vmem>>, vector<4x14xf32>
    tpu.vector_store %arg5[%c4_97, %c168_98], %83 {strides = array<i32>} : memref<36x196xf32, #tpu.memory_space<vmem>>, vector<4x14xf32>,
    %c0_99 = arith.constant 0 : index
    %c0_100 = arith.constant 0 : index
    %c209 = arith.constant 209 : index
    %85 = vector.load %arg1[%c0_99, %c0_100, %c209] : memref<2x4x256xf32, #tpu.memory_space<vmem>>, vector<1x4x14xf32>
    %86 = vector.shape_cast %85 : vector<1x4x14xf32> to vector<4x14xf32>
    %c4_101 = arith.constant 4 : index
    %c182_102 = arith.constant 182 : index
    %87 = vector.load %arg5[%c4_101, %c182_102] : memref<36x196xf32, #tpu.memory_space<vmem>>, vector<4x14xf32>
    tpu.vector_store %arg5[%c4_101, %c182_102], %86 {strides = array<i32>} : memref<36x196xf32, #tpu.memory_space<vmem>>, vector<4x14xf32>,
    %c0_103 = arith.constant 0 : index
    %c0_104 = arith.constant 0 : index
    %c2 = arith.constant 2 : index
    %88 = vector.load %arg1[%c0_103, %c0_104, %c2] : memref<2x4x256xf32, #tpu.memory_space<vmem>>, vector<1x4x14xf32>
    %89 = vector.shape_cast %88 : vector<1x4x14xf32> to vector<4x14xf32>
    %c8 = arith.constant 8 : index
    %c0_105 = arith.constant 0 : index
    %90 = vector.load %arg5[%c8, %c0_105] : memref<36x196xf32, #tpu.memory_space<vmem>>, vector<4x14xf32>
    tpu.vector_store %arg5[%c8, %c0_105], %89 {strides = array<i32>} : memref<36x196xf32, #tpu.memory_space<vmem>>, vector<4x14xf32>,
    %c0_106 = arith.constant 0 : index
    %c0_107 = arith.constant 0 : index
    %c18 = arith.constant 18 : index
    %91 = vector.load %arg1[%c0_106, %c0_107, %c18] : memref<2x4x256xf32, #tpu.memory_space<vmem>>, vector<1x4x14xf32>
    %92 = vector.shape_cast %91 : vector<1x4x14xf32> to vector<4x14xf32>
    %c8_108 = arith.constant 8 : index
    %c14_109 = arith.constant 14 : index
    %93 = vector.load %arg5[%c8_108, %c14_109] : memref<36x196xf32, #tpu.memory_space<vmem>>, vector<4x14xf32>
    tpu.vector_store %arg5[%c8_108, %c14_109], %92 {strides = array<i32>} : memref<36x196xf32, #tpu.memory_space<vmem>>, vector<4x14xf32>,
    %c0_110 = arith.constant 0 : index
    %c0_111 = arith.constant 0 : index
    %c34 = arith.constant 34 : index
    %94 = vector.load %arg1[%c0_110, %c0_111, %c34] : memref<2x4x256xf32, #tpu.memory_space<vmem>>, vector<1x4x14xf32>
    %95 = vector.shape_cast %94 : vector<1x4x14xf32> to vector<4x14xf32>
    %c8_112 = arith.constant 8 : index
    %c28_113 = arith.constant 28 : index
    %96 = vector.load %arg5[%c8_112, %c28_113] : memref<36x196xf32, #tpu.memory_space<vmem>>, vector<4x14xf32>
    tpu.vector_store %arg5[%c8_112, %c28_113], %95 {strides = array<i32>} : memref<36x196xf32, #tpu.memory_space<vmem>>, vector<4x14xf32>,
    %c0_114 = arith.constant 0 : index
    %c0_115 = arith.constant 0 : index
    %c50 = arith.constant 50 : index
    %97 = vector.load %arg1[%c0_114, %c0_115, %c50] : memref<2x4x256xf32, #tpu.memory_space<vmem>>, vector<1x4x14xf32>
    %98 = vector.shape_cast %97 : vector<1x4x14xf32> to vector<4x14xf32>
    %c8_116 = arith.constant 8 : index
    %c42_117 = arith.constant 42 : index
    %99 = vector.load %arg5[%c8_116, %c42_117] : memref<36x196xf32, #tpu.memory_space<vmem>>, vector<4x14xf32>
    tpu.vector_store %arg5[%c8_116, %c42_117], %98 {strides = array<i32>} : memref<36x196xf32, #tpu.memory_space<vmem>>, vector<4x14xf32>,
    %c0_118 = arith.constant 0 : index
    %c0_119 = arith.constant 0 : index
    %c66 = arith.constant 66 : index
    %100 = vector.load %arg1[%c0_118, %c0_119, %c66] : memref<2x4x256xf32, #tpu.memory_space<vmem>>, vector<1x4x14xf32>
    %101 = vector.shape_cast %100 : vector<1x4x14xf32> to vector<4x14xf32>
    %c8_120 = arith.constant 8 : index
    %c56_121 = arith.constant 56 : index
    %102 = vector.load %arg5[%c8_120, %c56_121] : memref<36x196xf32, #tpu.memory_space<vmem>>, vector<4x14xf32>
    tpu.vector_store %arg5[%c8_120, %c56_121], %101 {strides = array<i32>} : memref<36x196xf32, #tpu.memory_space<vmem>>, vector<4x14xf32>,
    %c0_122 = arith.constant 0 : index
    %c0_123 = arith.constant 0 : index
    %c82 = arith.constant 82 : index
    %103 = vector.load %arg1[%c0_122, %c0_123, %c82] : memref<2x4x256xf32, #tpu.memory_space<vmem>>, vector<1x4x14xf32>
    %104 = vector.shape_cast %103 : vector<1x4x14xf32> to vector<4x14xf32>
    %c8_124 = arith.constant 8 : index
    %c70_125 = arith.constant 70 : index
    %105 = vector.load %arg5[%c8_124, %c70_125] : memref<36x196xf32, #tpu.memory_space<vmem>>, vector<4x14xf32>
    tpu.vector_store %arg5[%c8_124, %c70_125], %104 {strides = array<i32>} : memref<36x196xf32, #tpu.memory_space<vmem>>, vector<4x14xf32>,
    %c0_126 = arith.constant 0 : index
    %c0_127 = arith.constant 0 : index
    %c98_128 = arith.constant 98 : index
    %106 = vector.load %arg1[%c0_126, %c0_127, %c98_128] : memref<2x4x256xf32, #tpu.memory_space<vmem>>, vector<1x4x14xf32>
    %107 = vector.shape_cast %106 : vector<1x4x14xf32> to vector<4x14xf32>
    %c8_129 = arith.constant 8 : index
    %c84_130 = arith.constant 84 : index
    %108 = vector.load %arg5[%c8_129, %c84_130] : memref<36x196xf32, #tpu.memory_space<vmem>>, vector<4x14xf32>
    tpu.vector_store %arg5[%c8_129, %c84_130], %107 {strides = array<i32>} : memref<36x196xf32, #tpu.memory_space<vmem>>, vector<4x14xf32>,
    %c0_131 = arith.constant 0 : index
    %c0_132 = arith.constant 0 : index
    %c114 = arith.constant 114 : index
    %109 = vector.load %arg1[%c0_131, %c0_132, %c114] : memref<2x4x256xf32, #tpu.memory_space<vmem>>, vector<1x4x14xf32>
    %110 = vector.shape_cast %109 : vector<1x4x14xf32> to vector<4x14xf32>
    %c8_133 = arith.constant 8 : index
    %c98_134 = arith.constant 98 : index
    %111 = vector.load %arg5[%c8_133, %c98_134] : memref<36x196xf32, #tpu.memory_space<vmem>>, vector<4x14xf32>
    tpu.vector_store %arg5[%c8_133, %c98_134], %110 {strides = array<i32>} : memref<36x196xf32, #tpu.memory_space<vmem>>, vector<4x14xf32>,
    %c0_135 = arith.constant 0 : index
    %c0_136 = arith.constant 0 : index
    %c130 = arith.constant 130 : index
    %112 = vector.load %arg1[%c0_135, %c0_136, %c130] : memref<2x4x256xf32, #tpu.memory_space<vmem>>, vector<1x4x14xf32>
    %113 = vector.shape_cast %112 : vector<1x4x14xf32> to vector<4x14xf32>
    %c8_137 = arith.constant 8 : index
    %c112_138 = arith.constant 112 : index
    %114 = vector.load %arg5[%c8_137, %c112_138] : memref<36x196xf32, #tpu.memory_space<vmem>>, vector<4x14xf32>
    tpu.vector_store %arg5[%c8_137, %c112_138], %113 {strides = array<i32>} : memref<36x196xf32, #tpu.memory_space<vmem>>, vector<4x14xf32>,
    %c0_139 = arith.constant 0 : index
    %c0_140 = arith.constant 0 : index
    %c146 = arith.constant 146 : index
    %115 = vector.load %arg1[%c0_139, %c0_140, %c146] : memref<2x4x256xf32, #tpu.memory_space<vmem>>, vector<1x4x14xf32>
    %116 = vector.shape_cast %115 : vector<1x4x14xf32> to vector<4x14xf32>
    %c8_141 = arith.constant 8 : index
    %c126_142 = arith.constant 126 : index
    %117 = vector.load %arg5[%c8_141, %c126_142] : memref<36x196xf32, #tpu.memory_space<vmem>>, vector<4x14xf32>
    tpu.vector_store %arg5[%c8_141, %c126_142], %116 {strides = array<i32>} : memref<36x196xf32, #tpu.memory_space<vmem>>, vector<4x14xf32>,
    %c0_143 = arith.constant 0 : index
    %c0_144 = arith.constant 0 : index
    %c162 = arith.constant 162 : index
    %118 = vector.load %arg1[%c0_143, %c0_144, %c162] : memref<2x4x256xf32, #tpu.memory_space<vmem>>, vector<1x4x14xf32>
    %119 = vector.shape_cast %118 : vector<1x4x14xf32> to vector<4x14xf32>
    %c8_145 = arith.constant 8 : index
    %c140_146 = arith.constant 140 : index
    %120 = vector.load %arg5[%c8_145, %c140_146] : memref<36x196xf32, #tpu.memory_space<vmem>>, vector<4x14xf32>
    tpu.vector_store %arg5[%c8_145, %c140_146], %119 {strides = array<i32>} : memref<36x196xf32, #tpu.memory_space<vmem>>, vector<4x14xf32>,
    %c0_147 = arith.constant 0 : index
    %c0_148 = arith.constant 0 : index
    %c178 = arith.constant 178 : index
    %121 = vector.load %arg1[%c0_147, %c0_148, %c178] : memref<2x4x256xf32, #tpu.memory_space<vmem>>, vector<1x4x14xf32>
    %122 = vector.shape_cast %121 : vector<1x4x14xf32> to vector<4x14xf32>
    %c8_149 = arith.constant 8 : index
    %c154_150 = arith.constant 154 : index
    %123 = vector.load %arg5[%c8_149, %c154_150] : memref<36x196xf32, #tpu.memory_space<vmem>>, vector<4x14xf32>
    tpu.vector_store %arg5[%c8_149, %c154_150], %122 {strides = array<i32>} : memref<36x196xf32, #tpu.memory_space<vmem>>, vector<4x14xf32>,
    %c0_151 = arith.constant 0 : index
    %c0_152 = arith.constant 0 : index
    %c194 = arith.constant 194 : index
    %124 = vector.load %arg1[%c0_151, %c0_152, %c194] : memref<2x4x256xf32, #tpu.memory_space<vmem>>, vector<1x4x14xf32>
    %125 = vector.shape_cast %124 : vector<1x4x14xf32> to vector<4x14xf32>
    %c8_153 = arith.constant 8 : index
    %c168_154 = arith.constant 168 : index
    %126 = vector.load %arg5[%c8_153, %c168_154] : memref<36x196xf32, #tpu.memory_space<vmem>>, vector<4x14xf32>
    tpu.vector_store %arg5[%c8_153, %c168_154], %125 {strides = array<i32>} : memref<36x196xf32, #tpu.memory_space<vmem>>, vector<4x14xf32>,
    %c0_155 = arith.constant 0 : index
    %c0_156 = arith.constant 0 : index
    %c210 = arith.constant 210 : index
    %127 = vector.load %arg1[%c0_155, %c0_156, %c210] : memref<2x4x256xf32, #tpu.memory_space<vmem>>, vector<1x4x14xf32>
    %128 = vector.shape_cast %127 : vector<1x4x14xf32> to vector<4x14xf32>
    %c8_157 = arith.constant 8 : index
    %c182_158 = arith.constant 182 : index
    %129 = vector.load %arg5[%c8_157, %c182_158] : memref<36x196xf32, #tpu.memory_space<vmem>>, vector<4x14xf32>
    tpu.vector_store %arg5[%c8_157, %c182_158], %128 {strides = array<i32>} : memref<36x196xf32, #tpu.memory_space<vmem>>, vector<4x14xf32>,
    %c0_159 = arith.constant 0 : index
    %c0_160 = arith.constant 0 : index
    %c16_161 = arith.constant 16 : index
    %130 = vector.load %arg1[%c0_159, %c0_160, %c16_161] : memref<2x4x256xf32, #tpu.memory_space<vmem>>, vector<1x4x14xf32>
    %131 = vector.shape_cast %130 : vector<1x4x14xf32> to vector<4x14xf32>
    %c12 = arith.constant 12 : index
    %c0_162 = arith.constant 0 : index
    %132 = vector.load %arg5[%c12, %c0_162] : memref<36x196xf32, #tpu.memory_space<vmem>>, vector<4x14xf32>
    tpu.vector_store %arg5[%c12, %c0_162], %131 {strides = array<i32>} : memref<36x196xf32, #tpu.memory_space<vmem>>, vector<4x14xf32>,
    %c0_163 = arith.constant 0 : index
    %c0_164 = arith.constant 0 : index
    %c32_165 = arith.constant 32 : index
    %133 = vector.load %arg1[%c0_163, %c0_164, %c32_165] : memref<2x4x256xf32, #tpu.memory_space<vmem>>, vector<1x4x14xf32>
    %134 = vector.shape_cast %133 : vector<1x4x14xf32> to vector<4x14xf32>
    %c12_166 = arith.constant 12 : index
    %c14_167 = arith.constant 14 : index
    %135 = vector.load %arg5[%c12_166, %c14_167] : memref<36x196xf32, #tpu.memory_space<vmem>>, vector<4x14xf32>
    tpu.vector_store %arg5[%c12_166, %c14_167], %134 {strides = array<i32>} : memref<36x196xf32, #tpu.memory_space<vmem>>, vector<4x14xf32>,
    %c0_168 = arith.constant 0 : index
    %c0_169 = arith.constant 0 : index
    %c48_170 = arith.constant 48 : index
    %136 = vector.load %arg1[%c0_168, %c0_169, %c48_170] : memref<2x4x256xf32, #tpu.memory_space<vmem>>, vector<1x4x14xf32>
    %137 = vector.shape_cast %136 : vector<1x4x14xf32> to vector<4x14xf32>
    %c12_171 = arith.constant 12 : index
    %c28_172 = arith.constant 28 : index
    %138 = vector.load %arg5[%c12_171, %c28_172] : memref<36x196xf32, #tpu.memory_space<vmem>>, vector<4x14xf32>
    tpu.vector_store %arg5[%c12_171, %c28_172], %137 {strides = array<i32>} : memref<36x196xf32, #tpu.memory_space<vmem>>, vector<4x14xf32>,
    %c0_173 = arith.constant 0 : index
    %c0_174 = arith.constant 0 : index
    %c64_175 = arith.constant 64 : index
    %139 = vector.load %arg1[%c0_173, %c0_174, %c64_175] : memref<2x4x256xf32, #tpu.memory_space<vmem>>, vector<1x4x14xf32>
    %140 = vector.shape_cast %139 : vector<1x4x14xf32> to vector<4x14xf32>
    %c12_176 = arith.constant 12 : index
    %c42_177 = arith.constant 42 : index
    %141 = vector.load %arg5[%c12_176, %c42_177] : memref<36x196xf32, #tpu.memory_space<vmem>>, vector<4x14xf32>
    tpu.vector_store %arg5[%c12_176, %c42_177], %140 {strides = array<i32>} : memref<36x196xf32, #tpu.memory_space<vmem>>, vector<4x14xf32>,
    %c0_178 = arith.constant 0 : index
    %c0_179 = arith.constant 0 : index
    %c80_180 = arith.constant 80 : index
    %142 = vector.load %arg1[%c0_178, %c0_179, %c80_180] : memref<2x4x256xf32, #tpu.memory_space<vmem>>, vector<1x4x14xf32>
    %143 = vector.shape_cast %142 : vector<1x4x14xf32> to vector<4x14xf32>
    %c12_181 = arith.constant 12 : index
    %c56_182 = arith.constant 56 : index
    %144 = vector.load %arg5[%c12_181, %c56_182] : memref<36x196xf32, #tpu.memory_space<vmem>>, vector<4x14xf32>
    tpu.vector_store %arg5[%c12_181, %c56_182], %143 {strides = array<i32>} : memref<36x196xf32, #tpu.memory_space<vmem>>, vector<4x14xf32>,
    %c0_183 = arith.constant 0 : index
    %c0_184 = arith.constant 0 : index
    %c96_185 = arith.constant 96 : index
    %145 = vector.load %arg1[%c0_183, %c0_184, %c96_185] : memref<2x4x256xf32, #tpu.memory_space<vmem>>, vector<1x4x14xf32>
    %146 = vector.shape_cast %145 : vector<1x4x14xf32> to vector<4x14xf32>
    %c12_186 = arith.constant 12 : index
    %c70_187 = arith.constant 70 : index
    %147 = vector.load %arg5[%c12_186, %c70_187] : memref<36x196xf32, #tpu.memory_space<vmem>>, vector<4x14xf32>
    tpu.vector_store %arg5[%c12_186, %c70_187], %146 {strides = array<i32>} : memref<36x196xf32, #tpu.memory_space<vmem>>, vector<4x14xf32>,
    %c0_188 = arith.constant 0 : index
    %c0_189 = arith.constant 0 : index
    %c112_190 = arith.constant 112 : index
    %148 = vector.load %arg1[%c0_188, %c0_189, %c112_190] : memref<2x4x256xf32, #tpu.memory_space<vmem>>, vector<1x4x14xf32>
    %149 = vector.shape_cast %148 : vector<1x4x14xf32> to vector<4x14xf32>
    %c12_191 = arith.constant 12 : index
    %c84_192 = arith.constant 84 : index
    %150 = vector.load %arg5[%c12_191, %c84_192] : memref<36x196xf32, #tpu.memory_space<vmem>>, vector<4x14xf32>
    tpu.vector_store %arg5[%c12_191, %c84_192], %149 {strides = array<i32>} : memref<36x196xf32, #tpu.memory_space<vmem>>, vector<4x14xf32>,
    %c0_193 = arith.constant 0 : index
    %c0_194 = arith.constant 0 : index
    %c128_195 = arith.constant 128 : index
    %151 = vector.load %arg1[%c0_193, %c0_194, %c128_195] : memref<2x4x256xf32, #tpu.memory_space<vmem>>, vector<1x4x14xf32>
    %152 = vector.shape_cast %151 : vector<1x4x14xf32> to vector<4x14xf32>
    %c12_196 = arith.constant 12 : index
    %c98_197 = arith.constant 98 : index
    %153 = vector.load %arg5[%c12_196, %c98_197] : memref<36x196xf32, #tpu.memory_space<vmem>>, vector<4x14xf32>
    tpu.vector_store %arg5[%c12_196, %c98_197], %152 {strides = array<i32>} : memref<36x196xf32, #tpu.memory_space<vmem>>, vector<4x14xf32>,
    %c0_198 = arith.constant 0 : index
    %c0_199 = arith.constant 0 : index
    %c144_200 = arith.constant 144 : index
    %154 = vector.load %arg1[%c0_198, %c0_199, %c144_200] : memref<2x4x256xf32, #tpu.memory_space<vmem>>, vector<1x4x14xf32>
    %155 = vector.shape_cast %154 : vector<1x4x14xf32> to vector<4x14xf32>
    %c12_201 = arith.constant 12 : index
    %c112_202 = arith.constant 112 : index
    %156 = vector.load %arg5[%c12_201, %c112_202] : memref<36x196xf32, #tpu.memory_space<vmem>>, vector<4x14xf32>
    tpu.vector_store %arg5[%c12_201, %c112_202], %155 {strides = array<i32>} : memref<36x196xf32, #tpu.memory_space<vmem>>, vector<4x14xf32>,
    %c0_203 = arith.constant 0 : index
    %c0_204 = arith.constant 0 : index
    %c160_205 = arith.constant 160 : index
    %157 = vector.load %arg1[%c0_203, %c0_204, %c160_205] : memref<2x4x256xf32, #tpu.memory_space<vmem>>, vector<1x4x14xf32>
    %158 = vector.shape_cast %157 : vector<1x4x14xf32> to vector<4x14xf32>
    %c12_206 = arith.constant 12 : index
    %c126_207 = arith.constant 126 : index
    %159 = vector.load %arg5[%c12_206, %c126_207] : memref<36x196xf32, #tpu.memory_space<vmem>>, vector<4x14xf32>
    tpu.vector_store %arg5[%c12_206, %c126_207], %158 {strides = array<i32>} : memref<36x196xf32, #tpu.memory_space<vmem>>, vector<4x14xf32>,
    %c0_208 = arith.constant 0 : index
    %c0_209 = arith.constant 0 : index
    %c176_210 = arith.constant 176 : index
    %160 = vector.load %arg1[%c0_208, %c0_209, %c176_210] : memref<2x4x256xf32, #tpu.memory_space<vmem>>, vector<1x4x14xf32>
    %161 = vector.shape_cast %160 : vector<1x4x14xf32> to vector<4x14xf32>
    %c12_211 = arith.constant 12 : index
    %c140_212 = arith.constant 140 : index
    %162 = vector.load %arg5[%c12_211, %c140_212] : memref<36x196xf32, #tpu.memory_space<vmem>>, vector<4x14xf32>
    tpu.vector_store %arg5[%c12_211, %c140_212], %161 {strides = array<i32>} : memref<36x196xf32, #tpu.memory_space<vmem>>, vector<4x14xf32>,
    %c0_213 = arith.constant 0 : index
    %c0_214 = arith.constant 0 : index
    %c192_215 = arith.constant 192 : index
    %163 = vector.load %arg1[%c0_213, %c0_214, %c192_215] : memref<2x4x256xf32, #tpu.memory_space<vmem>>, vector<1x4x14xf32>
    %164 = vector.shape_cast %163 : vector<1x4x14xf32> to vector<4x14xf32>
    %c12_216 = arith.constant 12 : index
    %c154_217 = arith.constant 154 : index
    %165 = vector.load %arg5[%c12_216, %c154_217] : memref<36x196xf32, #tpu.memory_space<vmem>>, vector<4x14xf32>
    tpu.vector_store %arg5[%c12_216, %c154_217], %164 {strides = array<i32>} : memref<36x196xf32, #tpu.memory_space<vmem>>, vector<4x14xf32>,
    %c0_218 = arith.constant 0 : index
    %c0_219 = arith.constant 0 : index
    %c208_220 = arith.constant 208 : index
    %166 = vector.load %arg1[%c0_218, %c0_219, %c208_220] : memref<2x4x256xf32, #tpu.memory_space<vmem>>, vector<1x4x14xf32>
    %167 = vector.shape_cast %166 : vector<1x4x14xf32> to vector<4x14xf32>
    %c12_221 = arith.constant 12 : index
    %c168_222 = arith.constant 168 : index
    %168 = vector.load %arg5[%c12_221, %c168_222] : memref<36x196xf32, #tpu.memory_space<vmem>>, vector<4x14xf32>
    tpu.vector_store %arg5[%c12_221, %c168_222], %167 {strides = array<i32>} : memref<36x196xf32, #tpu.memory_space<vmem>>, vector<4x14xf32>,
    %c0_223 = arith.constant 0 : index
    %c0_224 = arith.constant 0 : index
    %c224 = arith.constant 224 : index
    %169 = vector.load %arg1[%c0_223, %c0_224, %c224] : memref<2x4x256xf32, #tpu.memory_space<vmem>>, vector<1x4x14xf32>
    %170 = vector.shape_cast %169 : vector<1x4x14xf32> to vector<4x14xf32>
    %c12_225 = arith.constant 12 : index
    %c182_226 = arith.constant 182 : index
    %171 = vector.load %arg5[%c12_225, %c182_226] : memref<36x196xf32, #tpu.memory_space<vmem>>, vector<4x14xf32>
    tpu.vector_store %arg5[%c12_225, %c182_226], %170 {strides = array<i32>} : memref<36x196xf32, #tpu.memory_space<vmem>>, vector<4x14xf32>,
    %c0_227 = arith.constant 0 : index
    %c0_228 = arith.constant 0 : index
    %c17_229 = arith.constant 17 : index
    %172 = vector.load %arg1[%c0_227, %c0_228, %c17_229] : memref<2x4x256xf32, #tpu.memory_space<vmem>>, vector<1x4x14xf32>
    %173 = vector.shape_cast %172 : vector<1x4x14xf32> to vector<4x14xf32>
    %c16_230 = arith.constant 16 : index
    %c0_231 = arith.constant 0 : index
    %174 = vector.load %arg5[%c16_230, %c0_231] : memref<36x196xf32, #tpu.memory_space<vmem>>, vector<4x14xf32>
    tpu.vector_store %arg5[%c16_230, %c0_231], %173 {strides = array<i32>} : memref<36x196xf32, #tpu.memory_space<vmem>>, vector<4x14xf32>,
    %c0_232 = arith.constant 0 : index
    %c0_233 = arith.constant 0 : index
    %c33_234 = arith.constant 33 : index
    %175 = vector.load %arg1[%c0_232, %c0_233, %c33_234] : memref<2x4x256xf32, #tpu.memory_space<vmem>>, vector<1x4x14xf32>
    %176 = vector.shape_cast %175 : vector<1x4x14xf32> to vector<4x14xf32>
    %c16_235 = arith.constant 16 : index
    %c14_236 = arith.constant 14 : index
    %177 = vector.load %arg5[%c16_235, %c14_236] : memref<36x196xf32, #tpu.memory_space<vmem>>, vector<4x14xf32>
    tpu.vector_store %arg5[%c16_235, %c14_236], %176 {strides = array<i32>} : memref<36x196xf32, #tpu.memory_space<vmem>>, vector<4x14xf32>,
    %c0_237 = arith.constant 0 : index
    %c0_238 = arith.constant 0 : index
    %c49_239 = arith.constant 49 : index
    %178 = vector.load %arg1[%c0_237, %c0_238, %c49_239] : memref<2x4x256xf32, #tpu.memory_space<vmem>>, vector<1x4x14xf32>
    %179 = vector.shape_cast %178 : vector<1x4x14xf32> to vector<4x14xf32>
    %c16_240 = arith.constant 16 : index
    %c28_241 = arith.constant 28 : index
    %180 = vector.load %arg5[%c16_240, %c28_241] : memref<36x196xf32, #tpu.memory_space<vmem>>, vector<4x14xf32>
    tpu.vector_store %arg5[%c16_240, %c28_241], %179 {strides = array<i32>} : memref<36x196xf32, #tpu.memory_space<vmem>>, vector<4x14xf32>,
    %c0_242 = arith.constant 0 : index
    %c0_243 = arith.constant 0 : index
    %c65_244 = arith.constant 65 : index
    %181 = vector.load %arg1[%c0_242, %c0_243, %c65_244] : memref<2x4x256xf32, #tpu.memory_space<vmem>>, vector<1x4x14xf32>
    %182 = vector.shape_cast %181 : vector<1x4x14xf32> to vector<4x14xf32>
    %c16_245 = arith.constant 16 : index
    %c42_246 = arith.constant 42 : index
    %183 = vector.load %arg5[%c16_245, %c42_246] : memref<36x196xf32, #tpu.memory_space<vmem>>, vector<4x14xf32>
    tpu.vector_store %arg5[%c16_245, %c42_246], %182 {strides = array<i32>} : memref<36x196xf32, #tpu.memory_space<vmem>>, vector<4x14xf32>,
    %c0_247 = arith.constant 0 : index
    %c0_248 = arith.constant 0 : index
    %c81_249 = arith.constant 81 : index
    %184 = vector.load %arg1[%c0_247, %c0_248, %c81_249] : memref<2x4x256xf32, #tpu.memory_space<vmem>>, vector<1x4x14xf32>
    %185 = vector.shape_cast %184 : vector<1x4x14xf32> to vector<4x14xf32>
    %c16_250 = arith.constant 16 : index
    %c56_251 = arith.constant 56 : index
    %186 = vector.load %arg5[%c16_250, %c56_251] : memref<36x196xf32, #tpu.memory_space<vmem>>, vector<4x14xf32>
    tpu.vector_store %arg5[%c16_250, %c56_251], %185 {strides = array<i32>} : memref<36x196xf32, #tpu.memory_space<vmem>>, vector<4x14xf32>,
    %c0_252 = arith.constant 0 : index
    %c0_253 = arith.constant 0 : index
    %c97_254 = arith.constant 97 : index
    %187 = vector.load %arg1[%c0_252, %c0_253, %c97_254] : memref<2x4x256xf32, #tpu.memory_space<vmem>>, vector<1x4x14xf32>
    %188 = vector.shape_cast %187 : vector<1x4x14xf32> to vector<4x14xf32>
    %c16_255 = arith.constant 16 : index
    %c70_256 = arith.constant 70 : index
    %189 = vector.load %arg5[%c16_255, %c70_256] : memref<36x196xf32, #tpu.memory_space<vmem>>, vector<4x14xf32>
    tpu.vector_store %arg5[%c16_255, %c70_256], %188 {strides = array<i32>} : memref<36x196xf32, #tpu.memory_space<vmem>>, vector<4x14xf32>,
    %c0_257 = arith.constant 0 : index
    %c0_258 = arith.constant 0 : index
    %c113_259 = arith.constant 113 : index
    %190 = vector.load %arg1[%c0_257, %c0_258, %c113_259] : memref<2x4x256xf32, #tpu.memory_space<vmem>>, vector<1x4x14xf32>
    %191 = vector.shape_cast %190 : vector<1x4x14xf32> to vector<4x14xf32>
    %c16_260 = arith.constant 16 : index
    %c84_261 = arith.constant 84 : index
    %192 = vector.load %arg5[%c16_260, %c84_261] : memref<36x196xf32, #tpu.memory_space<vmem>>, vector<4x14xf32>
    tpu.vector_store %arg5[%c16_260, %c84_261], %191 {strides = array<i32>} : memref<36x196xf32, #tpu.memory_space<vmem>>, vector<4x14xf32>,
    %c0_262 = arith.constant 0 : index
    %c0_263 = arith.constant 0 : index
    %c129_264 = arith.constant 129 : index
    %193 = vector.load %arg1[%c0_262, %c0_263, %c129_264] : memref<2x4x256xf32, #tpu.memory_space<vmem>>, vector<1x4x14xf32>
    %194 = vector.shape_cast %193 : vector<1x4x14xf32> to vector<4x14xf32>
    %c16_265 = arith.constant 16 : index
    %c98_266 = arith.constant 98 : index
    %195 = vector.load %arg5[%c16_265, %c98_266] : memref<36x196xf32, #tpu.memory_space<vmem>>, vector<4x14xf32>
    tpu.vector_store %arg5[%c16_265, %c98_266], %194 {strides = array<i32>} : memref<36x196xf32, #tpu.memory_space<vmem>>, vector<4x14xf32>,
    %c0_267 = arith.constant 0 : index
    %c0_268 = arith.constant 0 : index
    %c145_269 = arith.constant 145 : index
    %196 = vector.load %arg1[%c0_267, %c0_268, %c145_269] : memref<2x4x256xf32, #tpu.memory_space<vmem>>, vector<1x4x14xf32>
    %197 = vector.shape_cast %196 : vector<1x4x14xf32> to vector<4x14xf32>
    %c16_270 = arith.constant 16 : index
    %c112_271 = arith.constant 112 : index
    %198 = vector.load %arg5[%c16_270, %c112_271] : memref<36x196xf32, #tpu.memory_space<vmem>>, vector<4x14xf32>
    tpu.vector_store %arg5[%c16_270, %c112_271], %197 {strides = array<i32>} : memref<36x196xf32, #tpu.memory_space<vmem>>, vector<4x14xf32>,
    %c0_272 = arith.constant 0 : index
    %c0_273 = arith.constant 0 : index
    %c161_274 = arith.constant 161 : index
    %199 = vector.load %arg1[%c0_272, %c0_273, %c161_274] : memref<2x4x256xf32, #tpu.memory_space<vmem>>, vector<1x4x14xf32>
    %200 = vector.shape_cast %199 : vector<1x4x14xf32> to vector<4x14xf32>
    %c16_275 = arith.constant 16 : index
    %c126_276 = arith.constant 126 : index
    %201 = vector.load %arg5[%c16_275, %c126_276] : memref<36x196xf32, #tpu.memory_space<vmem>>, vector<4x14xf32>
    tpu.vector_store %arg5[%c16_275, %c126_276], %200 {strides = array<i32>} : memref<36x196xf32, #tpu.memory_space<vmem>>, vector<4x14xf32>,
    %c0_277 = arith.constant 0 : index
    %c0_278 = arith.constant 0 : index
    %c177_279 = arith.constant 177 : index
    %202 = vector.load %arg1[%c0_277, %c0_278, %c177_279] : memref<2x4x256xf32, #tpu.memory_space<vmem>>, vector<1x4x14xf32>
    %203 = vector.shape_cast %202 : vector<1x4x14xf32> to vector<4x14xf32>
    %c16_280 = arith.constant 16 : index
    %c140_281 = arith.constant 140 : index
    %204 = vector.load %arg5[%c16_280, %c140_281] : memref<36x196xf32, #tpu.memory_space<vmem>>, vector<4x14xf32>
    tpu.vector_store %arg5[%c16_280, %c140_281], %203 {strides = array<i32>} : memref<36x196xf32, #tpu.memory_space<vmem>>, vector<4x14xf32>,
    %c0_282 = arith.constant 0 : index
    %c0_283 = arith.constant 0 : index
    %c193_284 = arith.constant 193 : index
    %205 = vector.load %arg1[%c0_282, %c0_283, %c193_284] : memref<2x4x256xf32, #tpu.memory_space<vmem>>, vector<1x4x14xf32>
    %206 = vector.shape_cast %205 : vector<1x4x14xf32> to vector<4x14xf32>
    %c16_285 = arith.constant 16 : index
    %c154_286 = arith.constant 154 : index
    %207 = vector.load %arg5[%c16_285, %c154_286] : memref<36x196xf32, #tpu.memory_space<vmem>>, vector<4x14xf32>
    tpu.vector_store %arg5[%c16_285, %c154_286], %206 {strides = array<i32>} : memref<36x196xf32, #tpu.memory_space<vmem>>, vector<4x14xf32>,
    %c0_287 = arith.constant 0 : index
    %c0_288 = arith.constant 0 : index
    %c209_289 = arith.constant 209 : index
    %208 = vector.load %arg1[%c0_287, %c0_288, %c209_289] : memref<2x4x256xf32, #tpu.memory_space<vmem>>, vector<1x4x14xf32>
    %209 = vector.shape_cast %208 : vector<1x4x14xf32> to vector<4x14xf32>
    %c16_290 = arith.constant 16 : index
    %c168_291 = arith.constant 168 : index
    %210 = vector.load %arg5[%c16_290, %c168_291] : memref<36x196xf32, #tpu.memory_space<vmem>>, vector<4x14xf32>
    tpu.vector_store %arg5[%c16_290, %c168_291], %209 {strides = array<i32>} : memref<36x196xf32, #tpu.memory_space<vmem>>, vector<4x14xf32>,
    %c0_292 = arith.constant 0 : index
    %c0_293 = arith.constant 0 : index
    %c225 = arith.constant 225 : index
    %211 = vector.load %arg1[%c0_292, %c0_293, %c225] : memref<2x4x256xf32, #tpu.memory_space<vmem>>, vector<1x4x14xf32>
    %212 = vector.shape_cast %211 : vector<1x4x14xf32> to vector<4x14xf32>
    %c16_294 = arith.constant 16 : index
    %c182_295 = arith.constant 182 : index
    %213 = vector.load %arg5[%c16_294, %c182_295] : memref<36x196xf32, #tpu.memory_space<vmem>>, vector<4x14xf32>
    tpu.vector_store %arg5[%c16_294, %c182_295], %212 {strides = array<i32>} : memref<36x196xf32, #tpu.memory_space<vmem>>, vector<4x14xf32>,
    %c0_296 = arith.constant 0 : index
    %c0_297 = arith.constant 0 : index
    %c18_298 = arith.constant 18 : index
    %214 = vector.load %arg1[%c0_296, %c0_297, %c18_298] : memref<2x4x256xf32, #tpu.memory_space<vmem>>, vector<1x4x14xf32>
    %215 = vector.shape_cast %214 : vector<1x4x14xf32> to vector<4x14xf32>
    %c20 = arith.constant 20 : index
    %c0_299 = arith.constant 0 : index
    %216 = vector.load %arg5[%c20, %c0_299] : memref<36x196xf32, #tpu.memory_space<vmem>>, vector<4x14xf32>
    tpu.vector_store %arg5[%c20, %c0_299], %215 {strides = array<i32>} : memref<36x196xf32, #tpu.memory_space<vmem>>, vector<4x14xf32>,
    %c0_300 = arith.constant 0 : index
    %c0_301 = arith.constant 0 : index
    %c34_302 = arith.constant 34 : index
    %217 = vector.load %arg1[%c0_300, %c0_301, %c34_302] : memref<2x4x256xf32, #tpu.memory_space<vmem>>, vector<1x4x14xf32>
    %218 = vector.shape_cast %217 : vector<1x4x14xf32> to vector<4x14xf32>
    %c20_303 = arith.constant 20 : index
    %c14_304 = arith.constant 14 : index
    %219 = vector.load %arg5[%c20_303, %c14_304] : memref<36x196xf32, #tpu.memory_space<vmem>>, vector<4x14xf32>
    tpu.vector_store %arg5[%c20_303, %c14_304], %218 {strides = array<i32>} : memref<36x196xf32, #tpu.memory_space<vmem>>, vector<4x14xf32>,
    %c0_305 = arith.constant 0 : index
    %c0_306 = arith.constant 0 : index
    %c50_307 = arith.constant 50 : index
    %220 = vector.load %arg1[%c0_305, %c0_306, %c50_307] : memref<2x4x256xf32, #tpu.memory_space<vmem>>, vector<1x4x14xf32>
    %221 = vector.shape_cast %220 : vector<1x4x14xf32> to vector<4x14xf32>
    %c20_308 = arith.constant 20 : index
    %c28_309 = arith.constant 28 : index
    %222 = vector.load %arg5[%c20_308, %c28_309] : memref<36x196xf32, #tpu.memory_space<vmem>>, vector<4x14xf32>
    tpu.vector_store %arg5[%c20_308, %c28_309], %221 {strides = array<i32>} : memref<36x196xf32, #tpu.memory_space<vmem>>, vector<4x14xf32>,
    %c0_310 = arith.constant 0 : index
    %c0_311 = arith.constant 0 : index
    %c66_312 = arith.constant 66 : index
    %223 = vector.load %arg1[%c0_310, %c0_311, %c66_312] : memref<2x4x256xf32, #tpu.memory_space<vmem>>, vector<1x4x14xf32>
    %224 = vector.shape_cast %223 : vector<1x4x14xf32> to vector<4x14xf32>
    %c20_313 = arith.constant 20 : index
    %c42_314 = arith.constant 42 : index
    %225 = vector.load %arg5[%c20_313, %c42_314] : memref<36x196xf32, #tpu.memory_space<vmem>>, vector<4x14xf32>
    tpu.vector_store %arg5[%c20_313, %c42_314], %224 {strides = array<i32>} : memref<36x196xf32, #tpu.memory_space<vmem>>, vector<4x14xf32>,
    %c0_315 = arith.constant 0 : index
    %c0_316 = arith.constant 0 : index
    %c82_317 = arith.constant 82 : index
    %226 = vector.load %arg1[%c0_315, %c0_316, %c82_317] : memref<2x4x256xf32, #tpu.memory_space<vmem>>, vector<1x4x14xf32>
    %227 = vector.shape_cast %226 : vector<1x4x14xf32> to vector<4x14xf32>
    %c20_318 = arith.constant 20 : index
    %c56_319 = arith.constant 56 : index
    %228 = vector.load %arg5[%c20_318, %c56_319] : memref<36x196xf32, #tpu.memory_space<vmem>>, vector<4x14xf32>
    tpu.vector_store %arg5[%c20_318, %c56_319], %227 {strides = array<i32>} : memref<36x196xf32, #tpu.memory_space<vmem>>, vector<4x14xf32>,
    %c0_320 = arith.constant 0 : index
    %c0_321 = arith.constant 0 : index
    %c98_322 = arith.constant 98 : index
    %229 = vector.load %arg1[%c0_320, %c0_321, %c98_322] : memref<2x4x256xf32, #tpu.memory_space<vmem>>, vector<1x4x14xf32>
    %230 = vector.shape_cast %229 : vector<1x4x14xf32> to vector<4x14xf32>
    %c20_323 = arith.constant 20 : index
    %c70_324 = arith.constant 70 : index
    %231 = vector.load %arg5[%c20_323, %c70_324] : memref<36x196xf32, #tpu.memory_space<vmem>>, vector<4x14xf32>
    tpu.vector_store %arg5[%c20_323, %c70_324], %230 {strides = array<i32>} : memref<36x196xf32, #tpu.memory_space<vmem>>, vector<4x14xf32>,
    %c0_325 = arith.constant 0 : index
    %c0_326 = arith.constant 0 : index
    %c114_327 = arith.constant 114 : index
    %232 = vector.load %arg1[%c0_325, %c0_326, %c114_327] : memref<2x4x256xf32, #tpu.memory_space<vmem>>, vector<1x4x14xf32>
    %233 = vector.shape_cast %232 : vector<1x4x14xf32> to vector<4x14xf32>
    %c20_328 = arith.constant 20 : index
    %c84_329 = arith.constant 84 : index
    %234 = vector.load %arg5[%c20_328, %c84_329] : memref<36x196xf32, #tpu.memory_space<vmem>>, vector<4x14xf32>
    tpu.vector_store %arg5[%c20_328, %c84_329], %233 {strides = array<i32>} : memref<36x196xf32, #tpu.memory_space<vmem>>, vector<4x14xf32>,
    %c0_330 = arith.constant 0 : index
    %c0_331 = arith.constant 0 : index
    %c130_332 = arith.constant 130 : index
    %235 = vector.load %arg1[%c0_330, %c0_331, %c130_332] : memref<2x4x256xf32, #tpu.memory_space<vmem>>, vector<1x4x14xf32>
    %236 = vector.shape_cast %235 : vector<1x4x14xf32> to vector<4x14xf32>
    %c20_333 = arith.constant 20 : index
    %c98_334 = arith.constant 98 : index
    %237 = vector.load %arg5[%c20_333, %c98_334] : memref<36x196xf32, #tpu.memory_space<vmem>>, vector<4x14xf32>
    tpu.vector_store %arg5[%c20_333, %c98_334], %236 {strides = array<i32>} : memref<36x196xf32, #tpu.memory_space<vmem>>, vector<4x14xf32>,
    %c0_335 = arith.constant 0 : index
    %c0_336 = arith.constant 0 : index
    %c146_337 = arith.constant 146 : index
    %238 = vector.load %arg1[%c0_335, %c0_336, %c146_337] : memref<2x4x256xf32, #tpu.memory_space<vmem>>, vector<1x4x14xf32>
    %239 = vector.shape_cast %238 : vector<1x4x14xf32> to vector<4x14xf32>
    %c20_338 = arith.constant 20 : index
    %c112_339 = arith.constant 112 : index
    %240 = vector.load %arg5[%c20_338, %c112_339] : memref<36x196xf32, #tpu.memory_space<vmem>>, vector<4x14xf32>
    tpu.vector_store %arg5[%c20_338, %c112_339], %239 {strides = array<i32>} : memref<36x196xf32, #tpu.memory_space<vmem>>, vector<4x14xf32>,
    %c0_340 = arith.constant 0 : index
    %c0_341 = arith.constant 0 : index
    %c162_342 = arith.constant 162 : index
    %241 = vector.load %arg1[%c0_340, %c0_341, %c162_342] : memref<2x4x256xf32, #tpu.memory_space<vmem>>, vector<1x4x14xf32>
    %242 = vector.shape_cast %241 : vector<1x4x14xf32> to vector<4x14xf32>
    %c20_343 = arith.constant 20 : index
    %c126_344 = arith.constant 126 : index
    %243 = vector.load %arg5[%c20_343, %c126_344] : memref<36x196xf32, #tpu.memory_space<vmem>>, vector<4x14xf32>
    tpu.vector_store %arg5[%c20_343, %c126_344], %242 {strides = array<i32>} : memref<36x196xf32, #tpu.memory_space<vmem>>, vector<4x14xf32>,
    %c0_345 = arith.constant 0 : index
    %c0_346 = arith.constant 0 : index
    %c178_347 = arith.constant 178 : index
    %244 = vector.load %arg1[%c0_345, %c0_346, %c178_347] : memref<2x4x256xf32, #tpu.memory_space<vmem>>, vector<1x4x14xf32>
    %245 = vector.shape_cast %244 : vector<1x4x14xf32> to vector<4x14xf32>
    %c20_348 = arith.constant 20 : index
    %c140_349 = arith.constant 140 : index
    %246 = vector.load %arg5[%c20_348, %c140_349] : memref<36x196xf32, #tpu.memory_space<vmem>>, vector<4x14xf32>
    tpu.vector_store %arg5[%c20_348, %c140_349], %245 {strides = array<i32>} : memref<36x196xf32, #tpu.memory_space<vmem>>, vector<4x14xf32>,
    %c0_350 = arith.constant 0 : index
    %c0_351 = arith.constant 0 : index
    %c194_352 = arith.constant 194 : index
    %247 = vector.load %arg1[%c0_350, %c0_351, %c194_352] : memref<2x4x256xf32, #tpu.memory_space<vmem>>, vector<1x4x14xf32>
    %248 = vector.shape_cast %247 : vector<1x4x14xf32> to vector<4x14xf32>
    %c20_353 = arith.constant 20 : index
    %c154_354 = arith.constant 154 : index
    %249 = vector.load %arg5[%c20_353, %c154_354] : memref<36x196xf32, #tpu.memory_space<vmem>>, vector<4x14xf32>
    tpu.vector_store %arg5[%c20_353, %c154_354], %248 {strides = array<i32>} : memref<36x196xf32, #tpu.memory_space<vmem>>, vector<4x14xf32>,
    %c0_355 = arith.constant 0 : index
    %c0_356 = arith.constant 0 : index
    %c210_357 = arith.constant 210 : index
    %250 = vector.load %arg1[%c0_355, %c0_356, %c210_357] : memref<2x4x256xf32, #tpu.memory_space<vmem>>, vector<1x4x14xf32>
    %251 = vector.shape_cast %250 : vector<1x4x14xf32> to vector<4x14xf32>
    %c20_358 = arith.constant 20 : index
    %c168_359 = arith.constant 168 : index
    %252 = vector.load %arg5[%c20_358, %c168_359] : memref<36x196xf32, #tpu.memory_space<vmem>>, vector<4x14xf32>
    tpu.vector_store %arg5[%c20_358, %c168_359], %251 {strides = array<i32>} : memref<36x196xf32, #tpu.memory_space<vmem>>, vector<4x14xf32>,
    %c0_360 = arith.constant 0 : index
    %c0_361 = arith.constant 0 : index
    %c226 = arith.constant 226 : index
    %253 = vector.load %arg1[%c0_360, %c0_361, %c226] : memref<2x4x256xf32, #tpu.memory_space<vmem>>, vector<1x4x14xf32>
    %254 = vector.shape_cast %253 : vector<1x4x14xf32> to vector<4x14xf32>
    %c20_362 = arith.constant 20 : index
    %c182_363 = arith.constant 182 : index
    %255 = vector.load %arg5[%c20_362, %c182_363] : memref<36x196xf32, #tpu.memory_space<vmem>>, vector<4x14xf32>
    tpu.vector_store %arg5[%c20_362, %c182_363], %254 {strides = array<i32>} : memref<36x196xf32, #tpu.memory_space<vmem>>, vector<4x14xf32>,
    %c0_364 = arith.constant 0 : index
    %c0_365 = arith.constant 0 : index
    %c32_366 = arith.constant 32 : index
    %256 = vector.load %arg1[%c0_364, %c0_365, %c32_366] : memref<2x4x256xf32, #tpu.memory_space<vmem>>, vector<1x4x14xf32>
    %257 = vector.shape_cast %256 : vector<1x4x14xf32> to vector<4x14xf32>
    %c24 = arith.constant 24 : index
    %c0_367 = arith.constant 0 : index
    %258 = vector.load %arg5[%c24, %c0_367] : memref<36x196xf32, #tpu.memory_space<vmem>>, vector<4x14xf32>
    tpu.vector_store %arg5[%c24, %c0_367], %257 {strides = array<i32>} : memref<36x196xf32, #tpu.memory_space<vmem>>, vector<4x14xf32>,
    %c0_368 = arith.constant 0 : index
    %c0_369 = arith.constant 0 : index
    %c48_370 = arith.constant 48 : index
    %259 = vector.load %arg1[%c0_368, %c0_369, %c48_370] : memref<2x4x256xf32, #tpu.memory_space<vmem>>, vector<1x4x14xf32>
    %260 = vector.shape_cast %259 : vector<1x4x14xf32> to vector<4x14xf32>
    %c24_371 = arith.constant 24 : index
    %c14_372 = arith.constant 14 : index
    %261 = vector.load %arg5[%c24_371, %c14_372] : memref<36x196xf32, #tpu.memory_space<vmem>>, vector<4x14xf32>
    tpu.vector_store %arg5[%c24_371, %c14_372], %260 {strides = array<i32>} : memref<36x196xf32, #tpu.memory_space<vmem>>, vector<4x14xf32>,
    %c0_373 = arith.constant 0 : index
    %c0_374 = arith.constant 0 : index
    %c64_375 = arith.constant 64 : index
    %262 = vector.load %arg1[%c0_373, %c0_374, %c64_375] : memref<2x4x256xf32, #tpu.memory_space<vmem>>, vector<1x4x14xf32>
    %263 = vector.shape_cast %262 : vector<1x4x14xf32> to vector<4x14xf32>
    %c24_376 = arith.constant 24 : index
    %c28_377 = arith.constant 28 : index
    %264 = vector.load %arg5[%c24_376, %c28_377] : memref<36x196xf32, #tpu.memory_space<vmem>>, vector<4x14xf32>
    tpu.vector_store %arg5[%c24_376, %c28_377], %263 {strides = array<i32>} : memref<36x196xf32, #tpu.memory_space<vmem>>, vector<4x14xf32>,
    %c0_378 = arith.constant 0 : index
    %c0_379 = arith.constant 0 : index
    %c80_380 = arith.constant 80 : index
    %265 = vector.load %arg1[%c0_378, %c0_379, %c80_380] : memref<2x4x256xf32, #tpu.memory_space<vmem>>, vector<1x4x14xf32>
    %266 = vector.shape_cast %265 : vector<1x4x14xf32> to vector<4x14xf32>
    %c24_381 = arith.constant 24 : index
    %c42_382 = arith.constant 42 : index
    %267 = vector.load %arg5[%c24_381, %c42_382] : memref<36x196xf32, #tpu.memory_space<vmem>>, vector<4x14xf32>
    tpu.vector_store %arg5[%c24_381, %c42_382], %266 {strides = array<i32>} : memref<36x196xf32, #tpu.memory_space<vmem>>, vector<4x14xf32>,
    %c0_383 = arith.constant 0 : index
    %c0_384 = arith.constant 0 : index
    %c96_385 = arith.constant 96 : index
    %268 = vector.load %arg1[%c0_383, %c0_384, %c96_385] : memref<2x4x256xf32, #tpu.memory_space<vmem>>, vector<1x4x14xf32>
    %269 = vector.shape_cast %268 : vector<1x4x14xf32> to vector<4x14xf32>
    %c24_386 = arith.constant 24 : index
    %c56_387 = arith.constant 56 : index
    %270 = vector.load %arg5[%c24_386, %c56_387] : memref<36x196xf32, #tpu.memory_space<vmem>>, vector<4x14xf32>
    tpu.vector_store %arg5[%c24_386, %c56_387], %269 {strides = array<i32>} : memref<36x196xf32, #tpu.memory_space<vmem>>, vector<4x14xf32>,
    %c0_388 = arith.constant 0 : index
    %c0_389 = arith.constant 0 : index
    %c112_390 = arith.constant 112 : index
    %271 = vector.load %arg1[%c0_388, %c0_389, %c112_390] : memref<2x4x256xf32, #tpu.memory_space<vmem>>, vector<1x4x14xf32>
    %272 = vector.shape_cast %271 : vector<1x4x14xf32> to vector<4x14xf32>
    %c24_391 = arith.constant 24 : index
    %c70_392 = arith.constant 70 : index
    %273 = vector.load %arg5[%c24_391, %c70_392] : memref<36x196xf32, #tpu.memory_space<vmem>>, vector<4x14xf32>
    tpu.vector_store %arg5[%c24_391, %c70_392], %272 {strides = array<i32>} : memref<36x196xf32, #tpu.memory_space<vmem>>, vector<4x14xf32>,
    %c0_393 = arith.constant 0 : index
    %c0_394 = arith.constant 0 : index
    %c128_395 = arith.constant 128 : index
    %274 = vector.load %arg1[%c0_393, %c0_394, %c128_395] : memref<2x4x256xf32, #tpu.memory_space<vmem>>, vector<1x4x14xf32>
    %275 = vector.shape_cast %274 : vector<1x4x14xf32> to vector<4x14xf32>
    %c24_396 = arith.constant 24 : index
    %c84_397 = arith.constant 84 : index
    %276 = vector.load %arg5[%c24_396, %c84_397] : memref<36x196xf32, #tpu.memory_space<vmem>>, vector<4x14xf32>
    tpu.vector_store %arg5[%c24_396, %c84_397], %275 {strides = array<i32>} : memref<36x196xf32, #tpu.memory_space<vmem>>, vector<4x14xf32>,
    %c0_398 = arith.constant 0 : index
    %c0_399 = arith.constant 0 : index
    %c144_400 = arith.constant 144 : index
    %277 = vector.load %arg1[%c0_398, %c0_399, %c144_400] : memref<2x4x256xf32, #tpu.memory_space<vmem>>, vector<1x4x14xf32>
    %278 = vector.shape_cast %277 : vector<1x4x14xf32> to vector<4x14xf32>
    %c24_401 = arith.constant 24 : index
    %c98_402 = arith.constant 98 : index
    %279 = vector.load %arg5[%c24_401, %c98_402] : memref<36x196xf32, #tpu.memory_space<vmem>>, vector<4x14xf32>
    tpu.vector_store %arg5[%c24_401, %c98_402], %278 {strides = array<i32>} : memref<36x196xf32, #tpu.memory_space<vmem>>, vector<4x14xf32>,
    %c0_403 = arith.constant 0 : index
    %c0_404 = arith.constant 0 : index
    %c160_405 = arith.constant 160 : index
    %280 = vector.load %arg1[%c0_403, %c0_404, %c160_405] : memref<2x4x256xf32, #tpu.memory_space<vmem>>, vector<1x4x14xf32>
    %281 = vector.shape_cast %280 : vector<1x4x14xf32> to vector<4x14xf32>
    %c24_406 = arith.constant 24 : index
    %c112_407 = arith.constant 112 : index
    %282 = vector.load %arg5[%c24_406, %c112_407] : memref<36x196xf32, #tpu.memory_space<vmem>>, vector<4x14xf32>
    tpu.vector_store %arg5[%c24_406, %c112_407], %281 {strides = array<i32>} : memref<36x196xf32, #tpu.memory_space<vmem>>, vector<4x14xf32>,
    %c0_408 = arith.constant 0 : index
    %c0_409 = arith.constant 0 : index
    %c176_410 = arith.constant 176 : index
    %283 = vector.load %arg1[%c0_408, %c0_409, %c176_410] : memref<2x4x256xf32, #tpu.memory_space<vmem>>, vector<1x4x14xf32>
    %284 = vector.shape_cast %283 : vector<1x4x14xf32> to vector<4x14xf32>
    %c24_411 = arith.constant 24 : index
    %c126_412 = arith.constant 126 : index
    %285 = vector.load %arg5[%c24_411, %c126_412] : memref<36x196xf32, #tpu.memory_space<vmem>>, vector<4x14xf32>
    tpu.vector_store %arg5[%c24_411, %c126_412], %284 {strides = array<i32>} : memref<36x196xf32, #tpu.memory_space<vmem>>, vector<4x14xf32>,
    %c0_413 = arith.constant 0 : index
    %c0_414 = arith.constant 0 : index
    %c192_415 = arith.constant 192 : index
    %286 = vector.load %arg1[%c0_413, %c0_414, %c192_415] : memref<2x4x256xf32, #tpu.memory_space<vmem>>, vector<1x4x14xf32>
    %287 = vector.shape_cast %286 : vector<1x4x14xf32> to vector<4x14xf32>
    %c24_416 = arith.constant 24 : index
    %c140_417 = arith.constant 140 : index
    %288 = vector.load %arg5[%c24_416, %c140_417] : memref<36x196xf32, #tpu.memory_space<vmem>>, vector<4x14xf32>
    tpu.vector_store %arg5[%c24_416, %c140_417], %287 {strides = array<i32>} : memref<36x196xf32, #tpu.memory_space<vmem>>, vector<4x14xf32>,
    %c0_418 = arith.constant 0 : index
    %c0_419 = arith.constant 0 : index
    %c208_420 = arith.constant 208 : index
    %289 = vector.load %arg1[%c0_418, %c0_419, %c208_420] : memref<2x4x256xf32, #tpu.memory_space<vmem>>, vector<1x4x14xf32>
    %290 = vector.shape_cast %289 : vector<1x4x14xf32> to vector<4x14xf32>
    %c24_421 = arith.constant 24 : index
    %c154_422 = arith.constant 154 : index
    %291 = vector.load %arg5[%c24_421, %c154_422] : memref<36x196xf32, #tpu.memory_space<vmem>>, vector<4x14xf32>
    tpu.vector_store %arg5[%c24_421, %c154_422], %290 {strides = array<i32>} : memref<36x196xf32, #tpu.memory_space<vmem>>, vector<4x14xf32>,
    %c0_423 = arith.constant 0 : index
    %c0_424 = arith.constant 0 : index
    %c224_425 = arith.constant 224 : index
    %292 = vector.load %arg1[%c0_423, %c0_424, %c224_425] : memref<2x4x256xf32, #tpu.memory_space<vmem>>, vector<1x4x14xf32>
    %293 = vector.shape_cast %292 : vector<1x4x14xf32> to vector<4x14xf32>
    %c24_426 = arith.constant 24 : index
    %c168_427 = arith.constant 168 : index
    %294 = vector.load %arg5[%c24_426, %c168_427] : memref<36x196xf32, #tpu.memory_space<vmem>>, vector<4x14xf32>
    tpu.vector_store %arg5[%c24_426, %c168_427], %293 {strides = array<i32>} : memref<36x196xf32, #tpu.memory_space<vmem>>, vector<4x14xf32>,
    %c0_428 = arith.constant 0 : index
    %c0_429 = arith.constant 0 : index
    %c240 = arith.constant 240 : index
    %295 = vector.load %arg1[%c0_428, %c0_429, %c240] : memref<2x4x256xf32, #tpu.memory_space<vmem>>, vector<1x4x14xf32>
    %296 = vector.shape_cast %295 : vector<1x4x14xf32> to vector<4x14xf32>
    %c24_430 = arith.constant 24 : index
    %c182_431 = arith.constant 182 : index
    %297 = vector.load %arg5[%c24_430, %c182_431] : memref<36x196xf32, #tpu.memory_space<vmem>>, vector<4x14xf32>
    tpu.vector_store %arg5[%c24_430, %c182_431], %296 {strides = array<i32>} : memref<36x196xf32, #tpu.memory_space<vmem>>, vector<4x14xf32>,
    %c0_432 = arith.constant 0 : index
    %c0_433 = arith.constant 0 : index
    %c33_434 = arith.constant 33 : index
    %298 = vector.load %arg1[%c0_432, %c0_433, %c33_434] : memref<2x4x256xf32, #tpu.memory_space<vmem>>, vector<1x4x14xf32>
    %299 = vector.shape_cast %298 : vector<1x4x14xf32> to vector<4x14xf32>
    %c28_435 = arith.constant 28 : index
    %c0_436 = arith.constant 0 : index
    %300 = vector.load %arg5[%c28_435, %c0_436] : memref<36x196xf32, #tpu.memory_space<vmem>>, vector<4x14xf32>
    tpu.vector_store %arg5[%c28_435, %c0_436], %299 {strides = array<i32>} : memref<36x196xf32, #tpu.memory_space<vmem>>, vector<4x14xf32>,
    %c0_437 = arith.constant 0 : index
    %c0_438 = arith.constant 0 : index
    %c49_439 = arith.constant 49 : index
    %301 = vector.load %arg1[%c0_437, %c0_438, %c49_439] : memref<2x4x256xf32, #tpu.memory_space<vmem>>, vector<1x4x14xf32>
    %302 = vector.shape_cast %301 : vector<1x4x14xf32> to vector<4x14xf32>
    %c28_440 = arith.constant 28 : index
    %c14_441 = arith.constant 14 : index
    %303 = vector.load %arg5[%c28_440, %c14_441] : memref<36x196xf32, #tpu.memory_space<vmem>>, vector<4x14xf32>
    tpu.vector_store %arg5[%c28_440, %c14_441], %302 {strides = array<i32>} : memref<36x196xf32, #tpu.memory_space<vmem>>, vector<4x14xf32>,
    %c0_442 = arith.constant 0 : index
    %c0_443 = arith.constant 0 : index
    %c65_444 = arith.constant 65 : index
    %304 = vector.load %arg1[%c0_442, %c0_443, %c65_444] : memref<2x4x256xf32, #tpu.memory_space<vmem>>, vector<1x4x14xf32>
    %305 = vector.shape_cast %304 : vector<1x4x14xf32> to vector<4x14xf32>
    %c28_445 = arith.constant 28 : index
    %c28_446 = arith.constant 28 : index
    %306 = vector.load %arg5[%c28_445, %c28_446] : memref<36x196xf32, #tpu.memory_space<vmem>>, vector<4x14xf32>
    tpu.vector_store %arg5[%c28_445, %c28_446], %305 {strides = array<i32>} : memref<36x196xf32, #tpu.memory_space<vmem>>, vector<4x14xf32>,
    %c0_447 = arith.constant 0 : index
    %c0_448 = arith.constant 0 : index
    %c81_449 = arith.constant 81 : index
    %307 = vector.load %arg1[%c0_447, %c0_448, %c81_449] : memref<2x4x256xf32, #tpu.memory_space<vmem>>, vector<1x4x14xf32>
    %308 = vector.shape_cast %307 : vector<1x4x14xf32> to vector<4x14xf32>
    %c28_450 = arith.constant 28 : index
    %c42_451 = arith.constant 42 : index
    %309 = vector.load %arg5[%c28_450, %c42_451] : memref<36x196xf32, #tpu.memory_space<vmem>>, vector<4x14xf32>
    tpu.vector_store %arg5[%c28_450, %c42_451], %308 {strides = array<i32>} : memref<36x196xf32, #tpu.memory_space<vmem>>, vector<4x14xf32>,
    %c0_452 = arith.constant 0 : index
    %c0_453 = arith.constant 0 : index
    %c97_454 = arith.constant 97 : index
    %310 = vector.load %arg1[%c0_452, %c0_453, %c97_454] : memref<2x4x256xf32, #tpu.memory_space<vmem>>, vector<1x4x14xf32>
    %311 = vector.shape_cast %310 : vector<1x4x14xf32> to vector<4x14xf32>
    %c28_455 = arith.constant 28 : index
    %c56_456 = arith.constant 56 : index
    %312 = vector.load %arg5[%c28_455, %c56_456] : memref<36x196xf32, #tpu.memory_space<vmem>>, vector<4x14xf32>
    tpu.vector_store %arg5[%c28_455, %c56_456], %311 {strides = array<i32>} : memref<36x196xf32, #tpu.memory_space<vmem>>, vector<4x14xf32>,
    %c0_457 = arith.constant 0 : index
    %c0_458 = arith.constant 0 : index
    %c113_459 = arith.constant 113 : index
    %313 = vector.load %arg1[%c0_457, %c0_458, %c113_459] : memref<2x4x256xf32, #tpu.memory_space<vmem>>, vector<1x4x14xf32>
    %314 = vector.shape_cast %313 : vector<1x4x14xf32> to vector<4x14xf32>
    %c28_460 = arith.constant 28 : index
    %c70_461 = arith.constant 70 : index
    %315 = vector.load %arg5[%c28_460, %c70_461] : memref<36x196xf32, #tpu.memory_space<vmem>>, vector<4x14xf32>
    tpu.vector_store %arg5[%c28_460, %c70_461], %314 {strides = array<i32>} : memref<36x196xf32, #tpu.memory_space<vmem>>, vector<4x14xf32>,
    %c0_462 = arith.constant 0 : index
    %c0_463 = arith.constant 0 : index
    %c129_464 = arith.constant 129 : index
    %316 = vector.load %arg1[%c0_462, %c0_463, %c129_464] : memref<2x4x256xf32, #tpu.memory_space<vmem>>, vector<1x4x14xf32>
    %317 = vector.shape_cast %316 : vector<1x4x14xf32> to vector<4x14xf32>
    %c28_465 = arith.constant 28 : index
    %c84_466 = arith.constant 84 : index
    %318 = vector.load %arg5[%c28_465, %c84_466] : memref<36x196xf32, #tpu.memory_space<vmem>>, vector<4x14xf32>
    tpu.vector_store %arg5[%c28_465, %c84_466], %317 {strides = array<i32>} : memref<36x196xf32, #tpu.memory_space<vmem>>, vector<4x14xf32>,
    %c0_467 = arith.constant 0 : index
    %c0_468 = arith.constant 0 : index
    %c145_469 = arith.constant 145 : index
    %319 = vector.load %arg1[%c0_467, %c0_468, %c145_469] : memref<2x4x256xf32, #tpu.memory_space<vmem>>, vector<1x4x14xf32>
    %320 = vector.shape_cast %319 : vector<1x4x14xf32> to vector<4x14xf32>
    %c28_470 = arith.constant 28 : index
    %c98_471 = arith.constant 98 : index
    %321 = vector.load %arg5[%c28_470, %c98_471] : memref<36x196xf32, #tpu.memory_space<vmem>>, vector<4x14xf32>
    tpu.vector_store %arg5[%c28_470, %c98_471], %320 {strides = array<i32>} : memref<36x196xf32, #tpu.memory_space<vmem>>, vector<4x14xf32>,
    %c0_472 = arith.constant 0 : index
    %c0_473 = arith.constant 0 : index
    %c161_474 = arith.constant 161 : index
    %322 = vector.load %arg1[%c0_472, %c0_473, %c161_474] : memref<2x4x256xf32, #tpu.memory_space<vmem>>, vector<1x4x14xf32>
    %323 = vector.shape_cast %322 : vector<1x4x14xf32> to vector<4x14xf32>
    %c28_475 = arith.constant 28 : index
    %c112_476 = arith.constant 112 : index
    %324 = vector.load %arg5[%c28_475, %c112_476] : memref<36x196xf32, #tpu.memory_space<vmem>>, vector<4x14xf32>
    tpu.vector_store %arg5[%c28_475, %c112_476], %323 {strides = array<i32>} : memref<36x196xf32, #tpu.memory_space<vmem>>, vector<4x14xf32>,
    %c0_477 = arith.constant 0 : index
    %c0_478 = arith.constant 0 : index
    %c177_479 = arith.constant 177 : index
    %325 = vector.load %arg1[%c0_477, %c0_478, %c177_479] : memref<2x4x256xf32, #tpu.memory_space<vmem>>, vector<1x4x14xf32>
    %326 = vector.shape_cast %325 : vector<1x4x14xf32> to vector<4x14xf32>
    %c28_480 = arith.constant 28 : index
    %c126_481 = arith.constant 126 : index
    %327 = vector.load %arg5[%c28_480, %c126_481] : memref<36x196xf32, #tpu.memory_space<vmem>>, vector<4x14xf32>
    tpu.vector_store %arg5[%c28_480, %c126_481], %326 {strides = array<i32>} : memref<36x196xf32, #tpu.memory_space<vmem>>, vector<4x14xf32>,
    %c0_482 = arith.constant 0 : index
    %c0_483 = arith.constant 0 : index
    %c193_484 = arith.constant 193 : index
    %328 = vector.load %arg1[%c0_482, %c0_483, %c193_484] : memref<2x4x256xf32, #tpu.memory_space<vmem>>, vector<1x4x14xf32>
    %329 = vector.shape_cast %328 : vector<1x4x14xf32> to vector<4x14xf32>
    %c28_485 = arith.constant 28 : index
    %c140_486 = arith.constant 140 : index
    %330 = vector.load %arg5[%c28_485, %c140_486] : memref<36x196xf32, #tpu.memory_space<vmem>>, vector<4x14xf32>
    tpu.vector_store %arg5[%c28_485, %c140_486], %329 {strides = array<i32>} : memref<36x196xf32, #tpu.memory_space<vmem>>, vector<4x14xf32>,
    %c0_487 = arith.constant 0 : index
    %c0_488 = arith.constant 0 : index
    %c209_489 = arith.constant 209 : index
    %331 = vector.load %arg1[%c0_487, %c0_488, %c209_489] : memref<2x4x256xf32, #tpu.memory_space<vmem>>, vector<1x4x14xf32>
    %332 = vector.shape_cast %331 : vector<1x4x14xf32> to vector<4x14xf32>
    %c28_490 = arith.constant 28 : index
    %c154_491 = arith.constant 154 : index
    %333 = vector.load %arg5[%c28_490, %c154_491] : memref<36x196xf32, #tpu.memory_space<vmem>>, vector<4x14xf32>
    tpu.vector_store %arg5[%c28_490, %c154_491], %332 {strides = array<i32>} : memref<36x196xf32, #tpu.memory_space<vmem>>, vector<4x14xf32>,
    %c0_492 = arith.constant 0 : index
    %c0_493 = arith.constant 0 : index
    %c225_494 = arith.constant 225 : index
    %334 = vector.load %arg1[%c0_492, %c0_493, %c225_494] : memref<2x4x256xf32, #tpu.memory_space<vmem>>, vector<1x4x14xf32>
    %335 = vector.shape_cast %334 : vector<1x4x14xf32> to vector<4x14xf32>
    %c28_495 = arith.constant 28 : index
    %c168_496 = arith.constant 168 : index
    %336 = vector.load %arg5[%c28_495, %c168_496] : memref<36x196xf32, #tpu.memory_space<vmem>>, vector<4x14xf32>
    tpu.vector_store %arg5[%c28_495, %c168_496], %335 {strides = array<i32>} : memref<36x196xf32, #tpu.memory_space<vmem>>, vector<4x14xf32>,
    %c0_497 = arith.constant 0 : index
    %c0_498 = arith.constant 0 : index
    %c241 = arith.constant 241 : index
    %337 = vector.load %arg1[%c0_497, %c0_498, %c241] : memref<2x4x256xf32, #tpu.memory_space<vmem>>, vector<1x4x14xf32>
    %338 = vector.shape_cast %337 : vector<1x4x14xf32> to vector<4x14xf32>
    %c28_499 = arith.constant 28 : index
    %c182_500 = arith.constant 182 : index
    %339 = vector.load %arg5[%c28_499, %c182_500] : memref<36x196xf32, #tpu.memory_space<vmem>>, vector<4x14xf32>
    tpu.vector_store %arg5[%c28_499, %c182_500], %338 {strides = array<i32>} : memref<36x196xf32, #tpu.memory_space<vmem>>, vector<4x14xf32>,
    %c0_501 = arith.constant 0 : index
    %c0_502 = arith.constant 0 : index
    %c34_503 = arith.constant 34 : index
    %340 = vector.load %arg1[%c0_501, %c0_502, %c34_503] : memref<2x4x256xf32, #tpu.memory_space<vmem>>, vector<1x4x14xf32>
    %341 = vector.shape_cast %340 : vector<1x4x14xf32> to vector<4x14xf32>
    %c32_504 = arith.constant 32 : index
    %c0_505 = arith.constant 0 : index
    %342 = vector.load %arg5[%c32_504, %c0_505] : memref<36x196xf32, #tpu.memory_space<vmem>>, vector<4x14xf32>
    tpu.vector_store %arg5[%c32_504, %c0_505], %341 {strides = array<i32>} : memref<36x196xf32, #tpu.memory_space<vmem>>, vector<4x14xf32>,
    %c0_506 = arith.constant 0 : index
    %c0_507 = arith.constant 0 : index
    %c50_508 = arith.constant 50 : index
    %343 = vector.load %arg1[%c0_506, %c0_507, %c50_508] : memref<2x4x256xf32, #tpu.memory_space<vmem>>, vector<1x4x14xf32>
    %344 = vector.shape_cast %343 : vector<1x4x14xf32> to vector<4x14xf32>
    %c32_509 = arith.constant 32 : index
    %c14_510 = arith.constant 14 : index
    %345 = vector.load %arg5[%c32_509, %c14_510] : memref<36x196xf32, #tpu.memory_space<vmem>>, vector<4x14xf32>
    tpu.vector_store %arg5[%c32_509, %c14_510], %344 {strides = array<i32>} : memref<36x196xf32, #tpu.memory_space<vmem>>, vector<4x14xf32>,
    %c0_511 = arith.constant 0 : index
    %c0_512 = arith.constant 0 : index
    %c66_513 = arith.constant 66 : index
    %346 = vector.load %arg1[%c0_511, %c0_512, %c66_513] : memref<2x4x256xf32, #tpu.memory_space<vmem>>, vector<1x4x14xf32>
    %347 = vector.shape_cast %346 : vector<1x4x14xf32> to vector<4x14xf32>
    %c32_514 = arith.constant 32 : index
    %c28_515 = arith.constant 28 : index
    %348 = vector.load %arg5[%c32_514, %c28_515] : memref<36x196xf32, #tpu.memory_space<vmem>>, vector<4x14xf32>
    tpu.vector_store %arg5[%c32_514, %c28_515], %347 {strides = array<i32>} : memref<36x196xf32, #tpu.memory_space<vmem>>, vector<4x14xf32>,
    %c0_516 = arith.constant 0 : index
    %c0_517 = arith.constant 0 : index
    %c82_518 = arith.constant 82 : index
    %349 = vector.load %arg1[%c0_516, %c0_517, %c82_518] : memref<2x4x256xf32, #tpu.memory_space<vmem>>, vector<1x4x14xf32>
    %350 = vector.shape_cast %349 : vector<1x4x14xf32> to vector<4x14xf32>
    %c32_519 = arith.constant 32 : index
    %c42_520 = arith.constant 42 : index
    %351 = vector.load %arg5[%c32_519, %c42_520] : memref<36x196xf32, #tpu.memory_space<vmem>>, vector<4x14xf32>
    tpu.vector_store %arg5[%c32_519, %c42_520], %350 {strides = array<i32>} : memref<36x196xf32, #tpu.memory_space<vmem>>, vector<4x14xf32>,
    %c0_521 = arith.constant 0 : index
    %c0_522 = arith.constant 0 : index
    %c98_523 = arith.constant 98 : index
    %352 = vector.load %arg1[%c0_521, %c0_522, %c98_523] : memref<2x4x256xf32, #tpu.memory_space<vmem>>, vector<1x4x14xf32>
    %353 = vector.shape_cast %352 : vector<1x4x14xf32> to vector<4x14xf32>
    %c32_524 = arith.constant 32 : index
    %c56_525 = arith.constant 56 : index
    %354 = vector.load %arg5[%c32_524, %c56_525] : memref<36x196xf32, #tpu.memory_space<vmem>>, vector<4x14xf32>
    tpu.vector_store %arg5[%c32_524, %c56_525], %353 {strides = array<i32>} : memref<36x196xf32, #tpu.memory_space<vmem>>, vector<4x14xf32>,
    %c0_526 = arith.constant 0 : index
    %c0_527 = arith.constant 0 : index
    %c114_528 = arith.constant 114 : index
    %355 = vector.load %arg1[%c0_526, %c0_527, %c114_528] : memref<2x4x256xf32, #tpu.memory_space<vmem>>, vector<1x4x14xf32>
    %356 = vector.shape_cast %355 : vector<1x4x14xf32> to vector<4x14xf32>
    %c32_529 = arith.constant 32 : index
    %c70_530 = arith.constant 70 : index
    %357 = vector.load %arg5[%c32_529, %c70_530] : memref<36x196xf32, #tpu.memory_space<vmem>>, vector<4x14xf32>
    tpu.vector_store %arg5[%c32_529, %c70_530], %356 {strides = array<i32>} : memref<36x196xf32, #tpu.memory_space<vmem>>, vector<4x14xf32>,
    %c0_531 = arith.constant 0 : index
    %c0_532 = arith.constant 0 : index
    %c130_533 = arith.constant 130 : index
    %358 = vector.load %arg1[%c0_531, %c0_532, %c130_533] : memref<2x4x256xf32, #tpu.memory_space<vmem>>, vector<1x4x14xf32>
    %359 = vector.shape_cast %358 : vector<1x4x14xf32> to vector<4x14xf32>
    %c32_534 = arith.constant 32 : index
    %c84_535 = arith.constant 84 : index
    %360 = vector.load %arg5[%c32_534, %c84_535] : memref<36x196xf32, #tpu.memory_space<vmem>>, vector<4x14xf32>
    tpu.vector_store %arg5[%c32_534, %c84_535], %359 {strides = array<i32>} : memref<36x196xf32, #tpu.memory_space<vmem>>, vector<4x14xf32>,
    %c0_536 = arith.constant 0 : index
    %c0_537 = arith.constant 0 : index
    %c146_538 = arith.constant 146 : index
    %361 = vector.load %arg1[%c0_536, %c0_537, %c146_538] : memref<2x4x256xf32, #tpu.memory_space<vmem>>, vector<1x4x14xf32>
    %362 = vector.shape_cast %361 : vector<1x4x14xf32> to vector<4x14xf32>
    %c32_539 = arith.constant 32 : index
    %c98_540 = arith.constant 98 : index
    %363 = vector.load %arg5[%c32_539, %c98_540] : memref<36x196xf32, #tpu.memory_space<vmem>>, vector<4x14xf32>
    tpu.vector_store %arg5[%c32_539, %c98_540], %362 {strides = array<i32>} : memref<36x196xf32, #tpu.memory_space<vmem>>, vector<4x14xf32>,
    %c0_541 = arith.constant 0 : index
    %c0_542 = arith.constant 0 : index
    %c162_543 = arith.constant 162 : index
    %364 = vector.load %arg1[%c0_541, %c0_542, %c162_543] : memref<2x4x256xf32, #tpu.memory_space<vmem>>, vector<1x4x14xf32>
    %365 = vector.shape_cast %364 : vector<1x4x14xf32> to vector<4x14xf32>
    %c32_544 = arith.constant 32 : index
    %c112_545 = arith.constant 112 : index
    %366 = vector.load %arg5[%c32_544, %c112_545] : memref<36x196xf32, #tpu.memory_space<vmem>>, vector<4x14xf32>
    tpu.vector_store %arg5[%c32_544, %c112_545], %365 {strides = array<i32>} : memref<36x196xf32, #tpu.memory_space<vmem>>, vector<4x14xf32>,
    %c0_546 = arith.constant 0 : index
    %c0_547 = arith.constant 0 : index
    %c178_548 = arith.constant 178 : index
    %367 = vector.load %arg1[%c0_546, %c0_547, %c178_548] : memref<2x4x256xf32, #tpu.memory_space<vmem>>, vector<1x4x14xf32>
    %368 = vector.shape_cast %367 : vector<1x4x14xf32> to vector<4x14xf32>
    %c32_549 = arith.constant 32 : index
    %c126_550 = arith.constant 126 : index
    %369 = vector.load %arg5[%c32_549, %c126_550] : memref<36x196xf32, #tpu.memory_space<vmem>>, vector<4x14xf32>
    tpu.vector_store %arg5[%c32_549, %c126_550], %368 {strides = array<i32>} : memref<36x196xf32, #tpu.memory_space<vmem>>, vector<4x14xf32>,
    %c0_551 = arith.constant 0 : index
    %c0_552 = arith.constant 0 : index
    %c194_553 = arith.constant 194 : index
    %370 = vector.load %arg1[%c0_551, %c0_552, %c194_553] : memref<2x4x256xf32, #tpu.memory_space<vmem>>, vector<1x4x14xf32>
    %371 = vector.shape_cast %370 : vector<1x4x14xf32> to vector<4x14xf32>
    %c32_554 = arith.constant 32 : index
    %c140_555 = arith.constant 140 : index
    %372 = vector.load %arg5[%c32_554, %c140_555] : memref<36x196xf32, #tpu.memory_space<vmem>>, vector<4x14xf32>
    tpu.vector_store %arg5[%c32_554, %c140_555], %371 {strides = array<i32>} : memref<36x196xf32, #tpu.memory_space<vmem>>, vector<4x14xf32>,
    %c0_556 = arith.constant 0 : index
    %c0_557 = arith.constant 0 : index
    %c210_558 = arith.constant 210 : index
    %373 = vector.load %arg1[%c0_556, %c0_557, %c210_558] : memref<2x4x256xf32, #tpu.memory_space<vmem>>, vector<1x4x14xf32>
    %374 = vector.shape_cast %373 : vector<1x4x14xf32> to vector<4x14xf32>
    %c32_559 = arith.constant 32 : index
    %c154_560 = arith.constant 154 : index
    %375 = vector.load %arg5[%c32_559, %c154_560] : memref<36x196xf32, #tpu.memory_space<vmem>>, vector<4x14xf32>
    tpu.vector_store %arg5[%c32_559, %c154_560], %374 {strides = array<i32>} : memref<36x196xf32, #tpu.memory_space<vmem>>, vector<4x14xf32>,
    %c0_561 = arith.constant 0 : index
    %c0_562 = arith.constant 0 : index
    %c226_563 = arith.constant 226 : index
    %376 = vector.load %arg1[%c0_561, %c0_562, %c226_563] : memref<2x4x256xf32, #tpu.memory_space<vmem>>, vector<1x4x14xf32>
    %377 = vector.shape_cast %376 : vector<1x4x14xf32> to vector<4x14xf32>
    %c32_564 = arith.constant 32 : index
    %c168_565 = arith.constant 168 : index
    %378 = vector.load %arg5[%c32_564, %c168_565] : memref<36x196xf32, #tpu.memory_space<vmem>>, vector<4x14xf32>
    tpu.vector_store %arg5[%c32_564, %c168_565], %377 {strides = array<i32>} : memref<36x196xf32, #tpu.memory_space<vmem>>, vector<4x14xf32>,
    %c0_566 = arith.constant 0 : index
    %c0_567 = arith.constant 0 : index
    %c242 = arith.constant 242 : index
    %379 = vector.load %arg1[%c0_566, %c0_567, %c242] : memref<2x4x256xf32, #tpu.memory_space<vmem>>, vector<1x4x14xf32>
    %380 = vector.shape_cast %379 : vector<1x4x14xf32> to vector<4x14xf32>
    %c32_568 = arith.constant 32 : index
    %c182_569 = arith.constant 182 : index
    %381 = vector.load %arg5[%c32_568, %c182_569] : memref<36x196xf32, #tpu.memory_space<vmem>>, vector<4x14xf32>
    tpu.vector_store %arg5[%c32_568, %c182_569], %380 {strides = array<i32>} : memref<36x196xf32, #tpu.memory_space<vmem>>, vector<4x14xf32>,
    %c0_570 = arith.constant 0 : index
    %c0_571 = arith.constant 0 : index
    %382 = vector.load %arg5[%c0_570, %c0_571] : memref<36x196xf32, #tpu.memory_space<vmem>>, vector<36x196xf32>
    %cst = arith.constant dense<0.000000e+00> : vector<8x196xf32>
    %383 = tpu.matmul %0, %382, %cst {dimension_numbers = #tpu.dot_dimension_numbers<[1], [0], [0], [1], [0, 0, 1, 1], [], []>} : vector<8x36xf32>, vector<36x196xf32>, vector<8x196xf32> -> vector<8x196xf32>
    %384 = arith.addf %383, %3 : vector<8x196xf32>
    %c0_572 = arith.constant 0 : index
    %c0_573 = arith.constant 0 : index
    %c0_574 = arith.constant 0 : index
    %385 = vector.load %arg4[%c0_572, %c0_573, %c0_574] : memref<2x8x196xf32, #tpu.memory_space<vmem>>, vector<1x8x196xf32>
    %386 = vector.shape_cast %385 : vector<1x8x196xf32> to vector<8x196xf32>
    %387 = vector.shape_cast %384 : vector<8x196xf32> to vector<1x8x196xf32>
    tpu.vector_store %arg4[%c0_572, %c0_573, %c0_574], %387 {strides = array<i32>} : memref<2x8x196xf32, #tpu.memory_space<vmem>>, vector<1x8x196xf32>,
    %c1_575 = arith.constant 1 : index
    %c0_576 = arith.constant 0 : index
    %c0_577 = arith.constant 0 : index
    %388 = vector.load %arg1[%c1_575, %c0_576, %c0_577] : memref<2x4x256xf32, #tpu.memory_space<vmem>>, vector<1x4x14xf32>
    %389 = vector.shape_cast %388 : vector<1x4x14xf32> to vector<4x14xf32>
    %c0_578 = arith.constant 0 : index
    %c0_579 = arith.constant 0 : index
    %390 = vector.load %arg5[%c0_578, %c0_579] : memref<36x196xf32, #tpu.memory_space<vmem>>, vector<4x14xf32>
    tpu.vector_store %arg5[%c0_578, %c0_579], %389 {strides = array<i32>} : memref<36x196xf32, #tpu.memory_space<vmem>>, vector<4x14xf32>,
    %c1_580 = arith.constant 1 : index
    %c0_581 = arith.constant 0 : index
    %c16_582 = arith.constant 16 : index
    %391 = vector.load %arg1[%c1_580, %c0_581, %c16_582] : memref<2x4x256xf32, #tpu.memory_space<vmem>>, vector<1x4x14xf32>
    %392 = vector.shape_cast %391 : vector<1x4x14xf32> to vector<4x14xf32>
    %c0_583 = arith.constant 0 : index
    %c14_584 = arith.constant 14 : index
    %393 = vector.load %arg5[%c0_583, %c14_584] : memref<36x196xf32, #tpu.memory_space<vmem>>, vector<4x14xf32>
    tpu.vector_store %arg5[%c0_583, %c14_584], %392 {strides = array<i32>} : memref<36x196xf32, #tpu.memory_space<vmem>>, vector<4x14xf32>,
    %c1_585 = arith.constant 1 : index
    %c0_586 = arith.constant 0 : index
    %c32_587 = arith.constant 32 : index
    %394 = vector.load %arg1[%c1_585, %c0_586, %c32_587] : memref<2x4x256xf32, #tpu.memory_space<vmem>>, vector<1x4x14xf32>
    %395 = vector.shape_cast %394 : vector<1x4x14xf32> to vector<4x14xf32>
    %c0_588 = arith.constant 0 : index
    %c28_589 = arith.constant 28 : index
    %396 = vector.load %arg5[%c0_588, %c28_589] : memref<36x196xf32, #tpu.memory_space<vmem>>, vector<4x14xf32>
    tpu.vector_store %arg5[%c0_588, %c28_589], %395 {strides = array<i32>} : memref<36x196xf32, #tpu.memory_space<vmem>>, vector<4x14xf32>,
    %c1_590 = arith.constant 1 : index
    %c0_591 = arith.constant 0 : index
    %c48_592 = arith.constant 48 : index
    %397 = vector.load %arg1[%c1_590, %c0_591, %c48_592] : memref<2x4x256xf32, #tpu.memory_space<vmem>>, vector<1x4x14xf32>
    %398 = vector.shape_cast %397 : vector<1x4x14xf32> to vector<4x14xf32>
    %c0_593 = arith.constant 0 : index
    %c42_594 = arith.constant 42 : index
    %399 = vector.load %arg5[%c0_593, %c42_594] : memref<36x196xf32, #tpu.memory_space<vmem>>, vector<4x14xf32>
    tpu.vector_store %arg5[%c0_593, %c42_594], %398 {strides = array<i32>} : memref<36x196xf32, #tpu.memory_space<vmem>>, vector<4x14xf32>,
    %c1_595 = arith.constant 1 : index
    %c0_596 = arith.constant 0 : index
    %c64_597 = arith.constant 64 : index
    %400 = vector.load %arg1[%c1_595, %c0_596, %c64_597] : memref<2x4x256xf32, #tpu.memory_space<vmem>>, vector<1x4x14xf32>
    %401 = vector.shape_cast %400 : vector<1x4x14xf32> to vector<4x14xf32>
    %c0_598 = arith.constant 0 : index
    %c56_599 = arith.constant 56 : index
    %402 = vector.load %arg5[%c0_598, %c56_599] : memref<36x196xf32, #tpu.memory_space<vmem>>, vector<4x14xf32>
    tpu.vector_store %arg5[%c0_598, %c56_599], %401 {strides = array<i32>} : memref<36x196xf32, #tpu.memory_space<vmem>>, vector<4x14xf32>,
    %c1_600 = arith.constant 1 : index
    %c0_601 = arith.constant 0 : index
    %c80_602 = arith.constant 80 : index
    %403 = vector.load %arg1[%c1_600, %c0_601, %c80_602] : memref<2x4x256xf32, #tpu.memory_space<vmem>>, vector<1x4x14xf32>
    %404 = vector.shape_cast %403 : vector<1x4x14xf32> to vector<4x14xf32>
    %c0_603 = arith.constant 0 : index
    %c70_604 = arith.constant 70 : index
    %405 = vector.load %arg5[%c0_603, %c70_604] : memref<36x196xf32, #tpu.memory_space<vmem>>, vector<4x14xf32>
    tpu.vector_store %arg5[%c0_603, %c70_604], %404 {strides = array<i32>} : memref<36x196xf32, #tpu.memory_space<vmem>>, vector<4x14xf32>,
    %c1_605 = arith.constant 1 : index
    %c0_606 = arith.constant 0 : index
    %c96_607 = arith.constant 96 : index
    %406 = vector.load %arg1[%c1_605, %c0_606, %c96_607] : memref<2x4x256xf32, #tpu.memory_space<vmem>>, vector<1x4x14xf32>
    %407 = vector.shape_cast %406 : vector<1x4x14xf32> to vector<4x14xf32>
    %c0_608 = arith.constant 0 : index
    %c84_609 = arith.constant 84 : index
    %408 = vector.load %arg5[%c0_608, %c84_609] : memref<36x196xf32, #tpu.memory_space<vmem>>, vector<4x14xf32>
    tpu.vector_store %arg5[%c0_608, %c84_609], %407 {strides = array<i32>} : memref<36x196xf32, #tpu.memory_space<vmem>>, vector<4x14xf32>,
    %c1_610 = arith.constant 1 : index
    %c0_611 = arith.constant 0 : index
    %c112_612 = arith.constant 112 : index
    %409 = vector.load %arg1[%c1_610, %c0_611, %c112_612] : memref<2x4x256xf32, #tpu.memory_space<vmem>>, vector<1x4x14xf32>
    %410 = vector.shape_cast %409 : vector<1x4x14xf32> to vector<4x14xf32>
    %c0_613 = arith.constant 0 : index
    %c98_614 = arith.constant 98 : index
    %411 = vector.load %arg5[%c0_613, %c98_614] : memref<36x196xf32, #tpu.memory_space<vmem>>, vector<4x14xf32>
    tpu.vector_store %arg5[%c0_613, %c98_614], %410 {strides = array<i32>} : memref<36x196xf32, #tpu.memory_space<vmem>>, vector<4x14xf32>,
    %c1_615 = arith.constant 1 : index
    %c0_616 = arith.constant 0 : index
    %c128_617 = arith.constant 128 : index
    %412 = vector.load %arg1[%c1_615, %c0_616, %c128_617] : memref<2x4x256xf32, #tpu.memory_space<vmem>>, vector<1x4x14xf32>
    %413 = vector.shape_cast %412 : vector<1x4x14xf32> to vector<4x14xf32>
    %c0_618 = arith.constant 0 : index
    %c112_619 = arith.constant 112 : index
    %414 = vector.load %arg5[%c0_618, %c112_619] : memref<36x196xf32, #tpu.memory_space<vmem>>, vector<4x14xf32>
    tpu.vector_store %arg5[%c0_618, %c112_619], %413 {strides = array<i32>} : memref<36x196xf32, #tpu.memory_space<vmem>>, vector<4x14xf32>,
    %c1_620 = arith.constant 1 : index
    %c0_621 = arith.constant 0 : index
    %c144_622 = arith.constant 144 : index
    %415 = vector.load %arg1[%c1_620, %c0_621, %c144_622] : memref<2x4x256xf32, #tpu.memory_space<vmem>>, vector<1x4x14xf32>
    %416 = vector.shape_cast %415 : vector<1x4x14xf32> to vector<4x14xf32>
    %c0_623 = arith.constant 0 : index
    %c126_624 = arith.constant 126 : index
    %417 = vector.load %arg5[%c0_623, %c126_624] : memref<36x196xf32, #tpu.memory_space<vmem>>, vector<4x14xf32>
    tpu.vector_store %arg5[%c0_623, %c126_624], %416 {strides = array<i32>} : memref<36x196xf32, #tpu.memory_space<vmem>>, vector<4x14xf32>,
    %c1_625 = arith.constant 1 : index
    %c0_626 = arith.constant 0 : index
    %c160_627 = arith.constant 160 : index
    %418 = vector.load %arg1[%c1_625, %c0_626, %c160_627] : memref<2x4x256xf32, #tpu.memory_space<vmem>>, vector<1x4x14xf32>
    %419 = vector.shape_cast %418 : vector<1x4x14xf32> to vector<4x14xf32>
    %c0_628 = arith.constant 0 : index
    %c140_629 = arith.constant 140 : index
    %420 = vector.load %arg5[%c0_628, %c140_629] : memref<36x196xf32, #tpu.memory_space<vmem>>, vector<4x14xf32>
    tpu.vector_store %arg5[%c0_628, %c140_629], %419 {strides = array<i32>} : memref<36x196xf32, #tpu.memory_space<vmem>>, vector<4x14xf32>,
    %c1_630 = arith.constant 1 : index
    %c0_631 = arith.constant 0 : index
    %c176_632 = arith.constant 176 : index
    %421 = vector.load %arg1[%c1_630, %c0_631, %c176_632] : memref<2x4x256xf32, #tpu.memory_space<vmem>>, vector<1x4x14xf32>
    %422 = vector.shape_cast %421 : vector<1x4x14xf32> to vector<4x14xf32>
    %c0_633 = arith.constant 0 : index
    %c154_634 = arith.constant 154 : index
    %423 = vector.load %arg5[%c0_633, %c154_634] : memref<36x196xf32, #tpu.memory_space<vmem>>, vector<4x14xf32>
    tpu.vector_store %arg5[%c0_633, %c154_634], %422 {strides = array<i32>} : memref<36x196xf32, #tpu.memory_space<vmem>>, vector<4x14xf32>,
    %c1_635 = arith.constant 1 : index
    %c0_636 = arith.constant 0 : index
    %c192_637 = arith.constant 192 : index
    %424 = vector.load %arg1[%c1_635, %c0_636, %c192_637] : memref<2x4x256xf32, #tpu.memory_space<vmem>>, vector<1x4x14xf32>
    %425 = vector.shape_cast %424 : vector<1x4x14xf32> to vector<4x14xf32>
    %c0_638 = arith.constant 0 : index
    %c168_639 = arith.constant 168 : index
    %426 = vector.load %arg5[%c0_638, %c168_639] : memref<36x196xf32, #tpu.memory_space<vmem>>, vector<4x14xf32>
    tpu.vector_store %arg5[%c0_638, %c168_639], %425 {strides = array<i32>} : memref<36x196xf32, #tpu.memory_space<vmem>>, vector<4x14xf32>,
    %c1_640 = arith.constant 1 : index
    %c0_641 = arith.constant 0 : index
    %c208_642 = arith.constant 208 : index
    %427 = vector.load %arg1[%c1_640, %c0_641, %c208_642] : memref<2x4x256xf32, #tpu.memory_space<vmem>>, vector<1x4x14xf32>
    %428 = vector.shape_cast %427 : vector<1x4x14xf32> to vector<4x14xf32>
    %c0_643 = arith.constant 0 : index
    %c182_644 = arith.constant 182 : index
    %429 = vector.load %arg5[%c0_643, %c182_644] : memref<36x196xf32, #tpu.memory_space<vmem>>, vector<4x14xf32>
    tpu.vector_store %arg5[%c0_643, %c182_644], %428 {strides = array<i32>} : memref<36x196xf32, #tpu.memory_space<vmem>>, vector<4x14xf32>,
    %c1_645 = arith.constant 1 : index
    %c0_646 = arith.constant 0 : index
    %c1_647 = arith.constant 1 : index
    %430 = vector.load %arg1[%c1_645, %c0_646, %c1_647] : memref<2x4x256xf32, #tpu.memory_space<vmem>>, vector<1x4x14xf32>
    %431 = vector.shape_cast %430 : vector<1x4x14xf32> to vector<4x14xf32>
    %c4_648 = arith.constant 4 : index
    %c0_649 = arith.constant 0 : index
    %432 = vector.load %arg5[%c4_648, %c0_649] : memref<36x196xf32, #tpu.memory_space<vmem>>, vector<4x14xf32>
    tpu.vector_store %arg5[%c4_648, %c0_649], %431 {strides = array<i32>} : memref<36x196xf32, #tpu.memory_space<vmem>>, vector<4x14xf32>,
    %c1_650 = arith.constant 1 : index
    %c0_651 = arith.constant 0 : index
    %c17_652 = arith.constant 17 : index
    %433 = vector.load %arg1[%c1_650, %c0_651, %c17_652] : memref<2x4x256xf32, #tpu.memory_space<vmem>>, vector<1x4x14xf32>
    %434 = vector.shape_cast %433 : vector<1x4x14xf32> to vector<4x14xf32>
    %c4_653 = arith.constant 4 : index
    %c14_654 = arith.constant 14 : index
    %435 = vector.load %arg5[%c4_653, %c14_654] : memref<36x196xf32, #tpu.memory_space<vmem>>, vector<4x14xf32>
    tpu.vector_store %arg5[%c4_653, %c14_654], %434 {strides = array<i32>} : memref<36x196xf32, #tpu.memory_space<vmem>>, vector<4x14xf32>,
    %c1_655 = arith.constant 1 : index
    %c0_656 = arith.constant 0 : index
    %c33_657 = arith.constant 33 : index
    %436 = vector.load %arg1[%c1_655, %c0_656, %c33_657] : memref<2x4x256xf32, #tpu.memory_space<vmem>>, vector<1x4x14xf32>
    %437 = vector.shape_cast %436 : vector<1x4x14xf32> to vector<4x14xf32>
    %c4_658 = arith.constant 4 : index
    %c28_659 = arith.constant 28 : index
    %438 = vector.load %arg5[%c4_658, %c28_659] : memref<36x196xf32, #tpu.memory_space<vmem>>, vector<4x14xf32>
    tpu.vector_store %arg5[%c4_658, %c28_659], %437 {strides = array<i32>} : memref<36x196xf32, #tpu.memory_space<vmem>>, vector<4x14xf32>,
    %c1_660 = arith.constant 1 : index
    %c0_661 = arith.constant 0 : index
    %c49_662 = arith.constant 49 : index
    %439 = vector.load %arg1[%c1_660, %c0_661, %c49_662] : memref<2x4x256xf32, #tpu.memory_space<vmem>>, vector<1x4x14xf32>
    %440 = vector.shape_cast %439 : vector<1x4x14xf32> to vector<4x14xf32>
    %c4_663 = arith.constant 4 : index
    %c42_664 = arith.constant 42 : index
    %441 = vector.load %arg5[%c4_663, %c42_664] : memref<36x196xf32, #tpu.memory_space<vmem>>, vector<4x14xf32>
    tpu.vector_store %arg5[%c4_663, %c42_664], %440 {strides = array<i32>} : memref<36x196xf32, #tpu.memory_space<vmem>>, vector<4x14xf32>,
    %c1_665 = arith.constant 1 : index
    %c0_666 = arith.constant 0 : index
    %c65_667 = arith.constant 65 : index
    %442 = vector.load %arg1[%c1_665, %c0_666, %c65_667] : memref<2x4x256xf32, #tpu.memory_space<vmem>>, vector<1x4x14xf32>
    %443 = vector.shape_cast %442 : vector<1x4x14xf32> to vector<4x14xf32>
    %c4_668 = arith.constant 4 : index
    %c56_669 = arith.constant 56 : index
    %444 = vector.load %arg5[%c4_668, %c56_669] : memref<36x196xf32, #tpu.memory_space<vmem>>, vector<4x14xf32>
    tpu.vector_store %arg5[%c4_668, %c56_669], %443 {strides = array<i32>} : memref<36x196xf32, #tpu.memory_space<vmem>>, vector<4x14xf32>,
    %c1_670 = arith.constant 1 : index
    %c0_671 = arith.constant 0 : index
    %c81_672 = arith.constant 81 : index
    %445 = vector.load %arg1[%c1_670, %c0_671, %c81_672] : memref<2x4x256xf32, #tpu.memory_space<vmem>>, vector<1x4x14xf32>
    %446 = vector.shape_cast %445 : vector<1x4x14xf32> to vector<4x14xf32>
    %c4_673 = arith.constant 4 : index
    %c70_674 = arith.constant 70 : index
    %447 = vector.load %arg5[%c4_673, %c70_674] : memref<36x196xf32, #tpu.memory_space<vmem>>, vector<4x14xf32>
    tpu.vector_store %arg5[%c4_673, %c70_674], %446 {strides = array<i32>} : memref<36x196xf32, #tpu.memory_space<vmem>>, vector<4x14xf32>,
    %c1_675 = arith.constant 1 : index
    %c0_676 = arith.constant 0 : index
    %c97_677 = arith.constant 97 : index
    %448 = vector.load %arg1[%c1_675, %c0_676, %c97_677] : memref<2x4x256xf32, #tpu.memory_space<vmem>>, vector<1x4x14xf32>
    %449 = vector.shape_cast %448 : vector<1x4x14xf32> to vector<4x14xf32>
    %c4_678 = arith.constant 4 : index
    %c84_679 = arith.constant 84 : index
    %450 = vector.load %arg5[%c4_678, %c84_679] : memref<36x196xf32, #tpu.memory_space<vmem>>, vector<4x14xf32>
    tpu.vector_store %arg5[%c4_678, %c84_679], %449 {strides = array<i32>} : memref<36x196xf32, #tpu.memory_space<vmem>>, vector<4x14xf32>,
    %c1_680 = arith.constant 1 : index
    %c0_681 = arith.constant 0 : index
    %c113_682 = arith.constant 113 : index
    %451 = vector.load %arg1[%c1_680, %c0_681, %c113_682] : memref<2x4x256xf32, #tpu.memory_space<vmem>>, vector<1x4x14xf32>
    %452 = vector.shape_cast %451 : vector<1x4x14xf32> to vector<4x14xf32>
    %c4_683 = arith.constant 4 : index
    %c98_684 = arith.constant 98 : index
    %453 = vector.load %arg5[%c4_683, %c98_684] : memref<36x196xf32, #tpu.memory_space<vmem>>, vector<4x14xf32>
    tpu.vector_store %arg5[%c4_683, %c98_684], %452 {strides = array<i32>} : memref<36x196xf32, #tpu.memory_space<vmem>>, vector<4x14xf32>,
    %c1_685 = arith.constant 1 : index
    %c0_686 = arith.constant 0 : index
    %c129_687 = arith.constant 129 : index
    %454 = vector.load %arg1[%c1_685, %c0_686, %c129_687] : memref<2x4x256xf32, #tpu.memory_space<vmem>>, vector<1x4x14xf32>
    %455 = vector.shape_cast %454 : vector<1x4x14xf32> to vector<4x14xf32>
    %c4_688 = arith.constant 4 : index
    %c112_689 = arith.constant 112 : index
    %456 = vector.load %arg5[%c4_688, %c112_689] : memref<36x196xf32, #tpu.memory_space<vmem>>, vector<4x14xf32>
    tpu.vector_store %arg5[%c4_688, %c112_689], %455 {strides = array<i32>} : memref<36x196xf32, #tpu.memory_space<vmem>>, vector<4x14xf32>,
    %c1_690 = arith.constant 1 : index
    %c0_691 = arith.constant 0 : index
    %c145_692 = arith.constant 145 : index
    %457 = vector.load %arg1[%c1_690, %c0_691, %c145_692] : memref<2x4x256xf32, #tpu.memory_space<vmem>>, vector<1x4x14xf32>
    %458 = vector.shape_cast %457 : vector<1x4x14xf32> to vector<4x14xf32>
    %c4_693 = arith.constant 4 : index
    %c126_694 = arith.constant 126 : index
    %459 = vector.load %arg5[%c4_693, %c126_694] : memref<36x196xf32, #tpu.memory_space<vmem>>, vector<4x14xf32>
    tpu.vector_store %arg5[%c4_693, %c126_694], %458 {strides = array<i32>} : memref<36x196xf32, #tpu.memory_space<vmem>>, vector<4x14xf32>,
    %c1_695 = arith.constant 1 : index
    %c0_696 = arith.constant 0 : index
    %c161_697 = arith.constant 161 : index
    %460 = vector.load %arg1[%c1_695, %c0_696, %c161_697] : memref<2x4x256xf32, #tpu.memory_space<vmem>>, vector<1x4x14xf32>
    %461 = vector.shape_cast %460 : vector<1x4x14xf32> to vector<4x14xf32>
    %c4_698 = arith.constant 4 : index
    %c140_699 = arith.constant 140 : index
    %462 = vector.load %arg5[%c4_698, %c140_699] : memref<36x196xf32, #tpu.memory_space<vmem>>, vector<4x14xf32>
    tpu.vector_store %arg5[%c4_698, %c140_699], %461 {strides = array<i32>} : memref<36x196xf32, #tpu.memory_space<vmem>>, vector<4x14xf32>,
    %c1_700 = arith.constant 1 : index
    %c0_701 = arith.constant 0 : index
    %c177_702 = arith.constant 177 : index
    %463 = vector.load %arg1[%c1_700, %c0_701, %c177_702] : memref<2x4x256xf32, #tpu.memory_space<vmem>>, vector<1x4x14xf32>
    %464 = vector.shape_cast %463 : vector<1x4x14xf32> to vector<4x14xf32>
    %c4_703 = arith.constant 4 : index
    %c154_704 = arith.constant 154 : index
    %465 = vector.load %arg5[%c4_703, %c154_704] : memref<36x196xf32, #tpu.memory_space<vmem>>, vector<4x14xf32>
    tpu.vector_store %arg5[%c4_703, %c154_704], %464 {strides = array<i32>} : memref<36x196xf32, #tpu.memory_space<vmem>>, vector<4x14xf32>,
    %c1_705 = arith.constant 1 : index
    %c0_706 = arith.constant 0 : index
    %c193_707 = arith.constant 193 : index
    %466 = vector.load %arg1[%c1_705, %c0_706, %c193_707] : memref<2x4x256xf32, #tpu.memory_space<vmem>>, vector<1x4x14xf32>
    %467 = vector.shape_cast %466 : vector<1x4x14xf32> to vector<4x14xf32>
    %c4_708 = arith.constant 4 : index
    %c168_709 = arith.constant 168 : index
    %468 = vector.load %arg5[%c4_708, %c168_709] : memref<36x196xf32, #tpu.memory_space<vmem>>, vector<4x14xf32>
    tpu.vector_store %arg5[%c4_708, %c168_709], %467 {strides = array<i32>} : memref<36x196xf32, #tpu.memory_space<vmem>>, vector<4x14xf32>,
    %c1_710 = arith.constant 1 : index
    %c0_711 = arith.constant 0 : index
    %c209_712 = arith.constant 209 : index
    %469 = vector.load %arg1[%c1_710, %c0_711, %c209_712] : memref<2x4x256xf32, #tpu.memory_space<vmem>>, vector<1x4x14xf32>
    %470 = vector.shape_cast %469 : vector<1x4x14xf32> to vector<4x14xf32>
    %c4_713 = arith.constant 4 : index
    %c182_714 = arith.constant 182 : index
    %471 = vector.load %arg5[%c4_713, %c182_714] : memref<36x196xf32, #tpu.memory_space<vmem>>, vector<4x14xf32>
    tpu.vector_store %arg5[%c4_713, %c182_714], %470 {strides = array<i32>} : memref<36x196xf32, #tpu.memory_space<vmem>>, vector<4x14xf32>,
    %c1_715 = arith.constant 1 : index
    %c0_716 = arith.constant 0 : index
    %c2_717 = arith.constant 2 : index
    %472 = vector.load %arg1[%c1_715, %c0_716, %c2_717] : memref<2x4x256xf32, #tpu.memory_space<vmem>>, vector<1x4x14xf32>
    %473 = vector.shape_cast %472 : vector<1x4x14xf32> to vector<4x14xf32>
    %c8_718 = arith.constant 8 : index
    %c0_719 = arith.constant 0 : index
    %474 = vector.load %arg5[%c8_718, %c0_719] : memref<36x196xf32, #tpu.memory_space<vmem>>, vector<4x14xf32>
    tpu.vector_store %arg5[%c8_718, %c0_719], %473 {strides = array<i32>} : memref<36x196xf32, #tpu.memory_space<vmem>>, vector<4x14xf32>,
    %c1_720 = arith.constant 1 : index
    %c0_721 = arith.constant 0 : index
    %c18_722 = arith.constant 18 : index
    %475 = vector.load %arg1[%c1_720, %c0_721, %c18_722] : memref<2x4x256xf32, #tpu.memory_space<vmem>>, vector<1x4x14xf32>
    %476 = vector.shape_cast %475 : vector<1x4x14xf32> to vector<4x14xf32>
    %c8_723 = arith.constant 8 : index
    %c14_724 = arith.constant 14 : index
    %477 = vector.load %arg5[%c8_723, %c14_724] : memref<36x196xf32, #tpu.memory_space<vmem>>, vector<4x14xf32>
    tpu.vector_store %arg5[%c8_723, %c14_724], %476 {strides = array<i32>} : memref<36x196xf32, #tpu.memory_space<vmem>>, vector<4x14xf32>,
    %c1_725 = arith.constant 1 : index
    %c0_726 = arith.constant 0 : index
    %c34_727 = arith.constant 34 : index
    %478 = vector.load %arg1[%c1_725, %c0_726, %c34_727] : memref<2x4x256xf32, #tpu.memory_space<vmem>>, vector<1x4x14xf32>
    %479 = vector.shape_cast %478 : vector<1x4x14xf32> to vector<4x14xf32>
    %c8_728 = arith.constant 8 : index
    %c28_729 = arith.constant 28 : index
    %480 = vector.load %arg5[%c8_728, %c28_729] : memref<36x196xf32, #tpu.memory_space<vmem>>, vector<4x14xf32>
    tpu.vector_store %arg5[%c8_728, %c28_729], %479 {strides = array<i32>} : memref<36x196xf32, #tpu.memory_space<vmem>>, vector<4x14xf32>,
    %c1_730 = arith.constant 1 : index
    %c0_731 = arith.constant 0 : index
    %c50_732 = arith.constant 50 : index
    %481 = vector.load %arg1[%c1_730, %c0_731, %c50_732] : memref<2x4x256xf32, #tpu.memory_space<vmem>>, vector<1x4x14xf32>
    %482 = vector.shape_cast %481 : vector<1x4x14xf32> to vector<4x14xf32>
    %c8_733 = arith.constant 8 : index
    %c42_734 = arith.constant 42 : index
    %483 = vector.load %arg5[%c8_733, %c42_734] : memref<36x196xf32, #tpu.memory_space<vmem>>, vector<4x14xf32>
    tpu.vector_store %arg5[%c8_733, %c42_734], %482 {strides = array<i32>} : memref<36x196xf32, #tpu.memory_space<vmem>>, vector<4x14xf32>,
    %c1_735 = arith.constant 1 : index
    %c0_736 = arith.constant 0 : index
    %c66_737 = arith.constant 66 : index
    %484 = vector.load %arg1[%c1_735, %c0_736, %c66_737] : memref<2x4x256xf32, #tpu.memory_space<vmem>>, vector<1x4x14xf32>
    %485 = vector.shape_cast %484 : vector<1x4x14xf32> to vector<4x14xf32>
    %c8_738 = arith.constant 8 : index
    %c56_739 = arith.constant 56 : index
    %486 = vector.load %arg5[%c8_738, %c56_739] : memref<36x196xf32, #tpu.memory_space<vmem>>, vector<4x14xf32>
    tpu.vector_store %arg5[%c8_738, %c56_739], %485 {strides = array<i32>} : memref<36x196xf32, #tpu.memory_space<vmem>>, vector<4x14xf32>,
    %c1_740 = arith.constant 1 : index
    %c0_741 = arith.constant 0 : index
    %c82_742 = arith.constant 82 : index
    %487 = vector.load %arg1[%c1_740, %c0_741, %c82_742] : memref<2x4x256xf32, #tpu.memory_space<vmem>>, vector<1x4x14xf32>
    %488 = vector.shape_cast %487 : vector<1x4x14xf32> to vector<4x14xf32>
    %c8_743 = arith.constant 8 : index
    %c70_744 = arith.constant 70 : index
    %489 = vector.load %arg5[%c8_743, %c70_744] : memref<36x196xf32, #tpu.memory_space<vmem>>, vector<4x14xf32>
    tpu.vector_store %arg5[%c8_743, %c70_744], %488 {strides = array<i32>} : memref<36x196xf32, #tpu.memory_space<vmem>>, vector<4x14xf32>,
    %c1_745 = arith.constant 1 : index
    %c0_746 = arith.constant 0 : index
    %c98_747 = arith.constant 98 : index
    %490 = vector.load %arg1[%c1_745, %c0_746, %c98_747] : memref<2x4x256xf32, #tpu.memory_space<vmem>>, vector<1x4x14xf32>
    %491 = vector.shape_cast %490 : vector<1x4x14xf32> to vector<4x14xf32>
    %c8_748 = arith.constant 8 : index
    %c84_749 = arith.constant 84 : index
    %492 = vector.load %arg5[%c8_748, %c84_749] : memref<36x196xf32, #tpu.memory_space<vmem>>, vector<4x14xf32>
    tpu.vector_store %arg5[%c8_748, %c84_749], %491 {strides = array<i32>} : memref<36x196xf32, #tpu.memory_space<vmem>>, vector<4x14xf32>,
    %c1_750 = arith.constant 1 : index
    %c0_751 = arith.constant 0 : index
    %c114_752 = arith.constant 114 : index
    %493 = vector.load %arg1[%c1_750, %c0_751, %c114_752] : memref<2x4x256xf32, #tpu.memory_space<vmem>>, vector<1x4x14xf32>
    %494 = vector.shape_cast %493 : vector<1x4x14xf32> to vector<4x14xf32>
    %c8_753 = arith.constant 8 : index
    %c98_754 = arith.constant 98 : index
    %495 = vector.load %arg5[%c8_753, %c98_754] : memref<36x196xf32, #tpu.memory_space<vmem>>, vector<4x14xf32>
    tpu.vector_store %arg5[%c8_753, %c98_754], %494 {strides = array<i32>} : memref<36x196xf32, #tpu.memory_space<vmem>>, vector<4x14xf32>,
    %c1_755 = arith.constant 1 : index
    %c0_756 = arith.constant 0 : index
    %c130_757 = arith.constant 130 : index
    %496 = vector.load %arg1[%c1_755, %c0_756, %c130_757] : memref<2x4x256xf32, #tpu.memory_space<vmem>>, vector<1x4x14xf32>
    %497 = vector.shape_cast %496 : vector<1x4x14xf32> to vector<4x14xf32>
    %c8_758 = arith.constant 8 : index
    %c112_759 = arith.constant 112 : index
    %498 = vector.load %arg5[%c8_758, %c112_759] : memref<36x196xf32, #tpu.memory_space<vmem>>, vector<4x14xf32>
    tpu.vector_store %arg5[%c8_758, %c112_759], %497 {strides = array<i32>} : memref<36x196xf32, #tpu.memory_space<vmem>>, vector<4x14xf32>,
    %c1_760 = arith.constant 1 : index
    %c0_761 = arith.constant 0 : index
    %c146_762 = arith.constant 146 : index
    %499 = vector.load %arg1[%c1_760, %c0_761, %c146_762] : memref<2x4x256xf32, #tpu.memory_space<vmem>>, vector<1x4x14xf32>
    %500 = vector.shape_cast %499 : vector<1x4x14xf32> to vector<4x14xf32>
    %c8_763 = arith.constant 8 : index
    %c126_764 = arith.constant 126 : index
    %501 = vector.load %arg5[%c8_763, %c126_764] : memref<36x196xf32, #tpu.memory_space<vmem>>, vector<4x14xf32>
    tpu.vector_store %arg5[%c8_763, %c126_764], %500 {strides = array<i32>} : memref<36x196xf32, #tpu.memory_space<vmem>>, vector<4x14xf32>,
    %c1_765 = arith.constant 1 : index
    %c0_766 = arith.constant 0 : index
    %c162_767 = arith.constant 162 : index
    %502 = vector.load %arg1[%c1_765, %c0_766, %c162_767] : memref<2x4x256xf32, #tpu.memory_space<vmem>>, vector<1x4x14xf32>
    %503 = vector.shape_cast %502 : vector<1x4x14xf32> to vector<4x14xf32>
    %c8_768 = arith.constant 8 : index
    %c140_769 = arith.constant 140 : index
    %504 = vector.load %arg5[%c8_768, %c140_769] : memref<36x196xf32, #tpu.memory_space<vmem>>, vector<4x14xf32>
    tpu.vector_store %arg5[%c8_768, %c140_769], %503 {strides = array<i32>} : memref<36x196xf32, #tpu.memory_space<vmem>>, vector<4x14xf32>,
    %c1_770 = arith.constant 1 : index
    %c0_771 = arith.constant 0 : index
    %c178_772 = arith.constant 178 : index
    %505 = vector.load %arg1[%c1_770, %c0_771, %c178_772] : memref<2x4x256xf32, #tpu.memory_space<vmem>>, vector<1x4x14xf32>
    %506 = vector.shape_cast %505 : vector<1x4x14xf32> to vector<4x14xf32>
    %c8_773 = arith.constant 8 : index
    %c154_774 = arith.constant 154 : index
    %507 = vector.load %arg5[%c8_773, %c154_774] : memref<36x196xf32, #tpu.memory_space<vmem>>, vector<4x14xf32>
    tpu.vector_store %arg5[%c8_773, %c154_774], %506 {strides = array<i32>} : memref<36x196xf32, #tpu.memory_space<vmem>>, vector<4x14xf32>,
    %c1_775 = arith.constant 1 : index
    %c0_776 = arith.constant 0 : index
    %c194_777 = arith.constant 194 : index
    %508 = vector.load %arg1[%c1_775, %c0_776, %c194_777] : memref<2x4x256xf32, #tpu.memory_space<vmem>>, vector<1x4x14xf32>
    %509 = vector.shape_cast %508 : vector<1x4x14xf32> to vector<4x14xf32>
    %c8_778 = arith.constant 8 : index
    %c168_779 = arith.constant 168 : index
    %510 = vector.load %arg5[%c8_778, %c168_779] : memref<36x196xf32, #tpu.memory_space<vmem>>, vector<4x14xf32>
    tpu.vector_store %arg5[%c8_778, %c168_779], %509 {strides = array<i32>} : memref<36x196xf32, #tpu.memory_space<vmem>>, vector<4x14xf32>,
    %c1_780 = arith.constant 1 : index
    %c0_781 = arith.constant 0 : index
    %c210_782 = arith.constant 210 : index
    %511 = vector.load %arg1[%c1_780, %c0_781, %c210_782] : memref<2x4x256xf32, #tpu.memory_space<vmem>>, vector<1x4x14xf32>
    %512 = vector.shape_cast %511 : vector<1x4x14xf32> to vector<4x14xf32>
    %c8_783 = arith.constant 8 : index
    %c182_784 = arith.constant 182 : index
    %513 = vector.load %arg5[%c8_783, %c182_784] : memref<36x196xf32, #tpu.memory_space<vmem>>, vector<4x14xf32>
    tpu.vector_store %arg5[%c8_783, %c182_784], %512 {strides = array<i32>} : memref<36x196xf32, #tpu.memory_space<vmem>>, vector<4x14xf32>,
    %c1_785 = arith.constant 1 : index
    %c0_786 = arith.constant 0 : index
    %c16_787 = arith.constant 16 : index
    %514 = vector.load %arg1[%c1_785, %c0_786, %c16_787] : memref<2x4x256xf32, #tpu.memory_space<vmem>>, vector<1x4x14xf32>
    %515 = vector.shape_cast %514 : vector<1x4x14xf32> to vector<4x14xf32>
    %c12_788 = arith.constant 12 : index
    %c0_789 = arith.constant 0 : index
    %516 = vector.load %arg5[%c12_788, %c0_789] : memref<36x196xf32, #tpu.memory_space<vmem>>, vector<4x14xf32>
    tpu.vector_store %arg5[%c12_788, %c0_789], %515 {strides = array<i32>} : memref<36x196xf32, #tpu.memory_space<vmem>>, vector<4x14xf32>,
    %c1_790 = arith.constant 1 : index
    %c0_791 = arith.constant 0 : index
    %c32_792 = arith.constant 32 : index
    %517 = vector.load %arg1[%c1_790, %c0_791, %c32_792] : memref<2x4x256xf32, #tpu.memory_space<vmem>>, vector<1x4x14xf32>
    %518 = vector.shape_cast %517 : vector<1x4x14xf32> to vector<4x14xf32>
    %c12_793 = arith.constant 12 : index
    %c14_794 = arith.constant 14 : index
    %519 = vector.load %arg5[%c12_793, %c14_794] : memref<36x196xf32, #tpu.memory_space<vmem>>, vector<4x14xf32>
    tpu.vector_store %arg5[%c12_793, %c14_794], %518 {strides = array<i32>} : memref<36x196xf32, #tpu.memory_space<vmem>>, vector<4x14xf32>,
    %c1_795 = arith.constant 1 : index
    %c0_796 = arith.constant 0 : index
    %c48_797 = arith.constant 48 : index
    %520 = vector.load %arg1[%c1_795, %c0_796, %c48_797] : memref<2x4x256xf32, #tpu.memory_space<vmem>>, vector<1x4x14xf32>
    %521 = vector.shape_cast %520 : vector<1x4x14xf32> to vector<4x14xf32>
    %c12_798 = arith.constant 12 : index
    %c28_799 = arith.constant 28 : index
    %522 = vector.load %arg5[%c12_798, %c28_799] : memref<36x196xf32, #tpu.memory_space<vmem>>, vector<4x14xf32>
    tpu.vector_store %arg5[%c12_798, %c28_799], %521 {strides = array<i32>} : memref<36x196xf32, #tpu.memory_space<vmem>>, vector<4x14xf32>,
    %c1_800 = arith.constant 1 : index
    %c0_801 = arith.constant 0 : index
    %c64_802 = arith.constant 64 : index
    %523 = vector.load %arg1[%c1_800, %c0_801, %c64_802] : memref<2x4x256xf32, #tpu.memory_space<vmem>>, vector<1x4x14xf32>
    %524 = vector.shape_cast %523 : vector<1x4x14xf32> to vector<4x14xf32>
    %c12_803 = arith.constant 12 : index
    %c42_804 = arith.constant 42 : index
    %525 = vector.load %arg5[%c12_803, %c42_804] : memref<36x196xf32, #tpu.memory_space<vmem>>, vector<4x14xf32>
    tpu.vector_store %arg5[%c12_803, %c42_804], %524 {strides = array<i32>} : memref<36x196xf32, #tpu.memory_space<vmem>>, vector<4x14xf32>,
    %c1_805 = arith.constant 1 : index
    %c0_806 = arith.constant 0 : index
    %c80_807 = arith.constant 80 : index
    %526 = vector.load %arg1[%c1_805, %c0_806, %c80_807] : memref<2x4x256xf32, #tpu.memory_space<vmem>>, vector<1x4x14xf32>
    %527 = vector.shape_cast %526 : vector<1x4x14xf32> to vector<4x14xf32>
    %c12_808 = arith.constant 12 : index
    %c56_809 = arith.constant 56 : index
    %528 = vector.load %arg5[%c12_808, %c56_809] : memref<36x196xf32, #tpu.memory_space<vmem>>, vector<4x14xf32>
    tpu.vector_store %arg5[%c12_808, %c56_809], %527 {strides = array<i32>} : memref<36x196xf32, #tpu.memory_space<vmem>>, vector<4x14xf32>,
    %c1_810 = arith.constant 1 : index
    %c0_811 = arith.constant 0 : index
    %c96_812 = arith.constant 96 : index
    %529 = vector.load %arg1[%c1_810, %c0_811, %c96_812] : memref<2x4x256xf32, #tpu.memory_space<vmem>>, vector<1x4x14xf32>
    %530 = vector.shape_cast %529 : vector<1x4x14xf32> to vector<4x14xf32>
    %c12_813 = arith.constant 12 : index
    %c70_814 = arith.constant 70 : index
    %531 = vector.load %arg5[%c12_813, %c70_814] : memref<36x196xf32, #tpu.memory_space<vmem>>, vector<4x14xf32>
    tpu.vector_store %arg5[%c12_813, %c70_814], %530 {strides = array<i32>} : memref<36x196xf32, #tpu.memory_space<vmem>>, vector<4x14xf32>,
    %c1_815 = arith.constant 1 : index
    %c0_816 = arith.constant 0 : index
    %c112_817 = arith.constant 112 : index
    %532 = vector.load %arg1[%c1_815, %c0_816, %c112_817] : memref<2x4x256xf32, #tpu.memory_space<vmem>>, vector<1x4x14xf32>
    %533 = vector.shape_cast %532 : vector<1x4x14xf32> to vector<4x14xf32>
    %c12_818 = arith.constant 12 : index
    %c84_819 = arith.constant 84 : index
    %534 = vector.load %arg5[%c12_818, %c84_819] : memref<36x196xf32, #tpu.memory_space<vmem>>, vector<4x14xf32>
    tpu.vector_store %arg5[%c12_818, %c84_819], %533 {strides = array<i32>} : memref<36x196xf32, #tpu.memory_space<vmem>>, vector<4x14xf32>,
    %c1_820 = arith.constant 1 : index
    %c0_821 = arith.constant 0 : index
    %c128_822 = arith.constant 128 : index
    %535 = vector.load %arg1[%c1_820, %c0_821, %c128_822] : memref<2x4x256xf32, #tpu.memory_space<vmem>>, vector<1x4x14xf32>
    %536 = vector.shape_cast %535 : vector<1x4x14xf32> to vector<4x14xf32>
    %c12_823 = arith.constant 12 : index
    %c98_824 = arith.constant 98 : index
    %537 = vector.load %arg5[%c12_823, %c98_824] : memref<36x196xf32, #tpu.memory_space<vmem>>, vector<4x14xf32>
    tpu.vector_store %arg5[%c12_823, %c98_824], %536 {strides = array<i32>} : memref<36x196xf32, #tpu.memory_space<vmem>>, vector<4x14xf32>,
    %c1_825 = arith.constant 1 : index
    %c0_826 = arith.constant 0 : index
    %c144_827 = arith.constant 144 : index
    %538 = vector.load %arg1[%c1_825, %c0_826, %c144_827] : memref<2x4x256xf32, #tpu.memory_space<vmem>>, vector<1x4x14xf32>
    %539 = vector.shape_cast %538 : vector<1x4x14xf32> to vector<4x14xf32>
    %c12_828 = arith.constant 12 : index
    %c112_829 = arith.constant 112 : index
    %540 = vector.load %arg5[%c12_828, %c112_829] : memref<36x196xf32, #tpu.memory_space<vmem>>, vector<4x14xf32>
    tpu.vector_store %arg5[%c12_828, %c112_829], %539 {strides = array<i32>} : memref<36x196xf32, #tpu.memory_space<vmem>>, vector<4x14xf32>,
    %c1_830 = arith.constant 1 : index
    %c0_831 = arith.constant 0 : index
    %c160_832 = arith.constant 160 : index
    %541 = vector.load %arg1[%c1_830, %c0_831, %c160_832] : memref<2x4x256xf32, #tpu.memory_space<vmem>>, vector<1x4x14xf32>
    %542 = vector.shape_cast %541 : vector<1x4x14xf32> to vector<4x14xf32>
    %c12_833 = arith.constant 12 : index
    %c126_834 = arith.constant 126 : index
    %543 = vector.load %arg5[%c12_833, %c126_834] : memref<36x196xf32, #tpu.memory_space<vmem>>, vector<4x14xf32>
    tpu.vector_store %arg5[%c12_833, %c126_834], %542 {strides = array<i32>} : memref<36x196xf32, #tpu.memory_space<vmem>>, vector<4x14xf32>,
    %c1_835 = arith.constant 1 : index
    %c0_836 = arith.constant 0 : index
    %c176_837 = arith.constant 176 : index
    %544 = vector.load %arg1[%c1_835, %c0_836, %c176_837] : memref<2x4x256xf32, #tpu.memory_space<vmem>>, vector<1x4x14xf32>
    %545 = vector.shape_cast %544 : vector<1x4x14xf32> to vector<4x14xf32>
    %c12_838 = arith.constant 12 : index
    %c140_839 = arith.constant 140 : index
    %546 = vector.load %arg5[%c12_838, %c140_839] : memref<36x196xf32, #tpu.memory_space<vmem>>, vector<4x14xf32>
    tpu.vector_store %arg5[%c12_838, %c140_839], %545 {strides = array<i32>} : memref<36x196xf32, #tpu.memory_space<vmem>>, vector<4x14xf32>,
    %c1_840 = arith.constant 1 : index
    %c0_841 = arith.constant 0 : index
    %c192_842 = arith.constant 192 : index
    %547 = vector.load %arg1[%c1_840, %c0_841, %c192_842] : memref<2x4x256xf32, #tpu.memory_space<vmem>>, vector<1x4x14xf32>
    %548 = vector.shape_cast %547 : vector<1x4x14xf32> to vector<4x14xf32>
    %c12_843 = arith.constant 12 : index
    %c154_844 = arith.constant 154 : index
    %549 = vector.load %arg5[%c12_843, %c154_844] : memref<36x196xf32, #tpu.memory_space<vmem>>, vector<4x14xf32>
    tpu.vector_store %arg5[%c12_843, %c154_844], %548 {strides = array<i32>} : memref<36x196xf32, #tpu.memory_space<vmem>>, vector<4x14xf32>,
    %c1_845 = arith.constant 1 : index
    %c0_846 = arith.constant 0 : index
    %c208_847 = arith.constant 208 : index
    %550 = vector.load %arg1[%c1_845, %c0_846, %c208_847] : memref<2x4x256xf32, #tpu.memory_space<vmem>>, vector<1x4x14xf32>
    %551 = vector.shape_cast %550 : vector<1x4x14xf32> to vector<4x14xf32>
    %c12_848 = arith.constant 12 : index
    %c168_849 = arith.constant 168 : index
    %552 = vector.load %arg5[%c12_848, %c168_849] : memref<36x196xf32, #tpu.memory_space<vmem>>, vector<4x14xf32>
    tpu.vector_store %arg5[%c12_848, %c168_849], %551 {strides = array<i32>} : memref<36x196xf32, #tpu.memory_space<vmem>>, vector<4x14xf32>,
    %c1_850 = arith.constant 1 : index
    %c0_851 = arith.constant 0 : index
    %c224_852 = arith.constant 224 : index
    %553 = vector.load %arg1[%c1_850, %c0_851, %c224_852] : memref<2x4x256xf32, #tpu.memory_space<vmem>>, vector<1x4x14xf32>
    %554 = vector.shape_cast %553 : vector<1x4x14xf32> to vector<4x14xf32>
    %c12_853 = arith.constant 12 : index
    %c182_854 = arith.constant 182 : index
    %555 = vector.load %arg5[%c12_853, %c182_854] : memref<36x196xf32, #tpu.memory_space<vmem>>, vector<4x14xf32>
    tpu.vector_store %arg5[%c12_853, %c182_854], %554 {strides = array<i32>} : memref<36x196xf32, #tpu.memory_space<vmem>>, vector<4x14xf32>,
    %c1_855 = arith.constant 1 : index
    %c0_856 = arith.constant 0 : index
    %c17_857 = arith.constant 17 : index
    %556 = vector.load %arg1[%c1_855, %c0_856, %c17_857] : memref<2x4x256xf32, #tpu.memory_space<vmem>>, vector<1x4x14xf32>
    %557 = vector.shape_cast %556 : vector<1x4x14xf32> to vector<4x14xf32>
    %c16_858 = arith.constant 16 : index
    %c0_859 = arith.constant 0 : index
    %558 = vector.load %arg5[%c16_858, %c0_859] : memref<36x196xf32, #tpu.memory_space<vmem>>, vector<4x14xf32>
    tpu.vector_store %arg5[%c16_858, %c0_859], %557 {strides = array<i32>} : memref<36x196xf32, #tpu.memory_space<vmem>>, vector<4x14xf32>,
    %c1_860 = arith.constant 1 : index
    %c0_861 = arith.constant 0 : index
    %c33_862 = arith.constant 33 : index
    %559 = vector.load %arg1[%c1_860, %c0_861, %c33_862] : memref<2x4x256xf32, #tpu.memory_space<vmem>>, vector<1x4x14xf32>
    %560 = vector.shape_cast %559 : vector<1x4x14xf32> to vector<4x14xf32>
    %c16_863 = arith.constant 16 : index
    %c14_864 = arith.constant 14 : index
    %561 = vector.load %arg5[%c16_863, %c14_864] : memref<36x196xf32, #tpu.memory_space<vmem>>, vector<4x14xf32>
    tpu.vector_store %arg5[%c16_863, %c14_864], %560 {strides = array<i32>} : memref<36x196xf32, #tpu.memory_space<vmem>>, vector<4x14xf32>,
    %c1_865 = arith.constant 1 : index
    %c0_866 = arith.constant 0 : index
    %c49_867 = arith.constant 49 : index
    %562 = vector.load %arg1[%c1_865, %c0_866, %c49_867] : memref<2x4x256xf32, #tpu.memory_space<vmem>>, vector<1x4x14xf32>
    %563 = vector.shape_cast %562 : vector<1x4x14xf32> to vector<4x14xf32>
    %c16_868 = arith.constant 16 : index
    %c28_869 = arith.constant 28 : index
    %564 = vector.load %arg5[%c16_868, %c28_869] : memref<36x196xf32, #tpu.memory_space<vmem>>, vector<4x14xf32>
    tpu.vector_store %arg5[%c16_868, %c28_869], %563 {strides = array<i32>} : memref<36x196xf32, #tpu.memory_space<vmem>>, vector<4x14xf32>,
    %c1_870 = arith.constant 1 : index
    %c0_871 = arith.constant 0 : index
    %c65_872 = arith.constant 65 : index
    %565 = vector.load %arg1[%c1_870, %c0_871, %c65_872] : memref<2x4x256xf32, #tpu.memory_space<vmem>>, vector<1x4x14xf32>
    %566 = vector.shape_cast %565 : vector<1x4x14xf32> to vector<4x14xf32>
    %c16_873 = arith.constant 16 : index
    %c42_874 = arith.constant 42 : index
    %567 = vector.load %arg5[%c16_873, %c42_874] : memref<36x196xf32, #tpu.memory_space<vmem>>, vector<4x14xf32>
    tpu.vector_store %arg5[%c16_873, %c42_874], %566 {strides = array<i32>} : memref<36x196xf32, #tpu.memory_space<vmem>>, vector<4x14xf32>,
    %c1_875 = arith.constant 1 : index
    %c0_876 = arith.constant 0 : index
    %c81_877 = arith.constant 81 : index
    %568 = vector.load %arg1[%c1_875, %c0_876, %c81_877] : memref<2x4x256xf32, #tpu.memory_space<vmem>>, vector<1x4x14xf32>
    %569 = vector.shape_cast %568 : vector<1x4x14xf32> to vector<4x14xf32>
    %c16_878 = arith.constant 16 : index
    %c56_879 = arith.constant 56 : index
    %570 = vector.load %arg5[%c16_878, %c56_879] : memref<36x196xf32, #tpu.memory_space<vmem>>, vector<4x14xf32>
    tpu.vector_store %arg5[%c16_878, %c56_879], %569 {strides = array<i32>} : memref<36x196xf32, #tpu.memory_space<vmem>>, vector<4x14xf32>,
    %c1_880 = arith.constant 1 : index
    %c0_881 = arith.constant 0 : index
    %c97_882 = arith.constant 97 : index
    %571 = vector.load %arg1[%c1_880, %c0_881, %c97_882] : memref<2x4x256xf32, #tpu.memory_space<vmem>>, vector<1x4x14xf32>
    %572 = vector.shape_cast %571 : vector<1x4x14xf32> to vector<4x14xf32>
    %c16_883 = arith.constant 16 : index
    %c70_884 = arith.constant 70 : index
    %573 = vector.load %arg5[%c16_883, %c70_884] : memref<36x196xf32, #tpu.memory_space<vmem>>, vector<4x14xf32>
    tpu.vector_store %arg5[%c16_883, %c70_884], %572 {strides = array<i32>} : memref<36x196xf32, #tpu.memory_space<vmem>>, vector<4x14xf32>,
    %c1_885 = arith.constant 1 : index
    %c0_886 = arith.constant 0 : index
    %c113_887 = arith.constant 113 : index
    %574 = vector.load %arg1[%c1_885, %c0_886, %c113_887] : memref<2x4x256xf32, #tpu.memory_space<vmem>>, vector<1x4x14xf32>
    %575 = vector.shape_cast %574 : vector<1x4x14xf32> to vector<4x14xf32>
    %c16_888 = arith.constant 16 : index
    %c84_889 = arith.constant 84 : index
    %576 = vector.load %arg5[%c16_888, %c84_889] : memref<36x196xf32, #tpu.memory_space<vmem>>, vector<4x14xf32>
    tpu.vector_store %arg5[%c16_888, %c84_889], %575 {strides = array<i32>} : memref<36x196xf32, #tpu.memory_space<vmem>>, vector<4x14xf32>,
    %c1_890 = arith.constant 1 : index
    %c0_891 = arith.constant 0 : index
    %c129_892 = arith.constant 129 : index
    %577 = vector.load %arg1[%c1_890, %c0_891, %c129_892] : memref<2x4x256xf32, #tpu.memory_space<vmem>>, vector<1x4x14xf32>
    %578 = vector.shape_cast %577 : vector<1x4x14xf32> to vector<4x14xf32>
    %c16_893 = arith.constant 16 : index
    %c98_894 = arith.constant 98 : index
    %579 = vector.load %arg5[%c16_893, %c98_894] : memref<36x196xf32, #tpu.memory_space<vmem>>, vector<4x14xf32>
    tpu.vector_store %arg5[%c16_893, %c98_894], %578 {strides = array<i32>} : memref<36x196xf32, #tpu.memory_space<vmem>>, vector<4x14xf32>,
    %c1_895 = arith.constant 1 : index
    %c0_896 = arith.constant 0 : index
    %c145_897 = arith.constant 145 : index
    %580 = vector.load %arg1[%c1_895, %c0_896, %c145_897] : memref<2x4x256xf32, #tpu.memory_space<vmem>>, vector<1x4x14xf32>
    %581 = vector.shape_cast %580 : vector<1x4x14xf32> to vector<4x14xf32>
    %c16_898 = arith.constant 16 : index
    %c112_899 = arith.constant 112 : index
    %582 = vector.load %arg5[%c16_898, %c112_899] : memref<36x196xf32, #tpu.memory_space<vmem>>, vector<4x14xf32>
    tpu.vector_store %arg5[%c16_898, %c112_899], %581 {strides = array<i32>} : memref<36x196xf32, #tpu.memory_space<vmem>>, vector<4x14xf32>,
    %c1_900 = arith.constant 1 : index
    %c0_901 = arith.constant 0 : index
    %c161_902 = arith.constant 161 : index
    %583 = vector.load %arg1[%c1_900, %c0_901, %c161_902] : memref<2x4x256xf32, #tpu.memory_space<vmem>>, vector<1x4x14xf32>
    %584 = vector.shape_cast %583 : vector<1x4x14xf32> to vector<4x14xf32>
    %c16_903 = arith.constant 16 : index
    %c126_904 = arith.constant 126 : index
    %585 = vector.load %arg5[%c16_903, %c126_904] : memref<36x196xf32, #tpu.memory_space<vmem>>, vector<4x14xf32>
    tpu.vector_store %arg5[%c16_903, %c126_904], %584 {strides = array<i32>} : memref<36x196xf32, #tpu.memory_space<vmem>>, vector<4x14xf32>,
    %c1_905 = arith.constant 1 : index
    %c0_906 = arith.constant 0 : index
    %c177_907 = arith.constant 177 : index
    %586 = vector.load %arg1[%c1_905, %c0_906, %c177_907] : memref<2x4x256xf32, #tpu.memory_space<vmem>>, vector<1x4x14xf32>
    %587 = vector.shape_cast %586 : vector<1x4x14xf32> to vector<4x14xf32>
    %c16_908 = arith.constant 16 : index
    %c140_909 = arith.constant 140 : index
    %588 = vector.load %arg5[%c16_908, %c140_909] : memref<36x196xf32, #tpu.memory_space<vmem>>, vector<4x14xf32>
    tpu.vector_store %arg5[%c16_908, %c140_909], %587 {strides = array<i32>} : memref<36x196xf32, #tpu.memory_space<vmem>>, vector<4x14xf32>,
    %c1_910 = arith.constant 1 : index
    %c0_911 = arith.constant 0 : index
    %c193_912 = arith.constant 193 : index
    %589 = vector.load %arg1[%c1_910, %c0_911, %c193_912] : memref<2x4x256xf32, #tpu.memory_space<vmem>>, vector<1x4x14xf32>
    %590 = vector.shape_cast %589 : vector<1x4x14xf32> to vector<4x14xf32>
    %c16_913 = arith.constant 16 : index
    %c154_914 = arith.constant 154 : index
    %591 = vector.load %arg5[%c16_913, %c154_914] : memref<36x196xf32, #tpu.memory_space<vmem>>, vector<4x14xf32>
    tpu.vector_store %arg5[%c16_913, %c154_914], %590 {strides = array<i32>} : memref<36x196xf32, #tpu.memory_space<vmem>>, vector<4x14xf32>,
    %c1_915 = arith.constant 1 : index
    %c0_916 = arith.constant 0 : index
    %c209_917 = arith.constant 209 : index
    %592 = vector.load %arg1[%c1_915, %c0_916, %c209_917] : memref<2x4x256xf32, #tpu.memory_space<vmem>>, vector<1x4x14xf32>
    %593 = vector.shape_cast %592 : vector<1x4x14xf32> to vector<4x14xf32>
    %c16_918 = arith.constant 16 : index
    %c168_919 = arith.constant 168 : index
    %594 = vector.load %arg5[%c16_918, %c168_919] : memref<36x196xf32, #tpu.memory_space<vmem>>, vector<4x14xf32>
    tpu.vector_store %arg5[%c16_918, %c168_919], %593 {strides = array<i32>} : memref<36x196xf32, #tpu.memory_space<vmem>>, vector<4x14xf32>,
    %c1_920 = arith.constant 1 : index
    %c0_921 = arith.constant 0 : index
    %c225_922 = arith.constant 225 : index
    %595 = vector.load %arg1[%c1_920, %c0_921, %c225_922] : memref<2x4x256xf32, #tpu.memory_space<vmem>>, vector<1x4x14xf32>
    %596 = vector.shape_cast %595 : vector<1x4x14xf32> to vector<4x14xf32>
    %c16_923 = arith.constant 16 : index
    %c182_924 = arith.constant 182 : index
    %597 = vector.load %arg5[%c16_923, %c182_924] : memref<36x196xf32, #tpu.memory_space<vmem>>, vector<4x14xf32>
    tpu.vector_store %arg5[%c16_923, %c182_924], %596 {strides = array<i32>} : memref<36x196xf32, #tpu.memory_space<vmem>>, vector<4x14xf32>,
    %c1_925 = arith.constant 1 : index
    %c0_926 = arith.constant 0 : index
    %c18_927 = arith.constant 18 : index
    %598 = vector.load %arg1[%c1_925, %c0_926, %c18_927] : memref<2x4x256xf32, #tpu.memory_space<vmem>>, vector<1x4x14xf32>
    %599 = vector.shape_cast %598 : vector<1x4x14xf32> to vector<4x14xf32>
    %c20_928 = arith.constant 20 : index
    %c0_929 = arith.constant 0 : index
    %600 = vector.load %arg5[%c20_928, %c0_929] : memref<36x196xf32, #tpu.memory_space<vmem>>, vector<4x14xf32>
    tpu.vector_store %arg5[%c20_928, %c0_929], %599 {strides = array<i32>} : memref<36x196xf32, #tpu.memory_space<vmem>>, vector<4x14xf32>,
    %c1_930 = arith.constant 1 : index
    %c0_931 = arith.constant 0 : index
    %c34_932 = arith.constant 34 : index
    %601 = vector.load %arg1[%c1_930, %c0_931, %c34_932] : memref<2x4x256xf32, #tpu.memory_space<vmem>>, vector<1x4x14xf32>
    %602 = vector.shape_cast %601 : vector<1x4x14xf32> to vector<4x14xf32>
    %c20_933 = arith.constant 20 : index
    %c14_934 = arith.constant 14 : index
    %603 = vector.load %arg5[%c20_933, %c14_934] : memref<36x196xf32, #tpu.memory_space<vmem>>, vector<4x14xf32>
    tpu.vector_store %arg5[%c20_933, %c14_934], %602 {strides = array<i32>} : memref<36x196xf32, #tpu.memory_space<vmem>>, vector<4x14xf32>,
    %c1_935 = arith.constant 1 : index
    %c0_936 = arith.constant 0 : index
    %c50_937 = arith.constant 50 : index
    %604 = vector.load %arg1[%c1_935, %c0_936, %c50_937] : memref<2x4x256xf32, #tpu.memory_space<vmem>>, vector<1x4x14xf32>
    %605 = vector.shape_cast %604 : vector<1x4x14xf32> to vector<4x14xf32>
    %c20_938 = arith.constant 20 : index
    %c28_939 = arith.constant 28 : index
    %606 = vector.load %arg5[%c20_938, %c28_939] : memref<36x196xf32, #tpu.memory_space<vmem>>, vector<4x14xf32>
    tpu.vector_store %arg5[%c20_938, %c28_939], %605 {strides = array<i32>} : memref<36x196xf32, #tpu.memory_space<vmem>>, vector<4x14xf32>,
    %c1_940 = arith.constant 1 : index
    %c0_941 = arith.constant 0 : index
    %c66_942 = arith.constant 66 : index
    %607 = vector.load %arg1[%c1_940, %c0_941, %c66_942] : memref<2x4x256xf32, #tpu.memory_space<vmem>>, vector<1x4x14xf32>
    %608 = vector.shape_cast %607 : vector<1x4x14xf32> to vector<4x14xf32>
    %c20_943 = arith.constant 20 : index
    %c42_944 = arith.constant 42 : index
    %609 = vector.load %arg5[%c20_943, %c42_944] : memref<36x196xf32, #tpu.memory_space<vmem>>, vector<4x14xf32>
    tpu.vector_store %arg5[%c20_943, %c42_944], %608 {strides = array<i32>} : memref<36x196xf32, #tpu.memory_space<vmem>>, vector<4x14xf32>,
    %c1_945 = arith.constant 1 : index
    %c0_946 = arith.constant 0 : index
    %c82_947 = arith.constant 82 : index
    %610 = vector.load %arg1[%c1_945, %c0_946, %c82_947] : memref<2x4x256xf32, #tpu.memory_space<vmem>>, vector<1x4x14xf32>
    %611 = vector.shape_cast %610 : vector<1x4x14xf32> to vector<4x14xf32>
    %c20_948 = arith.constant 20 : index
    %c56_949 = arith.constant 56 : index
    %612 = vector.load %arg5[%c20_948, %c56_949] : memref<36x196xf32, #tpu.memory_space<vmem>>, vector<4x14xf32>
    tpu.vector_store %arg5[%c20_948, %c56_949], %611 {strides = array<i32>} : memref<36x196xf32, #tpu.memory_space<vmem>>, vector<4x14xf32>,
    %c1_950 = arith.constant 1 : index
    %c0_951 = arith.constant 0 : index
    %c98_952 = arith.constant 98 : index
    %613 = vector.load %arg1[%c1_950, %c0_951, %c98_952] : memref<2x4x256xf32, #tpu.memory_space<vmem>>, vector<1x4x14xf32>
    %614 = vector.shape_cast %613 : vector<1x4x14xf32> to vector<4x14xf32>
    %c20_953 = arith.constant 20 : index
    %c70_954 = arith.constant 70 : index
    %615 = vector.load %arg5[%c20_953, %c70_954] : memref<36x196xf32, #tpu.memory_space<vmem>>, vector<4x14xf32>
    tpu.vector_store %arg5[%c20_953, %c70_954], %614 {strides = array<i32>} : memref<36x196xf32, #tpu.memory_space<vmem>>, vector<4x14xf32>,
    %c1_955 = arith.constant 1 : index
    %c0_956 = arith.constant 0 : index
    %c114_957 = arith.constant 114 : index
    %616 = vector.load %arg1[%c1_955, %c0_956, %c114_957] : memref<2x4x256xf32, #tpu.memory_space<vmem>>, vector<1x4x14xf32>
    %617 = vector.shape_cast %616 : vector<1x4x14xf32> to vector<4x14xf32>
    %c20_958 = arith.constant 20 : index
    %c84_959 = arith.constant 84 : index
    %618 = vector.load %arg5[%c20_958, %c84_959] : memref<36x196xf32, #tpu.memory_space<vmem>>, vector<4x14xf32>
    tpu.vector_store %arg5[%c20_958, %c84_959], %617 {strides = array<i32>} : memref<36x196xf32, #tpu.memory_space<vmem>>, vector<4x14xf32>,
    %c1_960 = arith.constant 1 : index
    %c0_961 = arith.constant 0 : index
    %c130_962 = arith.constant 130 : index
    %619 = vector.load %arg1[%c1_960, %c0_961, %c130_962] : memref<2x4x256xf32, #tpu.memory_space<vmem>>, vector<1x4x14xf32>
    %620 = vector.shape_cast %619 : vector<1x4x14xf32> to vector<4x14xf32>
    %c20_963 = arith.constant 20 : index
    %c98_964 = arith.constant 98 : index
    %621 = vector.load %arg5[%c20_963, %c98_964] : memref<36x196xf32, #tpu.memory_space<vmem>>, vector<4x14xf32>
    tpu.vector_store %arg5[%c20_963, %c98_964], %620 {strides = array<i32>} : memref<36x196xf32, #tpu.memory_space<vmem>>, vector<4x14xf32>,
    %c1_965 = arith.constant 1 : index
    %c0_966 = arith.constant 0 : index
    %c146_967 = arith.constant 146 : index
    %622 = vector.load %arg1[%c1_965, %c0_966, %c146_967] : memref<2x4x256xf32, #tpu.memory_space<vmem>>, vector<1x4x14xf32>
    %623 = vector.shape_cast %622 : vector<1x4x14xf32> to vector<4x14xf32>
    %c20_968 = arith.constant 20 : index
    %c112_969 = arith.constant 112 : index
    %624 = vector.load %arg5[%c20_968, %c112_969] : memref<36x196xf32, #tpu.memory_space<vmem>>, vector<4x14xf32>
    tpu.vector_store %arg5[%c20_968, %c112_969], %623 {strides = array<i32>} : memref<36x196xf32, #tpu.memory_space<vmem>>, vector<4x14xf32>,
    %c1_970 = arith.constant 1 : index
    %c0_971 = arith.constant 0 : index
    %c162_972 = arith.constant 162 : index
    %625 = vector.load %arg1[%c1_970, %c0_971, %c162_972] : memref<2x4x256xf32, #tpu.memory_space<vmem>>, vector<1x4x14xf32>
    %626 = vector.shape_cast %625 : vector<1x4x14xf32> to vector<4x14xf32>
    %c20_973 = arith.constant 20 : index
    %c126_974 = arith.constant 126 : index
    %627 = vector.load %arg5[%c20_973, %c126_974] : memref<36x196xf32, #tpu.memory_space<vmem>>, vector<4x14xf32>
    tpu.vector_store %arg5[%c20_973, %c126_974], %626 {strides = array<i32>} : memref<36x196xf32, #tpu.memory_space<vmem>>, vector<4x14xf32>,
    %c1_975 = arith.constant 1 : index
    %c0_976 = arith.constant 0 : index
    %c178_977 = arith.constant 178 : index
    %628 = vector.load %arg1[%c1_975, %c0_976, %c178_977] : memref<2x4x256xf32, #tpu.memory_space<vmem>>, vector<1x4x14xf32>
    %629 = vector.shape_cast %628 : vector<1x4x14xf32> to vector<4x14xf32>
    %c20_978 = arith.constant 20 : index
    %c140_979 = arith.constant 140 : index
    %630 = vector.load %arg5[%c20_978, %c140_979] : memref<36x196xf32, #tpu.memory_space<vmem>>, vector<4x14xf32>
    tpu.vector_store %arg5[%c20_978, %c140_979], %629 {strides = array<i32>} : memref<36x196xf32, #tpu.memory_space<vmem>>, vector<4x14xf32>,
    %c1_980 = arith.constant 1 : index
    %c0_981 = arith.constant 0 : index
    %c194_982 = arith.constant 194 : index
    %631 = vector.load %arg1[%c1_980, %c0_981, %c194_982] : memref<2x4x256xf32, #tpu.memory_space<vmem>>, vector<1x4x14xf32>
    %632 = vector.shape_cast %631 : vector<1x4x14xf32> to vector<4x14xf32>
    %c20_983 = arith.constant 20 : index
    %c154_984 = arith.constant 154 : index
    %633 = vector.load %arg5[%c20_983, %c154_984] : memref<36x196xf32, #tpu.memory_space<vmem>>, vector<4x14xf32>
    tpu.vector_store %arg5[%c20_983, %c154_984], %632 {strides = array<i32>} : memref<36x196xf32, #tpu.memory_space<vmem>>, vector<4x14xf32>,
    %c1_985 = arith.constant 1 : index
    %c0_986 = arith.constant 0 : index
    %c210_987 = arith.constant 210 : index
    %634 = vector.load %arg1[%c1_985, %c0_986, %c210_987] : memref<2x4x256xf32, #tpu.memory_space<vmem>>, vector<1x4x14xf32>
    %635 = vector.shape_cast %634 : vector<1x4x14xf32> to vector<4x14xf32>
    %c20_988 = arith.constant 20 : index
    %c168_989 = arith.constant 168 : index
    %636 = vector.load %arg5[%c20_988, %c168_989] : memref<36x196xf32, #tpu.memory_space<vmem>>, vector<4x14xf32>
    tpu.vector_store %arg5[%c20_988, %c168_989], %635 {strides = array<i32>} : memref<36x196xf32, #tpu.memory_space<vmem>>, vector<4x14xf32>,
    %c1_990 = arith.constant 1 : index
    %c0_991 = arith.constant 0 : index
    %c226_992 = arith.constant 226 : index
    %637 = vector.load %arg1[%c1_990, %c0_991, %c226_992] : memref<2x4x256xf32, #tpu.memory_space<vmem>>, vector<1x4x14xf32>
    %638 = vector.shape_cast %637 : vector<1x4x14xf32> to vector<4x14xf32>
    %c20_993 = arith.constant 20 : index
    %c182_994 = arith.constant 182 : index
    %639 = vector.load %arg5[%c20_993, %c182_994] : memref<36x196xf32, #tpu.memory_space<vmem>>, vector<4x14xf32>
    tpu.vector_store %arg5[%c20_993, %c182_994], %638 {strides = array<i32>} : memref<36x196xf32, #tpu.memory_space<vmem>>, vector<4x14xf32>,
    %c1_995 = arith.constant 1 : index
    %c0_996 = arith.constant 0 : index
    %c32_997 = arith.constant 32 : index
    %640 = vector.load %arg1[%c1_995, %c0_996, %c32_997] : memref<2x4x256xf32, #tpu.memory_space<vmem>>, vector<1x4x14xf32>
    %641 = vector.shape_cast %640 : vector<1x4x14xf32> to vector<4x14xf32>
    %c24_998 = arith.constant 24 : index
    %c0_999 = arith.constant 0 : index
    %642 = vector.load %arg5[%c24_998, %c0_999] : memref<36x196xf32, #tpu.memory_space<vmem>>, vector<4x14xf32>
    tpu.vector_store %arg5[%c24_998, %c0_999], %641 {strides = array<i32>} : memref<36x196xf32, #tpu.memory_space<vmem>>, vector<4x14xf32>,
    %c1_1000 = arith.constant 1 : index
    %c0_1001 = arith.constant 0 : index
    %c48_1002 = arith.constant 48 : index
    %643 = vector.load %arg1[%c1_1000, %c0_1001, %c48_1002] : memref<2x4x256xf32, #tpu.memory_space<vmem>>, vector<1x4x14xf32>
    %644 = vector.shape_cast %643 : vector<1x4x14xf32> to vector<4x14xf32>
    %c24_1003 = arith.constant 24 : index
    %c14_1004 = arith.constant 14 : index
    %645 = vector.load %arg5[%c24_1003, %c14_1004] : memref<36x196xf32, #tpu.memory_space<vmem>>, vector<4x14xf32>
    tpu.vector_store %arg5[%c24_1003, %c14_1004], %644 {strides = array<i32>} : memref<36x196xf32, #tpu.memory_space<vmem>>, vector<4x14xf32>,
    %c1_1005 = arith.constant 1 : index
    %c0_1006 = arith.constant 0 : index
    %c64_1007 = arith.constant 64 : index
    %646 = vector.load %arg1[%c1_1005, %c0_1006, %c64_1007] : memref<2x4x256xf32, #tpu.memory_space<vmem>>, vector<1x4x14xf32>
    %647 = vector.shape_cast %646 : vector<1x4x14xf32> to vector<4x14xf32>
    %c24_1008 = arith.constant 24 : index
    %c28_1009 = arith.constant 28 : index
    %648 = vector.load %arg5[%c24_1008, %c28_1009] : memref<36x196xf32, #tpu.memory_space<vmem>>, vector<4x14xf32>
    tpu.vector_store %arg5[%c24_1008, %c28_1009], %647 {strides = array<i32>} : memref<36x196xf32, #tpu.memory_space<vmem>>, vector<4x14xf32>,
    %c1_1010 = arith.constant 1 : index
    %c0_1011 = arith.constant 0 : index
    %c80_1012 = arith.constant 80 : index
    %649 = vector.load %arg1[%c1_1010, %c0_1011, %c80_1012] : memref<2x4x256xf32, #tpu.memory_space<vmem>>, vector<1x4x14xf32>
    %650 = vector.shape_cast %649 : vector<1x4x14xf32> to vector<4x14xf32>
    %c24_1013 = arith.constant 24 : index
    %c42_1014 = arith.constant 42 : index
    %651 = vector.load %arg5[%c24_1013, %c42_1014] : memref<36x196xf32, #tpu.memory_space<vmem>>, vector<4x14xf32>
    tpu.vector_store %arg5[%c24_1013, %c42_1014], %650 {strides = array<i32>} : memref<36x196xf32, #tpu.memory_space<vmem>>, vector<4x14xf32>,
    %c1_1015 = arith.constant 1 : index
    %c0_1016 = arith.constant 0 : index
    %c96_1017 = arith.constant 96 : index
    %652 = vector.load %arg1[%c1_1015, %c0_1016, %c96_1017] : memref<2x4x256xf32, #tpu.memory_space<vmem>>, vector<1x4x14xf32>
    %653 = vector.shape_cast %652 : vector<1x4x14xf32> to vector<4x14xf32>
    %c24_1018 = arith.constant 24 : index
    %c56_1019 = arith.constant 56 : index
    %654 = vector.load %arg5[%c24_1018, %c56_1019] : memref<36x196xf32, #tpu.memory_space<vmem>>, vector<4x14xf32>
    tpu.vector_store %arg5[%c24_1018, %c56_1019], %653 {strides = array<i32>} : memref<36x196xf32, #tpu.memory_space<vmem>>, vector<4x14xf32>,
    %c1_1020 = arith.constant 1 : index
    %c0_1021 = arith.constant 0 : index
    %c112_1022 = arith.constant 112 : index
    %655 = vector.load %arg1[%c1_1020, %c0_1021, %c112_1022] : memref<2x4x256xf32, #tpu.memory_space<vmem>>, vector<1x4x14xf32>
    %656 = vector.shape_cast %655 : vector<1x4x14xf32> to vector<4x14xf32>
    %c24_1023 = arith.constant 24 : index
    %c70_1024 = arith.constant 70 : index
    %657 = vector.load %arg5[%c24_1023, %c70_1024] : memref<36x196xf32, #tpu.memory_space<vmem>>, vector<4x14xf32>
    tpu.vector_store %arg5[%c24_1023, %c70_1024], %656 {strides = array<i32>} : memref<36x196xf32, #tpu.memory_space<vmem>>, vector<4x14xf32>,
    %c1_1025 = arith.constant 1 : index
    %c0_1026 = arith.constant 0 : index
    %c128_1027 = arith.constant 128 : index
    %658 = vector.load %arg1[%c1_1025, %c0_1026, %c128_1027] : memref<2x4x256xf32, #tpu.memory_space<vmem>>, vector<1x4x14xf32>
    %659 = vector.shape_cast %658 : vector<1x4x14xf32> to vector<4x14xf32>
    %c24_1028 = arith.constant 24 : index
    %c84_1029 = arith.constant 84 : index
    %660 = vector.load %arg5[%c24_1028, %c84_1029] : memref<36x196xf32, #tpu.memory_space<vmem>>, vector<4x14xf32>
    tpu.vector_store %arg5[%c24_1028, %c84_1029], %659 {strides = array<i32>} : memref<36x196xf32, #tpu.memory_space<vmem>>, vector<4x14xf32>,
    %c1_1030 = arith.constant 1 : index
    %c0_1031 = arith.constant 0 : index
    %c144_1032 = arith.constant 144 : index
    %661 = vector.load %arg1[%c1_1030, %c0_1031, %c144_1032] : memref<2x4x256xf32, #tpu.memory_space<vmem>>, vector<1x4x14xf32>
    %662 = vector.shape_cast %661 : vector<1x4x14xf32> to vector<4x14xf32>
    %c24_1033 = arith.constant 24 : index
    %c98_1034 = arith.constant 98 : index
    %663 = vector.load %arg5[%c24_1033, %c98_1034] : memref<36x196xf32, #tpu.memory_space<vmem>>, vector<4x14xf32>
    tpu.vector_store %arg5[%c24_1033, %c98_1034], %662 {strides = array<i32>} : memref<36x196xf32, #tpu.memory_space<vmem>>, vector<4x14xf32>,
    %c1_1035 = arith.constant 1 : index
    %c0_1036 = arith.constant 0 : index
    %c160_1037 = arith.constant 160 : index
    %664 = vector.load %arg1[%c1_1035, %c0_1036, %c160_1037] : memref<2x4x256xf32, #tpu.memory_space<vmem>>, vector<1x4x14xf32>
    %665 = vector.shape_cast %664 : vector<1x4x14xf32> to vector<4x14xf32>
    %c24_1038 = arith.constant 24 : index
    %c112_1039 = arith.constant 112 : index
    %666 = vector.load %arg5[%c24_1038, %c112_1039] : memref<36x196xf32, #tpu.memory_space<vmem>>, vector<4x14xf32>
    tpu.vector_store %arg5[%c24_1038, %c112_1039], %665 {strides = array<i32>} : memref<36x196xf32, #tpu.memory_space<vmem>>, vector<4x14xf32>,
    %c1_1040 = arith.constant 1 : index
    %c0_1041 = arith.constant 0 : index
    %c176_1042 = arith.constant 176 : index
    %667 = vector.load %arg1[%c1_1040, %c0_1041, %c176_1042] : memref<2x4x256xf32, #tpu.memory_space<vmem>>, vector<1x4x14xf32>
    %668 = vector.shape_cast %667 : vector<1x4x14xf32> to vector<4x14xf32>
    %c24_1043 = arith.constant 24 : index
    %c126_1044 = arith.constant 126 : index
    %669 = vector.load %arg5[%c24_1043, %c126_1044] : memref<36x196xf32, #tpu.memory_space<vmem>>, vector<4x14xf32>
    tpu.vector_store %arg5[%c24_1043, %c126_1044], %668 {strides = array<i32>} : memref<36x196xf32, #tpu.memory_space<vmem>>, vector<4x14xf32>,
    %c1_1045 = arith.constant 1 : index
    %c0_1046 = arith.constant 0 : index
    %c192_1047 = arith.constant 192 : index
    %670 = vector.load %arg1[%c1_1045, %c0_1046, %c192_1047] : memref<2x4x256xf32, #tpu.memory_space<vmem>>, vector<1x4x14xf32>
    %671 = vector.shape_cast %670 : vector<1x4x14xf32> to vector<4x14xf32>
    %c24_1048 = arith.constant 24 : index
    %c140_1049 = arith.constant 140 : index
    %672 = vector.load %arg5[%c24_1048, %c140_1049] : memref<36x196xf32, #tpu.memory_space<vmem>>, vector<4x14xf32>
    tpu.vector_store %arg5[%c24_1048, %c140_1049], %671 {strides = array<i32>} : memref<36x196xf32, #tpu.memory_space<vmem>>, vector<4x14xf32>,
    %c1_1050 = arith.constant 1 : index
    %c0_1051 = arith.constant 0 : index
    %c208_1052 = arith.constant 208 : index
    %673 = vector.load %arg1[%c1_1050, %c0_1051, %c208_1052] : memref<2x4x256xf32, #tpu.memory_space<vmem>>, vector<1x4x14xf32>
    %674 = vector.shape_cast %673 : vector<1x4x14xf32> to vector<4x14xf32>
    %c24_1053 = arith.constant 24 : index
    %c154_1054 = arith.constant 154 : index
    %675 = vector.load %arg5[%c24_1053, %c154_1054] : memref<36x196xf32, #tpu.memory_space<vmem>>, vector<4x14xf32>
    tpu.vector_store %arg5[%c24_1053, %c154_1054], %674 {strides = array<i32>} : memref<36x196xf32, #tpu.memory_space<vmem>>, vector<4x14xf32>,
    %c1_1055 = arith.constant 1 : index
    %c0_1056 = arith.constant 0 : index
    %c224_1057 = arith.constant 224 : index
    %676 = vector.load %arg1[%c1_1055, %c0_1056, %c224_1057] : memref<2x4x256xf32, #tpu.memory_space<vmem>>, vector<1x4x14xf32>
    %677 = vector.shape_cast %676 : vector<1x4x14xf32> to vector<4x14xf32>
    %c24_1058 = arith.constant 24 : index
    %c168_1059 = arith.constant 168 : index
    %678 = vector.load %arg5[%c24_1058, %c168_1059] : memref<36x196xf32, #tpu.memory_space<vmem>>, vector<4x14xf32>
    tpu.vector_store %arg5[%c24_1058, %c168_1059], %677 {strides = array<i32>} : memref<36x196xf32, #tpu.memory_space<vmem>>, vector<4x14xf32>,
    %c1_1060 = arith.constant 1 : index
    %c0_1061 = arith.constant 0 : index
    %c240_1062 = arith.constant 240 : index
    %679 = vector.load %arg1[%c1_1060, %c0_1061, %c240_1062] : memref<2x4x256xf32, #tpu.memory_space<vmem>>, vector<1x4x14xf32>
    %680 = vector.shape_cast %679 : vector<1x4x14xf32> to vector<4x14xf32>
    %c24_1063 = arith.constant 24 : index
    %c182_1064 = arith.constant 182 : index
    %681 = vector.load %arg5[%c24_1063, %c182_1064] : memref<36x196xf32, #tpu.memory_space<vmem>>, vector<4x14xf32>
    tpu.vector_store %arg5[%c24_1063, %c182_1064], %680 {strides = array<i32>} : memref<36x196xf32, #tpu.memory_space<vmem>>, vector<4x14xf32>,
    %c1_1065 = arith.constant 1 : index
    %c0_1066 = arith.constant 0 : index
    %c33_1067 = arith.constant 33 : index
    %682 = vector.load %arg1[%c1_1065, %c0_1066, %c33_1067] : memref<2x4x256xf32, #tpu.memory_space<vmem>>, vector<1x4x14xf32>
    %683 = vector.shape_cast %682 : vector<1x4x14xf32> to vector<4x14xf32>
    %c28_1068 = arith.constant 28 : index
    %c0_1069 = arith.constant 0 : index
    %684 = vector.load %arg5[%c28_1068, %c0_1069] : memref<36x196xf32, #tpu.memory_space<vmem>>, vector<4x14xf32>
    tpu.vector_store %arg5[%c28_1068, %c0_1069], %683 {strides = array<i32>} : memref<36x196xf32, #tpu.memory_space<vmem>>, vector<4x14xf32>,
    %c1_1070 = arith.constant 1 : index
    %c0_1071 = arith.constant 0 : index
    %c49_1072 = arith.constant 49 : index
    %685 = vector.load %arg1[%c1_1070, %c0_1071, %c49_1072] : memref<2x4x256xf32, #tpu.memory_space<vmem>>, vector<1x4x14xf32>
    %686 = vector.shape_cast %685 : vector<1x4x14xf32> to vector<4x14xf32>
    %c28_1073 = arith.constant 28 : index
    %c14_1074 = arith.constant 14 : index
    %687 = vector.load %arg5[%c28_1073, %c14_1074] : memref<36x196xf32, #tpu.memory_space<vmem>>, vector<4x14xf32>
    tpu.vector_store %arg5[%c28_1073, %c14_1074], %686 {strides = array<i32>} : memref<36x196xf32, #tpu.memory_space<vmem>>, vector<4x14xf32>,
    %c1_1075 = arith.constant 1 : index
    %c0_1076 = arith.constant 0 : index
    %c65_1077 = arith.constant 65 : index
    %688 = vector.load %arg1[%c1_1075, %c0_1076, %c65_1077] : memref<2x4x256xf32, #tpu.memory_space<vmem>>, vector<1x4x14xf32>
    %689 = vector.shape_cast %688 : vector<1x4x14xf32> to vector<4x14xf32>
    %c28_1078 = arith.constant 28 : index
    %c28_1079 = arith.constant 28 : index
    %690 = vector.load %arg5[%c28_1078, %c28_1079] : memref<36x196xf32, #tpu.memory_space<vmem>>, vector<4x14xf32>
    tpu.vector_store %arg5[%c28_1078, %c28_1079], %689 {strides = array<i32>} : memref<36x196xf32, #tpu.memory_space<vmem>>, vector<4x14xf32>,
    %c1_1080 = arith.constant 1 : index
    %c0_1081 = arith.constant 0 : index
    %c81_1082 = arith.constant 81 : index
    %691 = vector.load %arg1[%c1_1080, %c0_1081, %c81_1082] : memref<2x4x256xf32, #tpu.memory_space<vmem>>, vector<1x4x14xf32>
    %692 = vector.shape_cast %691 : vector<1x4x14xf32> to vector<4x14xf32>
    %c28_1083 = arith.constant 28 : index
    %c42_1084 = arith.constant 42 : index
    %693 = vector.load %arg5[%c28_1083, %c42_1084] : memref<36x196xf32, #tpu.memory_space<vmem>>, vector<4x14xf32>
    tpu.vector_store %arg5[%c28_1083, %c42_1084], %692 {strides = array<i32>} : memref<36x196xf32, #tpu.memory_space<vmem>>, vector<4x14xf32>,
    %c1_1085 = arith.constant 1 : index
    %c0_1086 = arith.constant 0 : index
    %c97_1087 = arith.constant 97 : index
    %694 = vector.load %arg1[%c1_1085, %c0_1086, %c97_1087] : memref<2x4x256xf32, #tpu.memory_space<vmem>>, vector<1x4x14xf32>
    %695 = vector.shape_cast %694 : vector<1x4x14xf32> to vector<4x14xf32>
    %c28_1088 = arith.constant 28 : index
    %c56_1089 = arith.constant 56 : index
    %696 = vector.load %arg5[%c28_1088, %c56_1089] : memref<36x196xf32, #tpu.memory_space<vmem>>, vector<4x14xf32>
    tpu.vector_store %arg5[%c28_1088, %c56_1089], %695 {strides = array<i32>} : memref<36x196xf32, #tpu.memory_space<vmem>>, vector<4x14xf32>,
    %c1_1090 = arith.constant 1 : index
    %c0_1091 = arith.constant 0 : index
    %c113_1092 = arith.constant 113 : index
    %697 = vector.load %arg1[%c1_1090, %c0_1091, %c113_1092] : memref<2x4x256xf32, #tpu.memory_space<vmem>>, vector<1x4x14xf32>
    %698 = vector.shape_cast %697 : vector<1x4x14xf32> to vector<4x14xf32>
    %c28_1093 = arith.constant 28 : index
    %c70_1094 = arith.constant 70 : index
    %699 = vector.load %arg5[%c28_1093, %c70_1094] : memref<36x196xf32, #tpu.memory_space<vmem>>, vector<4x14xf32>
    tpu.vector_store %arg5[%c28_1093, %c70_1094], %698 {strides = array<i32>} : memref<36x196xf32, #tpu.memory_space<vmem>>, vector<4x14xf32>,
    %c1_1095 = arith.constant 1 : index
    %c0_1096 = arith.constant 0 : index
    %c129_1097 = arith.constant 129 : index
    %700 = vector.load %arg1[%c1_1095, %c0_1096, %c129_1097] : memref<2x4x256xf32, #tpu.memory_space<vmem>>, vector<1x4x14xf32>
    %701 = vector.shape_cast %700 : vector<1x4x14xf32> to vector<4x14xf32>
    %c28_1098 = arith.constant 28 : index
    %c84_1099 = arith.constant 84 : index
    %702 = vector.load %arg5[%c28_1098, %c84_1099] : memref<36x196xf32, #tpu.memory_space<vmem>>, vector<4x14xf32>
    tpu.vector_store %arg5[%c28_1098, %c84_1099], %701 {strides = array<i32>} : memref<36x196xf32, #tpu.memory_space<vmem>>, vector<4x14xf32>,
    %c1_1100 = arith.constant 1 : index
    %c0_1101 = arith.constant 0 : index
    %c145_1102 = arith.constant 145 : index
    %703 = vector.load %arg1[%c1_1100, %c0_1101, %c145_1102] : memref<2x4x256xf32, #tpu.memory_space<vmem>>, vector<1x4x14xf32>
    %704 = vector.shape_cast %703 : vector<1x4x14xf32> to vector<4x14xf32>
    %c28_1103 = arith.constant 28 : index
    %c98_1104 = arith.constant 98 : index
    %705 = vector.load %arg5[%c28_1103, %c98_1104] : memref<36x196xf32, #tpu.memory_space<vmem>>, vector<4x14xf32>
    tpu.vector_store %arg5[%c28_1103, %c98_1104], %704 {strides = array<i32>} : memref<36x196xf32, #tpu.memory_space<vmem>>, vector<4x14xf32>,
    %c1_1105 = arith.constant 1 : index
    %c0_1106 = arith.constant 0 : index
    %c161_1107 = arith.constant 161 : index
    %706 = vector.load %arg1[%c1_1105, %c0_1106, %c161_1107] : memref<2x4x256xf32, #tpu.memory_space<vmem>>, vector<1x4x14xf32>
    %707 = vector.shape_cast %706 : vector<1x4x14xf32> to vector<4x14xf32>
    %c28_1108 = arith.constant 28 : index
    %c112_1109 = arith.constant 112 : index
    %708 = vector.load %arg5[%c28_1108, %c112_1109] : memref<36x196xf32, #tpu.memory_space<vmem>>, vector<4x14xf32>
    tpu.vector_store %arg5[%c28_1108, %c112_1109], %707 {strides = array<i32>} : memref<36x196xf32, #tpu.memory_space<vmem>>, vector<4x14xf32>,
    %c1_1110 = arith.constant 1 : index
    %c0_1111 = arith.constant 0 : index
    %c177_1112 = arith.constant 177 : index
    %709 = vector.load %arg1[%c1_1110, %c0_1111, %c177_1112] : memref<2x4x256xf32, #tpu.memory_space<vmem>>, vector<1x4x14xf32>
    %710 = vector.shape_cast %709 : vector<1x4x14xf32> to vector<4x14xf32>
    %c28_1113 = arith.constant 28 : index
    %c126_1114 = arith.constant 126 : index
    %711 = vector.load %arg5[%c28_1113, %c126_1114] : memref<36x196xf32, #tpu.memory_space<vmem>>, vector<4x14xf32>
    tpu.vector_store %arg5[%c28_1113, %c126_1114], %710 {strides = array<i32>} : memref<36x196xf32, #tpu.memory_space<vmem>>, vector<4x14xf32>,
    %c1_1115 = arith.constant 1 : index
    %c0_1116 = arith.constant 0 : index
    %c193_1117 = arith.constant 193 : index
    %712 = vector.load %arg1[%c1_1115, %c0_1116, %c193_1117] : memref<2x4x256xf32, #tpu.memory_space<vmem>>, vector<1x4x14xf32>
    %713 = vector.shape_cast %712 : vector<1x4x14xf32> to vector<4x14xf32>
    %c28_1118 = arith.constant 28 : index
    %c140_1119 = arith.constant 140 : index
    %714 = vector.load %arg5[%c28_1118, %c140_1119] : memref<36x196xf32, #tpu.memory_space<vmem>>, vector<4x14xf32>
    tpu.vector_store %arg5[%c28_1118, %c140_1119], %713 {strides = array<i32>} : memref<36x196xf32, #tpu.memory_space<vmem>>, vector<4x14xf32>,
    %c1_1120 = arith.constant 1 : index
    %c0_1121 = arith.constant 0 : index
    %c209_1122 = arith.constant 209 : index
    %715 = vector.load %arg1[%c1_1120, %c0_1121, %c209_1122] : memref<2x4x256xf32, #tpu.memory_space<vmem>>, vector<1x4x14xf32>
    %716 = vector.shape_cast %715 : vector<1x4x14xf32> to vector<4x14xf32>
    %c28_1123 = arith.constant 28 : index
    %c154_1124 = arith.constant 154 : index
    %717 = vector.load %arg5[%c28_1123, %c154_1124] : memref<36x196xf32, #tpu.memory_space<vmem>>, vector<4x14xf32>
    tpu.vector_store %arg5[%c28_1123, %c154_1124], %716 {strides = array<i32>} : memref<36x196xf32, #tpu.memory_space<vmem>>, vector<4x14xf32>,
    %c1_1125 = arith.constant 1 : index
    %c0_1126 = arith.constant 0 : index
    %c225_1127 = arith.constant 225 : index
    %718 = vector.load %arg1[%c1_1125, %c0_1126, %c225_1127] : memref<2x4x256xf32, #tpu.memory_space<vmem>>, vector<1x4x14xf32>
    %719 = vector.shape_cast %718 : vector<1x4x14xf32> to vector<4x14xf32>
    %c28_1128 = arith.constant 28 : index
    %c168_1129 = arith.constant 168 : index
    %720 = vector.load %arg5[%c28_1128, %c168_1129] : memref<36x196xf32, #tpu.memory_space<vmem>>, vector<4x14xf32>
    tpu.vector_store %arg5[%c28_1128, %c168_1129], %719 {strides = array<i32>} : memref<36x196xf32, #tpu.memory_space<vmem>>, vector<4x14xf32>,
    %c1_1130 = arith.constant 1 : index
    %c0_1131 = arith.constant 0 : index
    %c241_1132 = arith.constant 241 : index
    %721 = vector.load %arg1[%c1_1130, %c0_1131, %c241_1132] : memref<2x4x256xf32, #tpu.memory_space<vmem>>, vector<1x4x14xf32>
    %722 = vector.shape_cast %721 : vector<1x4x14xf32> to vector<4x14xf32>
    %c28_1133 = arith.constant 28 : index
    %c182_1134 = arith.constant 182 : index
    %723 = vector.load %arg5[%c28_1133, %c182_1134] : memref<36x196xf32, #tpu.memory_space<vmem>>, vector<4x14xf32>
    tpu.vector_store %arg5[%c28_1133, %c182_1134], %722 {strides = array<i32>} : memref<36x196xf32, #tpu.memory_space<vmem>>, vector<4x14xf32>,
    %c1_1135 = arith.constant 1 : index
    %c0_1136 = arith.constant 0 : index
    %c34_1137 = arith.constant 34 : index
    %724 = vector.load %arg1[%c1_1135, %c0_1136, %c34_1137] : memref<2x4x256xf32, #tpu.memory_space<vmem>>, vector<1x4x14xf32>
    %725 = vector.shape_cast %724 : vector<1x4x14xf32> to vector<4x14xf32>
    %c32_1138 = arith.constant 32 : index
    %c0_1139 = arith.constant 0 : index
    %726 = vector.load %arg5[%c32_1138, %c0_1139] : memref<36x196xf32, #tpu.memory_space<vmem>>, vector<4x14xf32>
    tpu.vector_store %arg5[%c32_1138, %c0_1139], %725 {strides = array<i32>} : memref<36x196xf32, #tpu.memory_space<vmem>>, vector<4x14xf32>,
    %c1_1140 = arith.constant 1 : index
    %c0_1141 = arith.constant 0 : index
    %c50_1142 = arith.constant 50 : index
    %727 = vector.load %arg1[%c1_1140, %c0_1141, %c50_1142] : memref<2x4x256xf32, #tpu.memory_space<vmem>>, vector<1x4x14xf32>
    %728 = vector.shape_cast %727 : vector<1x4x14xf32> to vector<4x14xf32>
    %c32_1143 = arith.constant 32 : index
    %c14_1144 = arith.constant 14 : index
    %729 = vector.load %arg5[%c32_1143, %c14_1144] : memref<36x196xf32, #tpu.memory_space<vmem>>, vector<4x14xf32>
    tpu.vector_store %arg5[%c32_1143, %c14_1144], %728 {strides = array<i32>} : memref<36x196xf32, #tpu.memory_space<vmem>>, vector<4x14xf32>,
    %c1_1145 = arith.constant 1 : index
    %c0_1146 = arith.constant 0 : index
    %c66_1147 = arith.constant 66 : index
    %730 = vector.load %arg1[%c1_1145, %c0_1146, %c66_1147] : memref<2x4x256xf32, #tpu.memory_space<vmem>>, vector<1x4x14xf32>
    %731 = vector.shape_cast %730 : vector<1x4x14xf32> to vector<4x14xf32>
    %c32_1148 = arith.constant 32 : index
    %c28_1149 = arith.constant 28 : index
    %732 = vector.load %arg5[%c32_1148, %c28_1149] : memref<36x196xf32, #tpu.memory_space<vmem>>, vector<4x14xf32>
    tpu.vector_store %arg5[%c32_1148, %c28_1149], %731 {strides = array<i32>} : memref<36x196xf32, #tpu.memory_space<vmem>>, vector<4x14xf32>,
    %c1_1150 = arith.constant 1 : index
    %c0_1151 = arith.constant 0 : index
    %c82_1152 = arith.constant 82 : index
    %733 = vector.load %arg1[%c1_1150, %c0_1151, %c82_1152] : memref<2x4x256xf32, #tpu.memory_space<vmem>>, vector<1x4x14xf32>
    %734 = vector.shape_cast %733 : vector<1x4x14xf32> to vector<4x14xf32>
    %c32_1153 = arith.constant 32 : index
    %c42_1154 = arith.constant 42 : index
    %735 = vector.load %arg5[%c32_1153, %c42_1154] : memref<36x196xf32, #tpu.memory_space<vmem>>, vector<4x14xf32>
    tpu.vector_store %arg5[%c32_1153, %c42_1154], %734 {strides = array<i32>} : memref<36x196xf32, #tpu.memory_space<vmem>>, vector<4x14xf32>,
    %c1_1155 = arith.constant 1 : index
    %c0_1156 = arith.constant 0 : index
    %c98_1157 = arith.constant 98 : index
    %736 = vector.load %arg1[%c1_1155, %c0_1156, %c98_1157] : memref<2x4x256xf32, #tpu.memory_space<vmem>>, vector<1x4x14xf32>
    %737 = vector.shape_cast %736 : vector<1x4x14xf32> to vector<4x14xf32>
    %c32_1158 = arith.constant 32 : index
    %c56_1159 = arith.constant 56 : index
    %738 = vector.load %arg5[%c32_1158, %c56_1159] : memref<36x196xf32, #tpu.memory_space<vmem>>, vector<4x14xf32>
    tpu.vector_store %arg5[%c32_1158, %c56_1159], %737 {strides = array<i32>} : memref<36x196xf32, #tpu.memory_space<vmem>>, vector<4x14xf32>,
    %c1_1160 = arith.constant 1 : index
    %c0_1161 = arith.constant 0 : index
    %c114_1162 = arith.constant 114 : index
    %739 = vector.load %arg1[%c1_1160, %c0_1161, %c114_1162] : memref<2x4x256xf32, #tpu.memory_space<vmem>>, vector<1x4x14xf32>
    %740 = vector.shape_cast %739 : vector<1x4x14xf32> to vector<4x14xf32>
    %c32_1163 = arith.constant 32 : index
    %c70_1164 = arith.constant 70 : index
    %741 = vector.load %arg5[%c32_1163, %c70_1164] : memref<36x196xf32, #tpu.memory_space<vmem>>, vector<4x14xf32>
    tpu.vector_store %arg5[%c32_1163, %c70_1164], %740 {strides = array<i32>} : memref<36x196xf32, #tpu.memory_space<vmem>>, vector<4x14xf32>,
    %c1_1165 = arith.constant 1 : index
    %c0_1166 = arith.constant 0 : index
    %c130_1167 = arith.constant 130 : index
    %742 = vector.load %arg1[%c1_1165, %c0_1166, %c130_1167] : memref<2x4x256xf32, #tpu.memory_space<vmem>>, vector<1x4x14xf32>
    %743 = vector.shape_cast %742 : vector<1x4x14xf32> to vector<4x14xf32>
    %c32_1168 = arith.constant 32 : index
    %c84_1169 = arith.constant 84 : index
    %744 = vector.load %arg5[%c32_1168, %c84_1169] : memref<36x196xf32, #tpu.memory_space<vmem>>, vector<4x14xf32>
    tpu.vector_store %arg5[%c32_1168, %c84_1169], %743 {strides = array<i32>} : memref<36x196xf32, #tpu.memory_space<vmem>>, vector<4x14xf32>,
    %c1_1170 = arith.constant 1 : index
    %c0_1171 = arith.constant 0 : index
    %c146_1172 = arith.constant 146 : index
    %745 = vector.load %arg1[%c1_1170, %c0_1171, %c146_1172] : memref<2x4x256xf32, #tpu.memory_space<vmem>>, vector<1x4x14xf32>
    %746 = vector.shape_cast %745 : vector<1x4x14xf32> to vector<4x14xf32>
    %c32_1173 = arith.constant 32 : index
    %c98_1174 = arith.constant 98 : index
    %747 = vector.load %arg5[%c32_1173, %c98_1174] : memref<36x196xf32, #tpu.memory_space<vmem>>, vector<4x14xf32>
    tpu.vector_store %arg5[%c32_1173, %c98_1174], %746 {strides = array<i32>} : memref<36x196xf32, #tpu.memory_space<vmem>>, vector<4x14xf32>,
    %c1_1175 = arith.constant 1 : index
    %c0_1176 = arith.constant 0 : index
    %c162_1177 = arith.constant 162 : index
    %748 = vector.load %arg1[%c1_1175, %c0_1176, %c162_1177] : memref<2x4x256xf32, #tpu.memory_space<vmem>>, vector<1x4x14xf32>
    %749 = vector.shape_cast %748 : vector<1x4x14xf32> to vector<4x14xf32>
    %c32_1178 = arith.constant 32 : index
    %c112_1179 = arith.constant 112 : index
    %750 = vector.load %arg5[%c32_1178, %c112_1179] : memref<36x196xf32, #tpu.memory_space<vmem>>, vector<4x14xf32>
    tpu.vector_store %arg5[%c32_1178, %c112_1179], %749 {strides = array<i32>} : memref<36x196xf32, #tpu.memory_space<vmem>>, vector<4x14xf32>,
    %c1_1180 = arith.constant 1 : index
    %c0_1181 = arith.constant 0 : index
    %c178_1182 = arith.constant 178 : index
    %751 = vector.load %arg1[%c1_1180, %c0_1181, %c178_1182] : memref<2x4x256xf32, #tpu.memory_space<vmem>>, vector<1x4x14xf32>
    %752 = vector.shape_cast %751 : vector<1x4x14xf32> to vector<4x14xf32>
    %c32_1183 = arith.constant 32 : index
    %c126_1184 = arith.constant 126 : index
    %753 = vector.load %arg5[%c32_1183, %c126_1184] : memref<36x196xf32, #tpu.memory_space<vmem>>, vector<4x14xf32>
    tpu.vector_store %arg5[%c32_1183, %c126_1184], %752 {strides = array<i32>} : memref<36x196xf32, #tpu.memory_space<vmem>>, vector<4x14xf32>,
    %c1_1185 = arith.constant 1 : index
    %c0_1186 = arith.constant 0 : index
    %c194_1187 = arith.constant 194 : index
    %754 = vector.load %arg1[%c1_1185, %c0_1186, %c194_1187] : memref<2x4x256xf32, #tpu.memory_space<vmem>>, vector<1x4x14xf32>
    %755 = vector.shape_cast %754 : vector<1x4x14xf32> to vector<4x14xf32>
    %c32_1188 = arith.constant 32 : index
    %c140_1189 = arith.constant 140 : index
    %756 = vector.load %arg5[%c32_1188, %c140_1189] : memref<36x196xf32, #tpu.memory_space<vmem>>, vector<4x14xf32>
    tpu.vector_store %arg5[%c32_1188, %c140_1189], %755 {strides = array<i32>} : memref<36x196xf32, #tpu.memory_space<vmem>>, vector<4x14xf32>,
    %c1_1190 = arith.constant 1 : index
    %c0_1191 = arith.constant 0 : index
    %c210_1192 = arith.constant 210 : index
    %757 = vector.load %arg1[%c1_1190, %c0_1191, %c210_1192] : memref<2x4x256xf32, #tpu.memory_space<vmem>>, vector<1x4x14xf32>
    %758 = vector.shape_cast %757 : vector<1x4x14xf32> to vector<4x14xf32>
    %c32_1193 = arith.constant 32 : index
    %c154_1194 = arith.constant 154 : index
    %759 = vector.load %arg5[%c32_1193, %c154_1194] : memref<36x196xf32, #tpu.memory_space<vmem>>, vector<4x14xf32>
    tpu.vector_store %arg5[%c32_1193, %c154_1194], %758 {strides = array<i32>} : memref<36x196xf32, #tpu.memory_space<vmem>>, vector<4x14xf32>,
    %c1_1195 = arith.constant 1 : index
    %c0_1196 = arith.constant 0 : index
    %c226_1197 = arith.constant 226 : index
    %760 = vector.load %arg1[%c1_1195, %c0_1196, %c226_1197] : memref<2x4x256xf32, #tpu.memory_space<vmem>>, vector<1x4x14xf32>
    %761 = vector.shape_cast %760 : vector<1x4x14xf32> to vector<4x14xf32>
    %c32_1198 = arith.constant 32 : index
    %c168_1199 = arith.constant 168 : index
    %762 = vector.load %arg5[%c32_1198, %c168_1199] : memref<36x196xf32, #tpu.memory_space<vmem>>, vector<4x14xf32>
    tpu.vector_store %arg5[%c32_1198, %c168_1199], %761 {strides = array<i32>} : memref<36x196xf32, #tpu.memory_space<vmem>>, vector<4x14xf32>,
    %c1_1200 = arith.constant 1 : index
    %c0_1201 = arith.constant 0 : index
    %c242_1202 = arith.constant 242 : index
    %763 = vector.load %arg1[%c1_1200, %c0_1201, %c242_1202] : memref<2x4x256xf32, #tpu.memory_space<vmem>>, vector<1x4x14xf32>
    %764 = vector.shape_cast %763 : vector<1x4x14xf32> to vector<4x14xf32>
    %c32_1203 = arith.constant 32 : index
    %c182_1204 = arith.constant 182 : index
    %765 = vector.load %arg5[%c32_1203, %c182_1204] : memref<36x196xf32, #tpu.memory_space<vmem>>, vector<4x14xf32>
    tpu.vector_store %arg5[%c32_1203, %c182_1204], %764 {strides = array<i32>} : memref<36x196xf32, #tpu.memory_space<vmem>>, vector<4x14xf32>,
    %c0_1205 = arith.constant 0 : index
    %c0_1206 = arith.constant 0 : index
    %766 = vector.load %arg5[%c0_1205, %c0_1206] : memref<36x196xf32, #tpu.memory_space<vmem>>, vector<36x196xf32>
    %cst_1207 = arith.constant dense<0.000000e+00> : vector<8x196xf32>
    %767 = tpu.matmul %0, %766, %cst_1207 {dimension_numbers = #tpu.dot_dimension_numbers<[1], [0], [0], [1], [0, 0, 1, 1], [], []>} : vector<8x36xf32>, vector<36x196xf32>, vector<8x196xf32> -> vector<8x196xf32>
    %768 = arith.addf %767, %3 : vector<8x196xf32>
    %c1_1208 = arith.constant 1 : index
    %c0_1209 = arith.constant 0 : index
    %c0_1210 = arith.constant 0 : index
    %769 = vector.load %arg4[%c1_1208, %c0_1209, %c0_1210] : memref<2x8x196xf32, #tpu.memory_space<vmem>>, vector<1x8x196xf32>
    %770 = vector.shape_cast %769 : vector<1x8x196xf32> to vector<8x196xf32>
    %771 = vector.shape_cast %768 : vector<8x196xf32> to vector<1x8x196xf32>
    tpu.vector_store %arg4[%c1_1208, %c0_1209, %c0_1210], %771 {strides = array<i32>} : memref<2x8x196xf32, #tpu.memory_space<vmem>>, vector<1x8x196xf32>,
    return
  }
  func.func @transform_0(%arg0: i32) -> (i32, i32, i32) {
    %c0_i32 = arith.constant 0 : i32
    %c0_i32_0 = arith.constant 0 : i32
    %c0_i32_1 = arith.constant 0 : i32
    %c0_i32_2 = arith.constant 0 : i32
    return %c0_i32, %c0_i32_0, %c0_i32_1 : i32, i32, i32
  }
  func.func @transform_1(%arg0: i32) -> (i32, i32) {
    %c0_i32 = arith.constant 0 : i32
    %c0_i32_0 = arith.constant 0 : i32
    %c0_i32_1 = arith.constant 0 : i32
    return %c0_i32, %c0_i32_0 : i32, i32
  }
  func.func @transform_2(%arg0: i32) -> (i32, i32) {
    %c0_i32 = arith.constant 0 : i32
    %c0_i32_0 = arith.constant 0 : i32
    %c0_i32_1 = arith.constant 0 : i32
    return %c0_i32, %c0_i32_0 : i32, i32
  }
  func.func @transform_3(%arg0: i32) -> (i32, i32, i32) {
    %c0_i32 = arith.constant 0 : i32
    %c0_i32_0 = arith.constant 0 : i32
    %c0_i32_1 = arith.constant 0 : i32
    %c0_i32_2 = arith.constant 0 : i32
    return %c0_i32, %c0_i32_0, %c0_i32_1 : i32, i32, i32
  }
}

</mosaic_0001>

<bundles_post_ra>
// kernel: conv2d_pallas.1
= control target key start
LH: loop header
LB: loop body
LE: loop exit
PB: predicated region body
PF: predicated region fallthrough
CT: control target
= control target key end

     0   :  { %v2184_v0 = vmov 0   ;;  %s3641_s16 = smov 124   ;;  %s3639_s21 = smov 122   ;;  %vm22_vm0 = vcmask 109568   ;;  %vm29_vm1 = vcmask 224368   ;;  %vm36_vm2 = vcmask 339168   ;;  %s3617_s2 = inlined_call_operand.vmem [shape: f32[8,1], index: 2, kind: input, shape index: {}]   ;;  %s3618_s0 = inlined_call_operand.vmem [shape: f32[2,4,256], index: 0, kind: input, shape index: {}]   ;;  %s3619_s1 = inlined_call_operand.vmem [shape: f32[8,36], index: 1, kind: input, shape index: {}]   ;;  %s3620_s3 = inlined_call_operand.vmem [shape: f32[2,8,196], index: 3, kind: output, shape index: {}]  }
   0x1   :  { %2071 = vset.pattern.permute.xlu0 %v2184_v0  ;;  %v15_v1 = vld [vmem:[%s3617_s2] sm:$0xff]  ;;  %s3651_s23 = smov 126   ;;  %s3635_s26 = smov 118   ;;  %vm43_vm3 = vcmask 453968   ;;  %vm87_vm4 = vcmask 93184   ;;  %vm50_vm5 = vcmask 568768  }
   0x2   :  { %v31_v2 = vld [vmem:[%s3618_s0] sm:$0xf]  ;;  %18 = vperm.xlu0 %2071, %v15_v1   ;;  %s3637_s29 = smov 120   ;;  %s3631_s5 = smov 114   ;;  %v80_v9 = vld [vmem:[%s3618_s0 + $0x4] sm:$0xf] }
   0x3   :  { %33 = vrot.lane.b32.xlu1 %v31_v2, %s3641_s16  ;;  %v38_v3 = vld [vmem:[%s3618_s0] sm:$0xf]  ;;  %s3633_s8 = smov 116   ;;  %v73_v10 = vld [vmem:[%s3618_s0 + $0x4] sm:$0xf]  ;;  %s3711_s11 = smov 110  }
   0x4   :  { %v24_v4 = vld [vmem:[%s3618_s0] sm:$0xf]  ;;  %v96_v11 = vld [vmem:[%s3618_s0 + $0x4] sm:$0xf]  ;;  %s3653_s14 = smov 112   ;;  %s3677_s18 = smov 106  }
   0x5   :  { %v52_v5 = vld [vmem:[%s3618_s0] sm:$0xf]  ;;  %v89_v12 = vld [vmem:[%s3618_s0 + $0x4] sm:$0xf]  ;;  %s3681_s2 = smov 108   ;;  %s3673_s28 = smov 102  }
   0x6   :  { %26 = vrot.lane.b32.xlu0 %v24_v4, %s3651_s23  ;;  %v45_v6 = vld [vmem:[%s3618_s0] sm:$0xf]  ;;  %v110_v13 = vld [vmem:[%s3618_s0 + $0x4] sm:$0xf]  ;;  %s3675_s30 = smov 104   ;;  %s3627_s10 = smov 125  }
   0x7   :  { %40 = vrot.lane.b32.xlu1 %v38_v3, %s3639_s21  ;;  %v66_v7 = vld [vmem:[%s3618_s0] sm:$0xf]  ;;  %v103_v14 = vld [vmem:[%s3618_s0 + $0x4] sm:$0xf]  ;;  %s3628_s12 = smov 127   ;;  %s3625_s20 = smov 121  }
   0x8   :  { %v59_v8 = vld [vmem:[%s3618_s0] sm:$0xf]  ;;  %s3626_s22 = smov 123   ;;  %s3621_s6 = smov 117   ;;  %v2078_v24 = vld [vmem:[%s3618_s0 + $0x4] ss:$0 sps:$4 sm:$0xff]  }
   0x9   :  { %v2072_v15 = vld [vmem:[%s3618_s0] ss:$0 sps:$4 sm:$0xff]   ;;  %s3624_s13 = smov 119   ;;  %s3622_s25 = smov 113   ;;  %v2083_v25 = vld [vmem:[%s3618_s0 + $0x4] ss:$0 sps:$4 sm:$0xff]  }
   0xa   :  { %47 = vrot.lane.b32.xlu0 %v45_v6, %s3637_s29  ;;  %v2075_v16 = vld [vmem:[%s3618_s0] ss:$0 sps:$4 sm:$0xff]   ;;  %s3623_s27 = smov 115   ;;  %v2080_v26 = vld [vmem:[%s3618_s0 + $0x4] ss:$0 sps:$4 sm:$0xff]   ;;  %s3679_s15 = smov 109  }
   0xb   :  { %54 = vrot.lane.b32.xlu1 %v52_v5, %s3635_s26  ;;  %v2073_v17 = vld [vmem:[%s3618_s0] ss:$0 sps:$4 sm:$0xff]   ;;  %s3683_s17 = smov 111   ;;  %v2084_v27 = vld [vmem:[%s3618_s0 + $0x4] ss:$0 sps:$4 sm:$0xff]   ;;  %s3643_s4 = smov 105  }
   0xc   :  { %v2077_v18 = vld [vmem:[%s3618_s0] ss:$0 sps:$4 sm:$0xff]   ;;  %v2082_v28 = vld [vmem:[%s3618_s0 + $0x4] ss:$0 sps:$4 sm:$0xff]   ;;  %s3649_s7 = smov 107   ;;  %s3704_s24 = smov 94  }
   0xd   :  { %v2074_v19 = vld [vmem:[%s3618_s0] ss:$0 sps:$4 sm:$0xff]   ;;  %v2085_v29 = vld [vmem:[%s3618_s0 + $0x4] ss:$0 sps:$4 sm:$0xff]   ;;  %s2217_s19 = smov 92   ;;  %vm57_vm6 = vcmask 683568  }
   0xe   :  { %61 = vrot.lane.b32.xlu0 %v59_v8, %s3633_s8  ;;  %v2079_v20 = vld [vmem:[%s3618_s0] ss:$0 sps:$4 sm:$0xff]   ;;  %v285_v38 = vld [vmem:[%s3618_s0 + $0x4] sm:$0xf]  ;;  %vm64_vm7 = vcmask 798368   ;;  %vm3685_vm8 = vcmask 913168  }
   0xf   :  { %68 = vrot.lane.b32.xlu1 %v66_v7, %s3631_s5  ;;  %v21_v21 = vld [vmem:[%s3618_s0] sm:$0xf]  ;;  %v279_v39 = vld [vmem:[%s3618_s0 + $0x4] sm:$0xf]  ;;  %vm3686_vm9 = vcmask 1027968   ;;  %vm3687_vm10 = vcmask 1044464  }
  0x10   :  { %23 = vst.msk [vmem:[#allocation2] sm:$0xf] %vm22_vm0, %v21_v21  ;;  %v2076_v22 = vld [vmem:[%s3618_s0] ss:$0 sps:$4 sm:$0xff]   ;;  %v298_v40 = vld [vmem:[%s3618_s0 + $0x4] sm:$0xf] }
  0x11   :  { %v2081_v23 = vld [vmem:[%s3618_s0] ss:$0 sps:$4 sm:$0xff]   ;;  %v292_v41 = vld [vmem:[%s3618_s0 + $0x4] sm:$0xf]  ;;  %vm3660_vm11 = vcmask 207968   ;;  %vm3655_vm12 = vcmask 322768  }
  0x12   :  { %75 = vrot.lane.b32.xlu0 %v73_v10, %s3653_s14  ;;  %v237_v30 = vld [vmem:[%s3618_s0] sm:$0xf]  ;;  %v310_v42 = vld [vmem:[%s3618_s0 + $0x4] sm:$0xf]  ;;  %vm3657_vm13 = vcmask 437568   ;;  %vm3656_vm14 = vcmask 552368  }
  0x13   :  { %82 = vrot.lane.b32.xlu1 %v80_v9, %s3711_s11  ;;  %v231_v31 = vld [vmem:[%s3618_s0] sm:$0xf]  ;;  %v304_v43 = vld [vmem:[%s3618_s0 + $0x4] sm:$0xf]  ;;  %vm3658_vm15 = vcmask 113668   ;;  %s2230_s9 = smov 78  }
  0x14   :  { %v249_v32 = vld [vmem:[%s3618_s0] sm:$0xf]  ;;  %v2090_v50 = vld [vmem:[%s3618_s0 + $0x4] ss:$0 sps:$4 sm:$0xff]  }
  0x15   :  { %v243_v33 = vld [vmem:[%s3618_s0] sm:$0xf]  ;;  %v2092_v52 = vld [vmem:[%s3618_s0 + $0x4] ss:$0 sps:$4 sm:$0xff]  }
  0x16   :  { %91 = vrot.lane.b32.xlu0 %v89_v12, %s3681_s2  ;;  %v261_v34 = vld [vmem:[%s3618_s0] sm:$0xf]  ;;  %v2097_v53 = vld [vmem:[%s3618_s0 + $0x4] ss:$0 sps:$4 sm:$0xff]  }
  0x17   :  { %98 = vrot.lane.b32.xlu1 %v96_v11, %s3677_s18  ;;  %v255_v35 = vld [vmem:[%s3618_s0] sm:$0xf]  ;;  %v2094_v54 = vld [vmem:[%s3618_s0 + $0x4] ss:$0 sps:$4 sm:$0xff]  }
  0x18   :  { %v273_v36 = vld [vmem:[%s3618_s0] sm:$0xf]  ;;  %v2098_v55 = vld [vmem:[%s3618_s0 + $0x4] ss:$0 sps:$4 sm:$0xff]  }
  0x19   :  { %v267_v37 = vld [vmem:[%s3618_s0] sm:$0xf]  ;;  %v2096_v56 = vld [vmem:[%s3618_s0 + $0x4] ss:$0 sps:$4 sm:$0xff]  }
  0x1a   :  { %105 = vrot.lane.b32.xlu0 %v103_v14, %s3675_s30  ;;  %v2086_v44 = vld [vmem:[%s3618_s0] ss:$0 sps:$4 sm:$0xff]   ;;  %v2099_v57 = vld [vmem:[%s3618_s0 + $0x4] ss:$0 sps:$4 sm:$0xff]  }
  0x1b   :  { %112 = vrot.lane.b32.xlu1 %v110_v13, %s3673_s28  ;;  %v2089_v45 = vld [vmem:[%s3618_s0] ss:$0 sps:$4 sm:$0xff]   ;;  %v457_v2 = vld [vmem:[%s3618_s0 + $0x4] sm:$0xf] }
  0x1c   :  { %v2087_v46 = vld [vmem:[%s3618_s0] ss:$0 sps:$4 sm:$0xff]   ;;  %v469_v6 = vld [vmem:[%s3618_s0 + $0x4] sm:$0xf] }
  0x1d   :  { %v2091_v47 = vld [vmem:[%s3618_s0] ss:$0 sps:$4 sm:$0xff]   ;;  %v463_v7 = vld [vmem:[%s3618_s0 + $0x4] sm:$0xf] }
  0x1e   :  { %120 = vrot.lane.b32.xlu0 %v2075_v16, %s3628_s12  ;;  %v2088_v48 = vld [vmem:[%s3618_s0] ss:$0 sps:$4 sm:$0xff]   ;;  %s3666_s12 = smov 98   ;;  %v482_v10 = vld [vmem:[%s3618_s0 + $0x4] sm:$0xf] }
  0x1f   :  { %128 = vrot.lane.b32.xlu1 %v2072_v15, %s3627_s10  ;;  %s3671_s10 = smov 100   ;;  %v2093_v49 = vld [vmem:[%s3618_s0] ss:$0 sps:$4 sm:$0xff]   ;;  %v476_v11 = vld [vmem:[%s3618_s0 + $0x4] sm:$0xf] }
  0x20   :  { %v2095_v51 = vld [vmem:[%s3618_s0] ss:$0 sps:$4 sm:$0xff]   ;;  %v494_v14 = vld [vmem:[%s3618_s0 + $0x4] sm:$0xf] }
  0x21   :  { %v421_v58 = vld [vmem:[%s3618_s0] sm:$0xf]  ;;  %v488_v15 = vld [vmem:[%s3618_s0 + $0x4] sm:$0xf] }
  0x22   :  { %136 = vrot.lane.b32.xlu0 %v2077_v18, %s3626_s22  ;;  %s3717_s22 = smov 86   ;;  %v415_v59 = vld [vmem:[%s3618_s0] sm:$0xf] }
  0x23   :  { %144 = vrot.lane.b32.xlu1 %v2073_v17, %s3625_s20  ;;  %s3629_s20 = smov 103   ;;  %v433_v60 = vld [vmem:[%s3618_s0] sm:$0xf] }
  0x24   :  { %v427_v61 = vld [vmem:[%s3618_s0] sm:$0xf] }
  0x25   :  { %v445_v63 = vld [vmem:[%s3618_s0] sm:$0xf] }
  0x26   :  { %152 = vrot.lane.b32.xlu0 %v2079_v20, %s3624_s13  ;;  %s3647_s13 = smov 101   ;;  %v439_v0 = vld [vmem:[%s3618_s0] sm:$0xf] }
  0x27   :  { %160 = vrot.lane.b32.xlu1 %v2074_v19, %s3621_s6  ;;  %v451_v3 = vld [vmem:[%s3618_s0] sm:$0xf]  ;;  %s3757_s6 = smov 112  }
  0x28   :  { %v2100_v18 = vld [vmem:[%s3618_s0] ss:$0 sps:$4 sm:$0xff]  }
  0x29   :  { %v2103_v19 = vld [vmem:[%s3618_s0] ss:$0 sps:$4 sm:$0xff]  }
  0x2a   :  { %168 = vrot.lane.b32.xlu0 %v2081_v23, %s3623_s27  ;;  %v2105_v23 = vld [vmem:[%s3618_s0] ss:$0 sps:$4 sm:$0xff]   ;;  %s3689_s27 = smov 80  }
  0x2b   :  { %176 = vrot.lane.b32.xlu1 %v2076_v22, %s3622_s25  ;;  %s3702_s25 = smov 96   ;;  %v2101_v22 = vld [vmem:[%s3618_s0] ss:$0 sps:$4 sm:$0xff]  }
  0x2e   :  { %184 = vrot.lane.b32.xlu0 %v2083_v25, %s3683_s17 }
  0x2f   :  { %192 = vrot.lane.b32.xlu1 %v2078_v24, %s3679_s15 }
  0x32   :  { %202 = vrot.lane.b32.xlu0 %v2084_v27, %s3649_s7  ;;  %v2107_v27 = vld [vmem:[%s3618_s0] ss:$0 sps:$4 sm:$0xff]  }
  0x33   :  { %210 = vrot.lane.b32.xlu1 %v2080_v26, %s3643_s4  ;;  %v2102_v26 = vld [vmem:[%s3618_s0] ss:$0 sps:$4 sm:$0xff]  }
  0x36   :  { %218 = vrot.lane.b32.xlu0 %v2085_v29, %s3629_s20  ;;  %s3708_s20 = smov 90  }
  0x37   :  { %226 = vrot.lane.b32.xlu1 %v2082_v28, %s3647_s13 }
  0x3a   :  { %233 = vrot.lane.b32.xlu0 %v231_v31, %s3651_s23  ;;  %v2109_v31 = vld [vmem:[%s3618_s0] ss:$0 sps:$4 sm:$0xff]   ;;  %s2232_s23 = smov 74  }
  0x3b   :  { %239 = vrot.lane.b32.xlu1 %v237_v30, %s3641_s16  ;;  %v2104_v30 = vld [vmem:[%s3618_s0 + $0x4] ss:$0 sps:$4 sm:$0xff]   ;;  %s3720_s16 = smov 84  }
  0x3e   :  { %245 = vrot.lane.b32.xlu0 %v243_v33, %s3639_s21  ;;  %s3646_s21 = smov 99  }
  0x3f   :  { %251 = vrot.lane.b32.xlu1 %v249_v32, %s3637_s29  ;;  %s3714_s29 = smov 88  }
  0x42   :  { %257 = vrot.lane.b32.xlu0 %v255_v35, %s3635_s26  ;;  %s3721_s26 = smov 103   ;;  %v2111_v35 = vld [vmem:[%s3618_s0 + $0x4] ss:$0 sps:$4 sm:$0xff]  }
  0x43   :  { %263 = vrot.lane.b32.xlu1 %v261_v34, %s3633_s8  ;;  %s3645_s8 = smov 97   ;;  %v2106_v34 = vld [vmem:[%s3618_s0 + $0x4] ss:$0 sps:$4 sm:$0xff]  }
  0x46   :  { %269 = vrot.lane.b32.xlu0 %v267_v37, %s3631_s5  ;;  %s3701_s5 = smov 95  }
  0x47   :  { %275 = vrot.lane.b32.xlu1 %v273_v36, %s3653_s14 }
  0x4a   :  { %281 = vrot.lane.b32.xlu0 %v279_v39, %s3711_s11  ;;  %v2112_v39 = vld [vmem:[%s3618_s0 + $0x4] ss:$0 sps:$4 sm:$0xff]  }
  0x4b   :  { %287 = vrot.lane.b32.xlu1 %v285_v38, %s3681_s2  ;;  %v2108_v38 = vld [vmem:[%s3618_s0 + $0x4] ss:$0 sps:$4 sm:$0xff]  }
  0x4e   :  { %294 = vrot.lane.b32.xlu0 %v292_v41, %s3677_s18 }
  0x4f   :  { %300 = vrot.lane.b32.xlu1 %v298_v40, %s3675_s30 }
  0x52   :  { %306 = vrot.lane.b32.xlu0 %v304_v43, %s3673_s28  ;;  %v2113_v43 = vld [vmem:[%s3618_s0 + $0x4] ss:$0 sps:$4 sm:$0xff]  }
  0x53   :  { %312 = vrot.lane.b32.xlu1 %v310_v42, %s3671_s10  ;;  %v2110_v42 = vld [vmem:[%s3618_s0 + $0x4] ss:$0 sps:$4 sm:$0xff]  }
  0x56   :  { %319 = vrot.lane.b32.xlu0 %v2089_v45, %s3653_s14  ;;  %s3713_s14 = smov 87  }
  0x57   :  { %326 = vrot.lane.b32.xlu1 %v2086_v44, %s3711_s11 }
  0x5a   :  { %333 = vrot.lane.b32.xlu0 %v2091_v47, %s3681_s2  ;;  %v599_v47 = vld [vmem:[%s3618_s0] sm:$0xf] }
  0x5b   :  { %340 = vrot.lane.b32.xlu1 %v2087_v46, %s3677_s18  ;;  %v605_v46 = vld [vmem:[%s3618_s0] sm:$0xf] }
  0x5e   :  { %347 = vrot.lane.b32.xlu0 %v2093_v49, %s3675_s30 }
  0x5f   :  { %354 = vrot.lane.b32.xlu1 %v2088_v48, %s3673_s28 }
  0x62   :  { %361 = vrot.lane.b32.xlu0 %v2095_v51, %s3671_s10  ;;  %v611_v51 = vld [vmem:[%s3618_s0] sm:$0xf] }
  0x63   :  { %368 = vrot.lane.b32.xlu1 %v2090_v50, %s3666_s12  ;;  %v617_v50 = vld [vmem:[%s3618_s0] sm:$0xf] }
  0x66   :  { %375 = vrot.lane.b32.xlu0 %v2097_v53, %s3702_s25 }
  0x67   :  { %382 = vrot.lane.b32.xlu1 %v2092_v52, %s3704_s24 }
  0x6a   :  { %390 = vrot.lane.b32.xlu0 %v2098_v55, %s2217_s19  ;;  %v623_v55 = vld [vmem:[%s3618_s0] sm:$0xf] }
  0x6b   :  { %397 = vrot.lane.b32.xlu1 %v2094_v54, %s3708_s20  ;;  %v629_v54 = vld [vmem:[%s3618_s0] sm:$0xf] }
  0x6e   :  { %404 = vrot.lane.b32.xlu0 %v2099_v57, %s3714_s29 }
  0x6f   :  { %411 = vrot.lane.b32.xlu1 %v2096_v56, %s3717_s22 }
  0x72   :  { %417 = vrot.lane.b32.xlu0 %v415_v59, %s3683_s17  ;;  %v635_v59 = vld [vmem:[%s3618_s0 + $0x4] sm:$0xf]  ;;  %s3716_s17 = smov 72  }
  0x73   :  { %423 = vrot.lane.b32.xlu1 %v421_v58, %s3679_s15  ;;  %v641_v58 = vld [vmem:[%s3618_s0 + $0x4] sm:$0xf]  ;;  %s3765_s15 = smov 124  }
  0x75   :  { %v34_v62 = vpop.permute.xlu1 %33 }
  0x76   :  { %429 = vrot.lane.b32.xlu0 %v427_v61, %s3649_s7  ;;  %s2233_s7 = smov 76  }
  0x77   :  { %435 = vrot.lane.b32.xlu1 %v433_v60, %s3643_s4  ;;  %s2222_s4 = smov 93  }
  0x79   :  { %v41_v1 = vpop.permute.xlu1 %40 }
  0x7a   :  { %441 = vrot.lane.b32.xlu0 %v439_v0, %s3721_s26 }
  0x7b   :  { %447 = vrot.lane.b32.xlu1 %v445_v63, %s3647_s13  ;;  %s3694_s13 = smov 85   ;;  %v647_v63 = vld [vmem:[%s3618_s0 + $0x4] sm:$0xf] }
  0x7d   :  { %v55_v4 = vpop.permute.xlu1 %54  ;;  %v2523_v5 = vpop.permute.xlu0 %18 }
  0x7e   :  { %453 = vrot.lane.b32.xlu0 %v451_v3, %s3646_s21  ;;  %s3710_s21 = smov 91   ;;  %v660_v3 = vld [vmem:[%s3618_s0 + $0x4] sm:$0xf] }
  0x7f   :  { %459 = vrot.lane.b32.xlu1 %v457_v2, %s3645_s8  ;;  %s3706_s8 = smov 89   ;;  %v666_v2 = vld [vmem:[%s3618_s0 + $0x4] sm:$0xf] }
  0x81   :  { %v69_v8 = vpop.permute.xlu1 %68  ;;  %v27_v9 = vpop.permute.xlu0 %26 }
  0x82   :  { %30 = vst.msk [vmem:[#allocation2] sm:$0xf] %vm29_vm1, %v27_v9  ;;  %465 = vrot.lane.b32.xlu0 %v463_v7, %s3701_s5  ;;  %v678_v7 = vld [vmem:[%s3618_s0 + $0x4] sm:$0xf] }
  0x83   :  { %471 = vrot.lane.b32.xlu1 %v469_v6, %s2222_s4  ;;  %37 = vst.msk [vmem:[#allocation2] sm:$0xf] %vm36_vm2, %v34_v62  ;;  %v653_v62 = vld [vmem:[%s3618_s0 + $0x4] sm:$0xf] }
  0x84   :  { %44 = vst.msk [vmem:[#allocation2] sm:$0xf] %vm43_vm3, %v41_v1 }
  0x85   :  { %v83_v12 = vpop.permute.xlu1 %82  ;;  %v48_v13 = vpop.permute.xlu0 %47 }
  0x86   :  { %88 = vst.msk [vmem:[#allocation2 + $0x8] sm:$0xf] %vm87_vm4, %v83_v12  ;;  %478 = vrot.lane.b32.xlu0 %v476_v11, %s3710_s21  ;;  %v2114_v11 = vld [vmem:[%s3618_s0] ss:$0 sps:$4 sm:$0xff]  }
  0x87   :  { %51 = vst.msk [vmem:[#allocation2] sm:$0xf] %vm50_vm5, %v48_v13  ;;  %484 = vrot.lane.b32.xlu1 %v482_v10, %s3706_s8 }
  0x88   :  { %58 = vst.msk [vmem:[#allocation2] sm:$0xf] %vm57_vm6, %v55_v4 }
  0x89   :  { %v99_v16 = vpop.permute.xlu1 %98  ;;  %v62_v17 = vpop.permute.xlu0 %61 }
  0x8a   :  { %65 = vst.msk [vmem:[#allocation2] sm:$0xf] %vm64_vm7, %v62_v17  ;;  %490 = vrot.lane.b32.xlu0 %v488_v15, %s3713_s14  ;;  %v2115_v15 = vld [vmem:[%s3618_s0] ss:$0 sps:$4 sm:$0xff]  }
  0x8b   :  { %496 = vrot.lane.b32.xlu1 %v494_v14, %s3694_s13  ;;  %72 = vst.msk [vmem:[#allocation2] sm:$0xf] %vm3685_vm8, %v69_v8  ;;  %v672_v8 = vld [vmem:[%s3618_s0 + $0x4] sm:$0xf] }
  0x8d   :  { %v113_v20 = vpop.permute.xlu1 %112  ;;  %v76_v21 = vpop.permute.xlu0 %75 }
  0x8e   :  { %79 = vst.msk [vmem:[#allocation2] sm:$0xf] %vm3686_vm9, %v76_v21  ;;  %503 = vrot.lane.b32.xlu0 %v2103_v19, %s3711_s11  ;;  %v789_v19 = vld [vmem:[%s3618_s0] sm:$0xf] }
  0x8f   :  { %510 = vrot.lane.b32.xlu1 %v2100_v18, %s3681_s2  ;;  %86 = vst.msk [vmem:[#allocation2] sm:$0xf] %vm3687_vm10, %v83_v12  ;;  %v2116_v12 = vld [vmem:[%s3618_s0] ss:$0 sps:$4 sm:$0xff]   ;;  %s3692_s2 = smov 81  }
  0x91   :  { %v129_v24 = vpop.permute.xlu1 %128  ;;  %v92_v25 = vpop.permute.xlu0 %91 }
  0x92   :  { %95 = vst.msk [vmem:[#allocation2 + $0x8] sm:$0xf] %vm3660_vm11, %v92_v25  ;;  %517 = vrot.lane.b32.xlu0 %v2105_v23, %s3677_s18  ;;  %vm3664_vm11 = vcmask 687668   ;;  %s3696_s18 = smov 70   ;;  %v801_v23 = vld [vmem:[%s3618_s0] sm:$0xf] }
  0x93   :  { %524 = vrot.lane.b32.xlu1 %v2101_v22, %s3675_s30  ;;  %102 = vst.msk [vmem:[#allocation2 + $0x8] sm:$0xf] %vm3655_vm12, %v99_v16  ;;  %vm3659_vm12 = vcmask 228468   ;;  %v2117_v16 = vld [vmem:[%s3618_s0] ss:$0 sps:$4 sm:$0xff]   ;;  %s3707_s30 = smov 71  }
  0x95   :  { %v145_v28 = vpop.permute.xlu1 %144  ;;  %v106_v29 = vpop.permute.xlu0 %105 }
  0x96   :  { %109 = vst.msk [vmem:[#allocation2 + $0x8] sm:$0xf] %vm3657_vm13, %v106_v29  ;;  %531 = vrot.lane.b32.xlu0 %v2107_v27, %s3673_s28  ;;  %vm3661_vm13 = vcmask 458068   ;;  %v813_v27 = vld [vmem:[%s3618_s0] sm:$0xf]  ;;  %s3691_s28 = smov 83  }
  0x97   :  { %538 = vrot.lane.b32.xlu1 %v2102_v26, %s3671_s10  ;;  %116 = vst.msk [vmem:[#allocation2 + $0x8] sm:$0xf] %vm3656_vm14, %v113_v20  ;;  %vm3688_vm14 = vcmask 343268   ;;  %v783_v20 = vld [vmem:[%s3618_s0] sm:$0xf]  ;;  %s3693_s10 = smov 79  }
  0x99   :  { %v161_v32 = vpop.permute.xlu1 %160  ;;  %v121_v33 = vpop.permute.xlu0 %120 }
  0x9a   :  { %124 = vst.msk [vmem:[#allocation2] sm:$0xf0] %vm3658_vm15, %v121_v33  ;;  %545 = vrot.lane.b32.xlu0 %v2109_v31, %s3666_s12  ;;  %vm3662_vm15 = vcmask 97284   ;;  %s3719_s12 = smov 82   ;;  %v2118_v31 = vld [vmem:[%s3618_s0] ss:$0 sps:$4 sm:$0xff]  }
  0x9b   :  { %552 = vrot.lane.b32.xlu1 %v2104_v30, %s3702_s25  ;;  %132 = vst.msk [vmem:[#allocation2] sm:$0xf0] %vm3659_vm12, %v129_v24  ;;  %vm3663_vm12 = vcmask 572868   ;;  %v795_v24 = vld [vmem:[%s3618_s0] sm:$0xf] }
  0x9d   :  { %v177_v36 = vpop.permute.xlu1 %176  ;;  %v137_v37 = vpop.permute.xlu0 %136 }
  0x9e   :  { %140 = vst.msk [vmem:[#allocation2] sm:$0xf0] %vm3688_vm14, %v137_v37  ;;  %559 = vrot.lane.b32.xlu0 %v2111_v35, %s3704_s24  ;;  %v2119_v35 = vld [vmem:[%s3618_s0] ss:$0 sps:$4 sm:$0xff]  }
  0x9f   :  { %566 = vrot.lane.b32.xlu1 %v2106_v34, %s2217_s19  ;;  %148 = vst.msk [vmem:[#allocation2] sm:$0xf0] %vm3661_vm13, %v145_v28  ;;  %vm3668_vm13 = vcmask 802468   ;;  %v807_v28 = vld [vmem:[%s3618_s0] sm:$0xf] }
  0xa1   :  { %v193_v40 = vpop.permute.xlu1 %192  ;;  %v153_v41 = vpop.permute.xlu0 %152 }
  0xa2   :  { %198 = vst.msk [vmem:[#allocation2 + $0x8] sm:$0xf0] %vm3662_vm15, %v193_v40  ;;  %574 = vrot.lane.b32.xlu0 %v2112_v39, %s3708_s20  ;;  %vm3665_vm15 = vcmask 917268   ;;  %v2120_v39 = vld [vmem:[%s3618_s0 + $0x4] ss:$0 sps:$4 sm:$0xff]  }
  0xa3   :  { %156 = vst.msk [vmem:[#allocation2] sm:$0xf0] %vm3663_vm12, %v153_v41  ;;  %581 = vrot.lane.b32.xlu1 %v2108_v38, %s3714_s29  ;;  %vm3670_vm12 = vcmask 1032068  }
  0xa4   :  { %164 = vst.msk [vmem:[#allocation2] sm:$0xf0] %vm3664_vm11, %v161_v32  ;;  %vm3669_vm11 = vcmask 1048564   ;;  %v819_v32 = vld [vmem:[%s3618_s0 + $0x4] sm:$0xf] }
  0xa5   :  { %v211_v44 = vpop.permute.xlu1 %210  ;;  %v169_v45 = vpop.permute.xlu0 %168 }
  0xa6   :  { %172 = vst.msk [vmem:[#allocation2] sm:$0xf0] %vm3668_vm13, %v169_v45  ;;  %588 = vrot.lane.b32.xlu0 %v2113_v43, %s3717_s22  ;;  %vm213_vm13 = vcmask 326868   ;;  %v2121_v43 = vld [vmem:[%s3618_s0 + $0x4] ss:$0 sps:$4 sm:$0xff]  }
  0xa7   :  { %595 = vrot.lane.b32.xlu1 %v2110_v42, %s3720_s16  ;;  %180 = vst.msk [vmem:[#allocation2] sm:$0xf0] %vm3665_vm15, %v177_v36  ;;  %vm205_vm15 = vcmask 212068   ;;  %v825_v36 = vld [vmem:[%s3618_s0 + $0x4] sm:$0xf] }
  0xa9   :  { %v227_v48 = vpop.permute.xlu1 %226  ;;  %v185_v49 = vpop.permute.xlu0 %184 }
  0xaa   :  { %188 = vst.msk [vmem:[#allocation2] sm:$0xf0] %vm3670_vm12, %v185_v49  ;;  %601 = vrot.lane.b32.xlu0 %v599_v47, %s3702_s25  ;;  %vm229_vm12 = vcmask 556468   ;;  %v2122_v47 = vld [vmem:[%s3618_s0 + $0x4] ss:$0 sps:$4 sm:$0xff]  }
  0xab   :  { %607 = vrot.lane.b32.xlu1 %v605_v46, %s3704_s24  ;;  %196 = vst.msk [vmem:[#allocation2] sm:$0xf0] %vm3669_vm11, %v193_v40  ;;  %vm221_vm11 = vcmask 441668   ;;  %v831_v40 = vld [vmem:[%s3618_s0 + $0x4] sm:$0xf] }
  0xad   :  { %v240_v52 = vpop.permute.xlu1 %239  ;;  %v203_v53 = vpop.permute.xlu0 %202 }
  0xae   :  { %206 = vst.msk [vmem:[#allocation2 + $0x8] sm:$0xf0] %vm205_vm15, %v203_v53  ;;  %613 = vrot.lane.b32.xlu0 %v611_v51, %s2217_s19  ;;  %v2123_v51 = vld [vmem:[%s3618_s0 + $0x4] ss:$0 sps:$4 sm:$0xff]  }
  0xaf   :  { %619 = vrot.lane.b32.xlu1 %v617_v50, %s3708_s20  ;;  %214 = vst.msk [vmem:[#allocation2 + $0x8] sm:$0xf0] %vm213_vm13, %v211_v44  ;;  %v837_v44 = vld [vmem:[%s3618_s0 + $0x4] sm:$0xf] }
  0xb1   :  { %v252_v56 = vpop.permute.xlu1 %251  ;;  %v219_v57 = vpop.permute.xlu0 %218 }
  0xb2   :  { %222 = vst.msk [vmem:[#allocation2 + $0x8] sm:$0xf0] %vm221_vm11, %v219_v57  ;;  %625 = vrot.lane.b32.xlu0 %v623_v55, %s3714_s29  ;;  %v2125_v55 = vld [vmem:[%s3618_s0 + $0x4] ss:$0 sps:$4 sm:$0xff]  }
  0xb3   :  { %631 = vrot.lane.b32.xlu1 %v629_v54, %s3717_s22  ;;  %230 = vst.msk [vmem:[#allocation2 + $0x8] sm:$0xf0] %vm229_vm12, %v227_v48  ;;  %v844_v48 = vld [vmem:[%s3618_s0 + $0x4] sm:$0xf] }
  0xb5   :  { %v264_v60 = vpop.permute.xlu1 %263  ;;  %v234_v61 = vpop.permute.xlu0 %233 }
  0xb6   :  { %236 = vst.msk [vmem:[#allocation2 + $0x10] sm:$0xf] %vm22_vm0, %v234_v61  ;;  %637 = vrot.lane.b32.xlu0 %v635_v59, %s3720_s16  ;;  %v2126_v59 = vld [vmem:[%s3618_s0 + $0x4] ss:$0 sps:$4 sm:$0xff]  }
  0xb7   :  { %643 = vrot.lane.b32.xlu1 %v641_v58, %s3719_s12  ;;  %242 = vst.msk [vmem:[#allocation2 + $0x10] sm:$0xf] %vm29_vm1, %v240_v52  ;;  %v850_v52 = vld [vmem:[%s3618_s0 + $0x4] sm:$0xf] }
  0xb9   :  { %v276_v0 = vpop.permute.xlu1 %275  ;;  %v246_v1 = vpop.permute.xlu0 %245 }
  0xba   :  { %248 = vst.msk [vmem:[#allocation2 + $0x10] sm:$0xf] %vm36_vm2, %v246_v1  ;;  %649 = vrot.lane.b32.xlu0 %v647_v63, %s3689_s27  ;;  %v2124_v63 = vld [vmem:[%s3618_s0 + $0x4] ss:$0 sps:$4 sm:$0xff]  }
  0xbb   :  { %655 = vrot.lane.b32.xlu1 %v653_v62, %s2230_s9  ;;  %254 = vst.msk [vmem:[#allocation2 + $0x10] sm:$0xf] %vm43_vm3, %v252_v56  ;;  %v856_v56 = vld [vmem:[%s3618_s0 + $0x4] sm:$0xf] }
  0xbd   :  { %v288_v4 = vpop.permute.xlu1 %287  ;;  %v258_v6 = vpop.permute.xlu0 %257 }
  0xbe   :  { %291 = vst.msk [vmem:[#allocation2 + $0x18] sm:$0xf] %vm87_vm4, %v288_v4  ;;  %662 = vrot.lane.b32.xlu0 %v660_v3, %s2233_s7  ;;  %v1991_v3 = vld [vmem:[%s3618_s0 + $0x8] sm:$0xf] }
  0xbf   :  { %260 = vst.msk [vmem:[#allocation2 + $0x10] sm:$0xf] %vm50_vm5, %v258_v6  ;;  %668 = vrot.lane.b32.xlu1 %v666_v2, %s2232_s23 }
  0xc0   :  { %266 = vst.msk [vmem:[#allocation2 + $0x10] sm:$0xf] %vm57_vm6, %v264_v60  ;;  %v862_v60 = vld [vmem:[%s3618_s0 + $0x4] sm:$0xf] }
  0xc1   :  { %v301_v9 = vpop.permute.xlu1 %300  ;;  %v270_v10 = vpop.permute.xlu0 %269 }
  0xc2   :  { %272 = vst.msk [vmem:[#allocation2 + $0x10] sm:$0xf] %vm64_vm7, %v270_v10  ;;  %674 = vrot.lane.b32.xlu0 %v672_v8, %s3716_s17  ;;  %v2127_v8 = vld [vmem:[%s3618_s0 + $0x8] ss:$0 sps:$4 sm:$0xff]  }
  0xc3   :  { %680 = vrot.lane.b32.xlu1 %v678_v7, %s3696_s18  ;;  %278 = vst.msk [vmem:[#allocation2 + $0x10] sm:$0xf] %vm3685_vm8, %v276_v0  ;;  %vm3722_vm8 = vcmask 207968   ;;  %v2128_v0 = vld [vmem:[%s3618_s0 + $0x4] ss:$0 sps:$4 sm:$0xff]  }
  0xc5   :  { %v313_v13 = vpop.permute.xlu1 %312  ;;  %v282_v14 = vpop.permute.xlu0 %281 }
  0xc6   :  { %284 = vst.msk [vmem:[#allocation2 + $0x10] sm:$0xf] %vm3686_vm9, %v282_v14  ;;  %687 = vrot.lane.b32.xlu0 %v2116_v12, %s3701_s5  ;;  %vm3723_vm9 = vcmask 322768   ;;  %v1963_v12 = vld [vmem:[%s3618_s0 + $0x8] sm:$0xf] }
  0xc7   :  { %694 = vrot.lane.b32.xlu1 %v2114_v11, %s2222_s4  ;;  %290 = vst.msk [vmem:[#allocation2 + $0x10] sm:$0xf] %vm3687_vm10, %v288_v4  ;;  %vm3724_vm10 = vcmask 437568   ;;  %v1990_v4 = vld [vmem:[%s3618_s0 + $0x8] sm:$0xf] }
  0xc9   :  { %v327_v17 = vpop.permute.xlu1 %326  ;;  %v295_v18 = vpop.permute.xlu0 %294 }
  0xca   :  { %297 = vst.msk [vmem:[#allocation2 + $0x18] sm:$0xf] %vm3722_vm8, %v295_v18  ;;  %701 = vrot.lane.b32.xlu0 %v2117_v16, %s3710_s21  ;;  %vm3725_vm8 = vcmask 552368   ;;  %v2131_v16 = vld [vmem:[%s3618_s0 + $0x8] ss:$0 sps:$4 sm:$0xff]   ;;  %v2245_v18 = vmov 0.0  }
  0xcb   :  { %708 = vrot.lane.b32.xlu1 %v2115_v15, %s3706_s8  ;;  %303 = vst.msk [vmem:[#allocation2 + $0x18] sm:$0xf] %vm3723_vm9, %v301_v9  ;;  %vm3726_vm9 = vcmask 113668   ;;  %v1962_v9 = vld [vmem:[%s3618_s0 + $0x8] sm:$0xf]  ;;  %953 = vmatprep.mubr.f32.mxu0 %v2245_v18 }
  0xcc   :  { %1861 = vmatprep.mubr.f32.mxu1 %v2245_v18  ;;  %v2002_v18 = vld [vmem:[%s3618_s0 + $0xc] sm:$0xf] }
  0xcd   :  { %v341_v21 = vpop.permute.xlu1 %340  ;;  %v307_v22 = vpop.permute.xlu0 %306 }
  0xce   :  { %309 = vst.msk [vmem:[#allocation2 + $0x18] sm:$0xf] %vm3724_vm10, %v307_v22  ;;  %785 = vrot.lane.b32.xlu0 %v783_v20, %s3704_s24  ;;  %vm3727_vm10 = vcmask 228468   ;;  %v1934_v22 = vld [vmem:[%s3618_s0 + $0x8] sm:$0xf] }
  0xcf   :  { %791 = vrot.lane.b32.xlu1 %v789_v19, %s2217_s19  ;;  %315 = vst.msk [vmem:[#allocation2 + $0x18] sm:$0xf] %vm3725_vm8, %v313_v13  ;;  %vm3728_vm8 = vcmask 458068   ;;  %v1992_v13 = vld [vmem:[%s3618_s0 + $0x8] sm:$0xf] }
  0xd1   :  { %v355_v25 = vpop.permute.xlu1 %354  ;;  %v320_v26 = vpop.permute.xlu0 %319 }
  0xd2   :  { %322 = vst.msk [vmem:[#allocation2 + $0x10] sm:$0xf0] %vm3726_vm9, %v320_v26  ;;  %797 = vrot.lane.b32.xlu0 %v795_v24, %s3708_s20  ;;  %vm3729_vm9 = vcmask 97284   ;;  %v1964_v26 = vld [vmem:[%s3618_s0 + $0x8] sm:$0xf] }
  0xd3   :  { %803 = vrot.lane.b32.xlu1 %v801_v23, %s3714_s29  ;;  %329 = vst.msk [vmem:[#allocation2 + $0x10] sm:$0xf0] %vm3727_vm10, %v327_v17  ;;  %vm3730_vm10 = vcmask 572868   ;;  %v1993_v17 = vld [vmem:[%s3618_s0 + $0x8] sm:$0xf] }
  0xd5   :  { %v369_v29 = vpop.permute.xlu1 %368  ;;  %v334_v30 = vpop.permute.xlu0 %333 }
  0xd6   :  { %336 = vst.msk [vmem:[#allocation2 + $0x10] sm:$0xf0] %vm3688_vm14, %v334_v30  ;;  %809 = vrot.lane.b32.xlu0 %v807_v28, %s3717_s22  ;;  %vm3731_vm14 = vcmask 687668   ;;  %v1994_v30 = vld [vmem:[%s3618_s0 + $0x8] sm:$0xf] }
  0xd7   :  { %815 = vrot.lane.b32.xlu1 %v813_v27, %s3720_s16  ;;  %343 = vst.msk [vmem:[#allocation2 + $0x10] sm:$0xf0] %vm3728_vm8, %v341_v21  ;;  %vm3732_vm8 = vcmask 802468   ;;  %v2129_v21 = vld [vmem:[%s3618_s0 + $0x8] ss:$0 sps:$4 sm:$0xff]  }
  0xd9   :  { %v383_v33 = vpop.permute.xlu1 %382  ;;  %v348_v34 = vpop.permute.xlu0 %347 }
  0xda   :  { %386 = vst.msk [vmem:[#allocation2 + $0x18] sm:$0xf0] %vm3729_vm9, %v383_v33  ;;  %715 = vrot.lane.b32.xlu0 %v2118_v31, %s3713_s14  ;;  %vm3733_vm9 = vcmask 917268  }
  0xdb   :  { %350 = vst.msk [vmem:[#allocation2 + $0x10] sm:$0xf0] %vm3730_vm10, %v348_v34  ;;  %821 = vrot.lane.b32.xlu1 %v819_v32, %s3719_s12  ;;  %vm3735_vm10 = vcmask 1048564   ;;  %v1935_v34 = vld [vmem:[%s3618_s0 + $0x8] sm:$0xf] }
  0xdc   :  { %357 = vst.msk [vmem:[#allocation2 + $0x10] sm:$0xf0] %vm3731_vm14, %v355_v25  ;;  %vm3734_vm14 = vcmask 1032068   ;;  %v2130_v25 = vld [vmem:[%s3618_s0 + $0x8] ss:$0 sps:$4 sm:$0xff]  }
  0xdd   :  { %v398_v37 = vpop.permute.xlu1 %397  ;;  %v362_v38 = vpop.permute.xlu0 %361 }
  0xde   :  { %364 = vst.msk [vmem:[#allocation2 + $0x10] sm:$0xf0] %vm3732_vm8, %v362_v38  ;;  %722 = vrot.lane.b32.xlu0 %v2119_v35, %s3694_s13  ;;  %s2242_s13 = smov 73   ;;  %vm3736_vm8 = vcmask 913168   ;;  %v1965_v38 = vld [vmem:[%s3618_s0 + $0x8] sm:$0xf] }
  0xdf   :  { %827 = vrot.lane.b32.xlu1 %v825_v36, %s3689_s27  ;;  %371 = vst.msk [vmem:[#allocation2 + $0x10] sm:$0xf0] %vm3733_vm9, %v369_v29  ;;  %s2239_s27 = smov 77   ;;  %vm3737_vm9 = vcmask 1027968   ;;  %v1999_v29 = vld [vmem:[%s3618_s0 + $0xc] sm:$0xf] }
  0xe1   :  { %v412_v41 = vpop.permute.xlu1 %411  ;;  %v376_v42 = vpop.permute.xlu0 %375 }
  0xe2   :  { %378 = vst.msk [vmem:[#allocation2 + $0x10] sm:$0xf0] %vm3734_vm14, %v376_v42  ;;  %729 = vrot.lane.b32.xlu0 %v2120_v39, %s3691_s28  ;;  %s3698_s28 = smov 75   ;;  %vm3738_vm14 = vcmask 1044464   ;;  %v1995_v42 = vld [vmem:[%s3618_s0 + $0x8] sm:$0xf] }
  0xe3   :  { %833 = vrot.lane.b32.xlu1 %v831_v40, %s2230_s9  ;;  %385 = vst.msk [vmem:[#allocation2 + $0x10] sm:$0xf0] %vm3735_vm10, %v383_v33  ;;  %vm3739_vm10 = vcmask 207968   ;;  %v2132_v33 = vld [vmem:[%s3618_s0 + $0x8] ss:$0 sps:$4 sm:$0xff]  }
  0xe5   :  { %v424_v45 = vpop.permute.xlu1 %423  ;;  %v391_v46 = vpop.permute.xlu0 %390 }
  0xe6   :  { %393 = vst.msk [vmem:[#allocation2 + $0x18] sm:$0xf0] %vm205_vm15, %v391_v46  ;;  %736 = vrot.lane.b32.xlu0 %v2121_v43, %s3692_s2  ;;  %s3700_s2 = smov 68   ;;  %v1906_v46 = vld [vmem:[%s3618_s0 + $0x8] sm:$0xf] }
  0xe7   :  { %839 = vrot.lane.b32.xlu1 %v837_v44, %s2233_s7  ;;  %400 = vst.msk [vmem:[#allocation2 + $0x18] sm:$0xf0] %vm213_vm13, %v398_v37  ;;  %v2133_v37 = vld [vmem:[%s3618_s0 + $0x8] ss:$0 sps:$4 sm:$0xff]  }
  0xe9   :  { %v436_v49 = vpop.permute.xlu1 %435  ;;  %v405_v50 = vpop.permute.xlu0 %404 }
  0xea   :  { %407 = vst.msk [vmem:[#allocation2 + $0x18] sm:$0xf0] %vm221_vm11, %v405_v50  ;;  %743 = vrot.lane.b32.xlu0 %v2122_v47, %s3693_s10  ;;  %s3699_s10 = smov 69   ;;  %v1936_v50 = vld [vmem:[%s3618_s0 + $0x8] sm:$0xf] }
  0xeb   :  { %846 = vrot.lane.b32.xlu1 %v844_v48, %s2232_s23  ;;  %414 = vst.msk [vmem:[#allocation2 + $0x18] sm:$0xf0] %vm229_vm12, %v412_v41  ;;  %v2000_v41 = vld [vmem:[%s3618_s0 + $0xc] sm:$0xf] }
  0xed   :  { %v448_v53 = vpop.permute.xlu1 %447  ;;  %v418_v54 = vpop.permute.xlu0 %417 }
  0xee   :  { %420 = vst.msk [vmem:[#allocation2 + $0x20] sm:$0xf] %vm22_vm0, %v418_v54  ;;  %750 = vrot.lane.b32.xlu0 %v2123_v51, %s2239_s27  ;;  %v1966_v54 = vld [vmem:[%s3618_s0 + $0x8] sm:$0xf] }
  0xef   :  { %852 = vrot.lane.b32.xlu1 %v850_v52, %s3716_s17  ;;  %426 = vst.msk [vmem:[#allocation2 + $0x20] sm:$0xf] %vm29_vm1, %v424_v45  ;;  %v2134_v45 = vld [vmem:[%s3618_s0 + $0x8] ss:$0 sps:$4 sm:$0xff]  }
  0xf1   :  { %v460_v57 = vpop.permute.xlu1 %459  ;;  %v430_v58 = vpop.permute.xlu0 %429 }
  0xf2   :  { %432 = vst.msk [vmem:[#allocation2 + $0x20] sm:$0xf] %vm36_vm2, %v430_v58  ;;  %758 = vrot.lane.b32.xlu0 %v2125_v55, %s3698_s28  ;;  %s3746_s28 = smov 111   ;;  %v2138_v58 = vld [vmem:[%s3618_s0 + $0x8] ss:$0 sps:$4 sm:$0xff]  }
  0xf3   :  { %858 = vrot.lane.b32.xlu1 %v856_v56, %s3696_s18  ;;  %438 = vst.msk [vmem:[#allocation2 + $0x20] sm:$0xf] %vm43_vm3, %v436_v49  ;;  %v2135_v49 = vld [vmem:[%s3618_s0 + $0x8] ss:$0 sps:$4 sm:$0xff]   ;;  %s3760_s18 = smov 107  }
  0xf5   :  { %v472_v61 = vpop.permute.xlu1 %471  ;;  %v442_v62 = vpop.permute.xlu0 %441 }
  0xf6   :  { %475 = vst.msk [vmem:[#allocation2 + $0x28] sm:$0xf] %vm87_vm4, %v472_v61  ;;  %765 = vrot.lane.b32.xlu0 %v2126_v59, %s2242_s13 }
  0xf7   :  { %444 = vst.msk [vmem:[#allocation2 + $0x20] sm:$0xf] %vm50_vm5, %v442_v62  ;;  %864 = vrot.lane.b32.xlu1 %v862_v60, %s3700_s2  ;;  %s3754_s2 = smov 108   ;;  %v1996_v62 = vld [vmem:[%s3618_s0 + $0xc] sm:$0xf] }
  0xf8   :  { %450 = vst.msk [vmem:[#allocation2 + $0x20] sm:$0xf] %vm57_vm6, %v448_v53  ;;  %v1971_v53 = vld [vmem:[%s3618_s0 + $0xc] sm:$0xf] }
  0xf9   :  { %v485_v1 = vpop.permute.xlu1 %484  ;;  %v454_v2 = vpop.permute.xlu0 %453 }
  0xfa   :  { %456 = vst.msk [vmem:[#allocation2 + $0x20] sm:$0xf] %vm64_vm7, %v454_v2  ;;  %772 = vrot.lane.b32.xlu0 %v2128_v0, %s3707_s30  ;;  %v1907_v2 = vld [vmem:[%s3618_s0 + $0x8] sm:$0xf]  ;;  %s3779_s30 = smov 122  }
  0xfb   :  { %779 = vrot.lane.b32.xlu1 %v2124_v63, %s3699_s10  ;;  %462 = vst.msk [vmem:[#allocation2 + $0x20] sm:$0xf] %vm3736_vm8, %v460_v57  ;;  %vm3740_vm8 = vcmask 322768   ;;  %v2136_v57 = vld [vmem:[%s3618_s0 + $0xc] ss:$0 sps:$4 sm:$0xff]   ;;  %s3768_s10 = smov 104  }
  0xfd   :  { %v497_v6 = vpop.permute.xlu1 %496  ;;  %v466_v7 = vpop.permute.xlu0 %465 }
  0xfe   :  { %468 = vst.msk [vmem:[#allocation2 + $0x20] sm:$0xf] %vm3737_vm9, %v466_v7  ;;  %1698 = vrot.lane.b32.xlu0 %v1990_v4, %s3704_s24  ;;  %vm3741_vm9 = vcmask 437568   ;;  %v1937_v7 = vld [vmem:[%s3618_s0 + $0x8] sm:$0xf] }
  0xff   :  { %1704 = vrot.lane.b32.xlu1 %v1991_v3, %s2217_s19  ;;  %474 = vst.msk [vmem:[#allocation2 + $0x20] sm:$0xf] %vm3738_vm14, %v472_v61  ;;  %vm3742_vm14 = vcmask 552368   ;;  %v2001_v61 = vld [vmem:[%s3618_s0 + $0xc] sm:$0xf] }
 0x101   :  { %v511_v10 = vpop.permute.xlu1 %510  ;;  %v479_v11 = vpop.permute.xlu0 %478 }
 0x102   :  { %481 = vst.msk [vmem:[#allocation2 + $0x28] sm:$0xf] %vm3739_vm10, %v479_v11  ;;  %1514 = vrot.lane.b32.xlu0 %v1962_v9, %s3702_s25  ;;  %vm3743_vm10 = vcmask 113668   ;;  %s3759_s25 = smov 106   ;;  %v1967_v11 = vld [vmem:[%s3618_s0 + $0x8] sm:$0xf] }
 0x103   :  { %1600 = vrot.lane.b32.xlu1 %v2127_v8, %s3701_s5  ;;  %487 = vst.msk [vmem:[#allocation2 + $0x28] sm:$0xf] %vm3740_vm8, %v485_v1  ;;  %vm3744_vm8 = vcmask 228468   ;;  %s3755_s5 = smov 109   ;;  %v2137_v1 = vld [vmem:[%s3618_s0 + $0x8] ss:$0 sps:$4 sm:$0xff]  }
 0x105   :  { %v525_v14 = vpop.permute.xlu1 %524  ;;  %v491_v15 = vpop.permute.xlu0 %490 }
 0x106   :  { %493 = vst.msk [vmem:[#allocation2 + $0x28] sm:$0xf] %vm3741_vm9, %v491_v15  ;;  %1710 = vrot.lane.b32.xlu0 %v1992_v13, %s3708_s20  ;;  %vm3745_vm9 = vcmask 343268   ;;  %v2141_v15 = vld [vmem:[%s3618_s0 + $0x8] ss:$0 sps:$4 sm:$0xff]  }
 0x107   :  { %1520 = vrot.lane.b32.xlu1 %v1963_v12, %s3704_s24  ;;  %499 = vst.msk [vmem:[#allocation2 + $0x28] sm:$0xf] %vm3742_vm14, %v497_v6  ;;  %vm3747_vm14 = vcmask 458068   ;;  %s3758_s24 = smov 126   ;;  %v2139_v6 = vld [vmem:[%s3618_s0 + $0x8] ss:$0 sps:$4 sm:$0xff]  }
 0x109   :  { %v539_v19 = vpop.permute.xlu1 %538  ;;  %v504_v20 = vpop.permute.xlu0 %503 }
 0x10a   :  { %506 = vst.msk [vmem:[#allocation2 + $0x20] sm:$0xf0] %vm3743_vm10, %v504_v20  ;;  %1607 = vrot.lane.b32.xlu0 %v2131_v16, %s2222_s4  ;;  %vm3748_vm10 = vcmask 97284  }
 0x10b   :  { %1716 = vrot.lane.b32.xlu1 %v1993_v17, %s3714_s29  ;;  %513 = vst.msk [vmem:[#allocation2 + $0x20] sm:$0xf0] %vm3744_vm8, %v511_v10  ;;  %vm3749_vm8 = vcmask 572868   ;;  %v1972_v10 = vld [vmem:[%s3618_s0 + $0xc] sm:$0xf] }
 0x10d   :  { %v553_v23 = vpop.permute.xlu1 %552  ;;  %v518_v24 = vpop.permute.xlu0 %517 }
 0x10e   :  { %520 = vst.msk [vmem:[#allocation2 + $0x20] sm:$0xf0] %vm3745_vm9, %v518_v24  ;;  %1330 = vrot.lane.b32.xlu0 %v1934_v22, %s3746_s28  ;;  %vm3750_vm9 = vcmask 687668   ;;  %v2143_v22 = vld [vmem:[%s3618_s0 + $0x8] ss:$0 sps:$4 sm:$0xff]  }
 0x10f   :  { %1416 = vrot.lane.b32.xlu1 %v2129_v21, %s3711_s11  ;;  %527 = vst.msk [vmem:[#allocation2 + $0x20] sm:$0xf0] %vm3747_vm14, %v525_v14  ;;  %vm3751_vm14 = vcmask 802468   ;;  %v2140_v14 = vld [vmem:[%s3618_s0 + $0xc] ss:$0 sps:$4 sm:$0xff]  }
 0x111   :  { %v567_v27 = vpop.permute.xlu1 %566  ;;  %v532_v28 = vpop.permute.xlu0 %531 }
 0x112   :  { %570 = vst.msk [vmem:[#allocation2 + $0x28] sm:$0xf0] %vm3748_vm10, %v567_v27  ;;  %1526 = vrot.lane.b32.xlu0 %v1964_v26, %s2217_s19  ;;  %vm3752_vm10 = vcmask 917268   ;;  %v2144_v26 = vld [vmem:[%s3618_s0 + $0x8] ss:$0 sps:$4 sm:$0xff]  }
 0x113   :  { %534 = vst.msk [vmem:[#allocation2 + $0x20] sm:$0xf0] %vm3749_vm8, %v532_v28  ;;  %1614 = vrot.lane.b32.xlu1 %v2130_v25, %s3710_s21  ;;  %vm3753_vm8 = vcmask 1032068   ;;  %s3789_s21 = smov 83  }
 0x114   :  { %541 = vst.msk [vmem:[#allocation2 + $0x20] sm:$0xf0] %vm3750_vm9, %v539_v19  ;;  %vm3756_vm9 = vcmask 1048564   ;;  %v1997_v19 = vld [vmem:[%s3618_s0 + $0xc] sm:$0xf] }
 0x115   :  { %v582_v31 = vpop.permute.xlu1 %581  ;;  %v546_v32 = vpop.permute.xlu0 %545 }
 0x116   :  { %548 = vst.msk [vmem:[#allocation2 + $0x20] sm:$0xf0] %vm3751_vm14, %v546_v32  ;;  %1722 = vrot.lane.b32.xlu0 %v1994_v30, %s3717_s22  ;;  %vm3761_vm14 = vcmask 913168   ;;  %v2142_v30 = vld [vmem:[%s3618_s0 + $0x8] ss:$0 sps:$4 sm:$0xff]  }
 0x117   :  { %1752 = vrot.lane.b32.xlu1 %v1999_v29, %s2233_s7  ;;  %555 = vst.msk [vmem:[#allocation2 + $0x20] sm:$0xf0] %vm3752_vm10, %v553_v23  ;;  %vm3762_vm10 = vcmask 1027968   ;;  %v1908_v23 = vld [vmem:[%s3618_s0 + $0x8] sm:$0xf] }
 0x119   :  { %v596_v35 = vpop.permute.xlu1 %595  ;;  %v560_v36 = vpop.permute.xlu0 %559 }
 0x11a   :  { %562 = vst.msk [vmem:[#allocation2 + $0x20] sm:$0xf0] %vm3753_vm8, %v560_v36  ;;  %1336 = vrot.lane.b32.xlu0 %v1935_v34, %s3755_s5  ;;  %vm3763_vm8 = vcmask 1044464   ;;  %v3073_v34 = vld [vmem:[#allocation2] sm:$0xff]  ;;  %v1878_v36 = vld [vmem:[%s3618_s0 + $0x8] sm:$0xf] }
 0x11b   :  { %1423 = vrot.lane.b32.xlu1 %v2132_v33, %s3754_s2  ;;  %569 = vst.msk [vmem:[#allocation2 + $0x20] sm:$0xf0] %vm3756_vm9, %v567_v27  ;;  %vm3764_vm9 = vcmask 207968   ;;  %v1938_v27 = vld [vmem:[%s3618_s0 + $0x8] sm:$0xf] }
 0x11c   :  { %965 = vst.msk [vmem:[#allocation2] sm:$0xf] %vm22_vm0, %v1878_v36 }
 0x11d   :  { %v608_v39 = vpop.permute.xlu1 %607  ;;  %v575_v40 = vpop.permute.xlu0 %574 }
 0x11e   :  { %577 = vst.msk [vmem:[#allocation2 + $0x28] sm:$0xf0] %vm205_vm15, %v575_v40  ;;  %1532 = vrot.lane.b32.xlu0 %v1965_v38, %s3708_s20  ;;  %s3769_s20 = smov 105   ;;  %v2145_v40 = vld [vmem:[%s3618_s0 + $0xc] ss:$0 sps:$4 sm:$0xff]  }
 0x11f   :  { %1621 = vrot.lane.b32.xlu1 %v2133_v37, %s3706_s8  ;;  %584 = vst.msk [vmem:[#allocation2 + $0x28] sm:$0xf0] %vm213_vm13, %v582_v31  ;;  %s3780_s8 = smov 127   ;;  %v1943_v31 = vld [vmem:[%s3618_s0 + $0xc] sm:$0xf] }
 0x120   :  { %v1968_v37 = vld [vmem:[%s3618_s0 + $0xc] sm:$0xf] }
 0x121   :  { %v620_v43 = vpop.permute.xlu1 %619  ;;  %v589_v44 = vpop.permute.xlu0 %588 }
 0x122   :  { %591 = vst.msk [vmem:[#allocation2 + $0x28] sm:$0xf0] %vm221_vm11, %v589_v44  ;;  %1728 = vrot.lane.b32.xlu0 %v1995_v42, %s3720_s16  ;;  %v2147_v44 = vld [vmem:[%s3618_s0 + $0xc] ss:$0 sps:$4 sm:$0xff]  }
 0x123   :  { %1759 = vrot.lane.b32.xlu1 %v2000_v41, %s2232_s23  ;;  %598 = vst.msk [vmem:[#allocation2 + $0x28] sm:$0xf0] %vm229_vm12, %v596_v35  ;;  %v2146_v35 = vld [vmem:[%s3618_s0 + $0xc] ss:$0 sps:$4 sm:$0xff]  }
 0x124   :  { %v1973_v41 = vld [vmem:[%s3618_s0 + $0xc] sm:$0xf] }
 0x125   :  { %v632_v47 = vpop.permute.xlu1 %631  ;;  %v602_v48 = vpop.permute.xlu0 %601 }
 0x126   :  { %604 = vst.msk [vmem:[#allocation2 + $0x30] sm:$0xf] %vm22_vm0, %v602_v48  ;;  %1146 = vrot.lane.b32.xlu0 %v1906_v46, %s3758_s24  ;;  %v1879_v48 = vld [vmem:[%s3618_s0 + $0x8] sm:$0xf] }
 0x127   :  { %1232 = vrot.lane.b32.xlu1 %v2134_v45, %s3757_s6  ;;  %610 = vst.msk [vmem:[#allocation2 + $0x30] sm:$0xf] %vm29_vm1, %v608_v39  ;;  %v1998_v45 = vld [vmem:[%s3618_s0 + $0xc] sm:$0xf] }
 0x129   :  { %v644_v51 = vpop.permute.xlu1 %643  ;;  %v614_v52 = vpop.permute.xlu0 %613 }
 0x12a   :  { %616 = vst.msk [vmem:[#allocation2 + $0x30] sm:$0xf] %vm36_vm2, %v614_v52  ;;  %1342 = vrot.lane.b32.xlu0 %v1936_v50, %s3760_s18  ;;  %v2149_v52 = vld [vmem:[%s3618_s0 + $0x8] ss:$0 sps:$4 sm:$0xff]  }
 0x12b   :  { %1430 = vrot.lane.b32.xlu1 %v2135_v49, %s3759_s25  ;;  %622 = vst.msk [vmem:[#allocation2 + $0x30] sm:$0xf] %vm43_vm3, %v620_v43  ;;  %v2003_v49 = vld [vmem:[%s3618_s0 + $0xc] sm:$0xf] }
 0x12d   :  { %v656_v55 = vpop.permute.xlu1 %655  ;;  %v626_v56 = vpop.permute.xlu0 %625 }
 0x12e   :  { %659 = vst.msk [vmem:[#allocation2 + $0x38] sm:$0xf] %vm87_vm4, %v656_v55  ;;  %1538 = vrot.lane.b32.xlu0 %v1966_v54, %s3714_s29  ;;  %s3777_s29 = smov 70  }
 0x12f   :  { %628 = vst.msk [vmem:[#allocation2 + $0x30] sm:$0xf] %vm50_vm5, %v626_v56  ;;  %1568 = vrot.lane.b32.xlu1 %v1971_v53, %s2230_s9  ;;  %v1909_v53 = vld [vmem:[%s3618_s0 + $0x8] sm:$0xf] }
 0x130   :  { %634 = vst.msk [vmem:[#allocation2 + $0x30] sm:$0xf] %vm57_vm6, %v632_v47  ;;  %v2150_v56 = vld [vmem:[%s3618_s0 + $0x8] ss:$0 sps:$4 sm:$0xff]  }
 0x131   :  { %v669_v59 = vpop.permute.xlu1 %668  ;;  %v638_v60 = vpop.permute.xlu0 %637 }
 0x132   :  { %640 = vst.msk [vmem:[#allocation2 + $0x30] sm:$0xf] %vm64_vm7, %v638_v60  ;;  %1628 = vrot.lane.b32.xlu0 %v2138_v58, %s3713_s14  ;;  %s3775_s14 = smov 85   ;;  %v2148_v60 = vld [vmem:[%s3618_s0 + $0x8] ss:$0 sps:$4 sm:$0xff]  }
 0x133   :  { %1663 = vrot.lane.b32.xlu1 %v2136_v57, %s2239_s27  ;;  %646 = vst.msk [vmem:[#allocation2 + $0x30] sm:$0xf] %vm3761_vm14, %v644_v51  ;;  %vm3766_vm14 = vcmask 322768   ;;  %s3798_s27 = smov 120   ;;  %v1939_v57 = vld [vmem:[%s3618_s0 + $0x8] sm:$0xf] }
 0x135   :  { %v681_v63 = vpop.permute.xlu1 %680  ;;  %v650_v0 = vpop.permute.xlu0 %649 }
 0x136   :  { %652 = vst.msk [vmem:[#allocation2 + $0x30] sm:$0xf] %vm3762_vm10, %v650_v0  ;;  %1734 = vrot.lane.b32.xlu0 %v1996_v62, %s3719_s12  ;;  %vm3767_vm10 = vcmask 437568   ;;  %s3807_s12 = smov 72  }
 0x137   :  { %1765 = vrot.lane.b32.xlu1 %v2001_v61, %s3716_s17  ;;  %658 = vst.msk [vmem:[#allocation2 + $0x30] sm:$0xf] %vm3763_vm8, %v656_v55  ;;  %vm3770_vm8 = vcmask 552368   ;;  %s3778_s17 = smov 80  }
 0x139   :  { %v695_v3 = vpop.permute.xlu1 %694  ;;  %v663_v4 = vpop.permute.xlu0 %662 }
 0x13a   :  { %665 = vst.msk [vmem:[#allocation2 + $0x38] sm:$0xf] %vm3764_vm9, %v663_v4  ;;  %1152 = vrot.lane.b32.xlu0 %v1907_v2, %s3765_s15  ;;  %vm3771_vm9 = vcmask 113668   ;;  %v1969_v2 = vld [vmem:[%s3618_s0 + $0xc] sm:$0xf] }
 0x13b   :  { %1239 = vrot.lane.b32.xlu1 %v2137_v1, %s3711_s11  ;;  %671 = vst.msk [vmem:[#allocation2 + $0x38] sm:$0xf] %vm3766_vm14, %v669_v59  ;;  %vm3772_vm14 = vcmask 228468   ;;  %s3774_s11 = smov 75  }
 0x13d   :  { %v709_v8 = vpop.permute.xlu1 %708  ;;  %v675_v9 = vpop.permute.xlu0 %674 }
 0x13e   :  { %677 = vst.msk [vmem:[#allocation2 + $0x38] sm:$0xf] %vm3767_vm10, %v675_v9  ;;  %1348 = vrot.lane.b32.xlu0 %v1937_v7, %s3769_s20  ;;  %vm3773_vm10 = vcmask 343268  }
 0x13f   :  { %1437 = vrot.lane.b32.xlu1 %v2139_v6, %s3768_s10  ;;  %683 = vst.msk [vmem:[#allocation2 + $0x38] sm:$0xf] %vm3770_vm8, %v681_v63  ;;  %vm3776_vm8 = vcmask 458068   ;;  %v1944_v63 = vld [vmem:[%s3618_s0 + $0xc] sm:$0xf] }
 0x141   :  { %v792_v12 = vpop.permute.xlu1 %791  ;;  %v688_v13 = vpop.permute.xlu0 %687 }
 0x142   :  { %690 = vst.msk [vmem:[#allocation2 + $0x30] sm:$0xf0] %vm3771_vm9, %v688_v13  ;;  %1544 = vrot.lane.b32.xlu0 %v1967_v11, %s3717_s22  ;;  %vm3781_vm9 = vcmask 913168   ;;  %s3794_s22 = smov 68   ;;  %v2154_v13 = vld [vmem:[%s3618_s0 + $0xc] ss:$0 sps:$4 sm:$0xff]  }
 0x143   :  { %1575 = vrot.lane.b32.xlu1 %v1972_v10, %s2233_s7  ;;  %697 = vst.msk [vmem:[#allocation2 + $0x30] sm:$0xf0] %vm3772_vm14, %v695_v3  ;;  %vm3782_vm14 = vcmask 1027968   ;;  %s3802_s7 = smov 91   ;;  %v2152_v3 = vld [vmem:[%s3618_s0 + $0xc] ss:$0 sps:$4 sm:$0xff]  }
 0x144   :  { %v1974_v10 = vld [vmem:[%s3618_s0 + $0xc] sm:$0xf] }
 0x145   :  { %v804_v16 = vpop.permute.xlu1 %803  ;;  %v702_v17 = vpop.permute.xlu0 %701 }
 0x146   :  { %704 = vst.msk [vmem:[#allocation2 + $0x30] sm:$0xf0] %vm3773_vm10, %v702_v17  ;;  %1635 = vrot.lane.b32.xlu0 %v2141_v15, %s3775_s14  ;;  %vm3783_vm10 = vcmask 572868   ;;  %v1910_v17 = vld [vmem:[%s3618_s0 + $0x8] sm:$0xf] }
 0x147   :  { %1671 = vrot.lane.b32.xlu1 %v2140_v14, %s3774_s11  ;;  %711 = vst.msk [vmem:[#allocation2 + $0x30] sm:$0xf0] %vm3776_vm8, %v709_v8  ;;  %vm3785_vm8 = vcmask 1044464   ;;  %v2151_v8 = vld [vmem:[%s3618_s0 + $0xc] ss:$0 sps:$4 sm:$0xff]   ;;  %s3805_s11 = smov 90  }
 0x149   :  { %v816_v20 = vpop.permute.xlu1 %815  ;;  %v786_v21 = vpop.permute.xlu0 %785 }
 0x14a   :  { %788 = vst.msk [vmem:[#allocation2 + $0x40] sm:$0xf] %vm22_vm0, %v786_v21  ;;  %1740 = vrot.lane.b32.xlu0 %v1997_v19, %s3778_s17  ;;  %v872_v19 = vld [vmem:[#allocation2 + $0x20] sm:$0xff]  ;;  %v873_v21 = vld [vmem:[#allocation2 + $0x28] sm:$0xff] }
 0x14b   :  { %1771 = vrot.lane.b32.xlu1 %v2002_v18, %s3777_s29  ;;  %794 = vst.msk [vmem:[#allocation2 + $0x40] sm:$0xf] %vm29_vm1, %v792_v12  ;;  %v1880_v12 = vld [vmem:[%s3618_s0 + $0x8] sm:$0xf] }
 0x14c   :  { %v2155_v18 = vld [vmem:[%s3618_s0 + $0x8] ss:$0 sps:$4 sm:$0xff]  }
 0x14d   :  { %v822_v24 = vpop.permute.xlu1 %821  ;;  %v798_v25 = vpop.permute.xlu0 %797 }
 0x14e   :  { %800 = vst.msk [vmem:[#allocation2 + $0x40] sm:$0xf] %vm36_vm2, %v798_v25  ;;  %1048 = vrot.lane.b32.xlu0 %v2143_v22, %s3780_s8  ;;  %s3784_s8 = smov 102   ;;  %v870_v25 = vld [vmem:[#allocation2 + $0x10] sm:$0xff] }
 0x14f   :  { %1158 = vrot.lane.b32.xlu1 %v1908_v23, %s3779_s30  ;;  %806 = vst.msk [vmem:[#allocation2 + $0x40] sm:$0xf] %vm43_vm3, %v804_v16  ;;  %v871_v23 = vld [vmem:[#allocation2 + $0x18] sm:$0xff] }
 0x151   :  { %v828_v28 = vpop.permute.xlu1 %827  ;;  %v810_v29 = vpop.permute.xlu0 %809 }
 0x152   :  { %812 = vst.msk [vmem:[#allocation2 + $0x40] sm:$0xf] %vm50_vm5, %v810_v29  ;;  %1246 = vrot.lane.b32.xlu0 %v2144_v26, %s3754_s2  ;;  %v1915_v29 = vld [vmem:[%s3618_s0 + $0xc] sm:$0xf] }
 0x153   :  { %1354 = vrot.lane.b32.xlu1 %v1938_v27, %s3721_s26  ;;  %818 = vst.msk [vmem:[#allocation2 + $0x40] sm:$0xf] %vm57_vm6, %v816_v20  ;;  %v869_v27 = vld [vmem:[#allocation2 + $0x8] sm:$0xff] }
 0x154   :  { %824 = vst.msk [vmem:[#allocation2 + $0x40] sm:$0xf] %vm64_vm7, %v822_v24  ;;  %v2153_v24 = vld [vmem:[%s3618_s0 + $0x8] ss:$0 sps:$4 sm:$0xff]  }
 0x155   :  { %v834_v32 = vpop.permute.xlu1 %833  ;;  %830 = vst.msk [vmem:[#allocation2 + $0x40] sm:$0xf] %vm3781_vm9, %v828_v28  ;;  %v716_v33 = vpop.permute.xlu0 %715  ;;  %vm3786_vm9 = vcmask 687668   ;;  %v3203_v28 = vld [vmem:[%s3619_s1] sm:$0xff]  ;;  %s3826_s1 = smov 121  }
 0x156   :  { %836 = vst.msk [vmem:[#allocation2 + $0x40] sm:$0xf] %vm3782_vm14, %v834_v32  ;;  %1384 = vrot.lane.b32.xlu0 %v1943_v31, %s2222_s4  ;;  %vm3787_vm14 = vcmask 207968   ;;  %s3811_s4 = smov 123   ;;  %v1940_v31 = vld [vmem:[%s3618_s0 + $0x8] sm:$0xf] }
 0x157   :  { %718 = vst.msk [vmem:[#allocation2 + $0x30] sm:$0xf0] %vm3783_vm10, %v716_v33  ;;  %1444 = vrot.lane.b32.xlu1 %v2142_v30, %s3784_s8  ;;  %vm3788_vm10 = vcmask 802468   ;;  %v2157_v32 = vld [vmem:[%s3618_s0 + $0xc] ss:$0 sps:$4 sm:$0xff]  }
 0x159   :  { %v840_v38 = vpop.permute.xlu1 %839  ;;  %v723_v39 = vpop.permute.xlu0 %722 }
 0x15a   :  { %842 = vst.msk [vmem:[#allocation2 + $0x40] sm:$0xf] %vm3785_vm8, %v840_v38  ;;  %1479 = vrot.lane.b32.xlu0 %v2146_v35, %s2217_s19  ;;  %vm3790_vm8 = vcmask 322768   ;;  %v2156_v35 = vld [vmem:[%s3618_s0 + $0x8] ss:$0 sps:$4 sm:$0xff]  }
 0x15b   :  { %843 = vst.msk [vmem:[#allocation2 + $0x48] sm:$0xf] %vm87_vm4, %v840_v38  ;;  %1550 = vrot.lane.b32.xlu1 %v1968_v37, %s3720_s16  ;;  %s3810_s16 = smov 118   ;;  %v1945_v37 = vld [vmem:[%s3618_s0 + $0xc] sm:$0xf] }
 0x15c   :  { %725 = vst.msk [vmem:[#allocation2 + $0x30] sm:$0xf0] %vm3786_vm9, %v723_v39  ;;  %vm3791_vm9 = vcmask 917268   ;;  %v1970_v39 = vld [vmem:[%s3618_s0 + $0xc] sm:$0xf] }
 0x15d   :  { %v847_v42 = vpop.permute.xlu1 %846  ;;  %v730_v43 = vpop.permute.xlu0 %729 }
 0x15e   :  { %849 = vst.msk [vmem:[#allocation2 + $0x48] sm:$0xf] %vm3787_vm14, %v847_v42  ;;  %1581 = vrot.lane.b32.xlu0 %v1973_v41, %s2232_s23  ;;  %vm3792_vm14 = vcmask 437568   ;;  %s3821_s23 = smov 79  }
 0x15f   :  { %732 = vst.msk [vmem:[#allocation2 + $0x30] sm:$0xf0] %vm3788_vm10, %v730_v43  ;;  %1642 = vrot.lane.b32.xlu1 %v2145_v40, %s3789_s21  ;;  %vm3793_vm10 = vcmask 1032068   ;;  %s3806_s21 = smov 81   ;;  %v2159_v40 = vld [vmem:[%s3618_s0 + $0xc] ss:$0 sps:$4 sm:$0xff]  }
 0x160   :  { %v2158_v43 = vld [vmem:[%s3618_s0 + $0xc] ss:$0 sps:$4 sm:$0xff]  }
 0x161   :  { %v853_v46 = vpop.permute.xlu1 %852  ;;  %v737_v47 = vpop.permute.xlu0 %736  ;;  %v876_v1 = vld [vmem:[#allocation2 + $0x40] sm:$0xf] }
 0x162   :  { %855 = vst.msk [vmem:[#allocation2 + $0x48] sm:$0xf] %vm3790_vm8, %v853_v46  ;;  %1678 = vrot.lane.b32.xlu0 %v2147_v44, %s2242_s13  ;;  %vm3795_vm8 = vcmask 552368   ;;  %s3804_s13 = smov 82  }
 0x163   :  { %739 = vst.msk [vmem:[#allocation2 + $0x30] sm:$0xf0] %vm3791_vm9, %v737_v47  ;;  %1746 = vrot.lane.b32.xlu1 %v1998_v45, %s2230_s9  ;;  %vm3796_vm9 = vcmask 1048564   ;;  %v1975_v45 = vld [vmem:[%s3618_s0 + $0xc] sm:$0xf] }
 0x164   :  { %v1881_v47 = vld [vmem:[%s3618_s0 + $0x8] sm:$0xf] }
 0x165   :  { %v859_v50 = vpop.permute.xlu1 %858  ;;  %v744_v51 = vpop.permute.xlu0 %743 }
 0x166   :  { %861 = vst.msk [vmem:[#allocation2 + $0x48] sm:$0xf] %vm3792_vm14, %v859_v50  ;;  %1777 = vrot.lane.b32.xlu0 %v2003_v49, %s3794_s22  ;;  %vm3797_vm14 = vcmask 97284   ;;  %s3800_s22 = smov 101  }
 0x167   :  { %746 = vst.msk [vmem:[#allocation2 + $0x30] sm:$0xf0] %vm3793_vm10, %v744_v51  ;;  %968 = vrot.lane.b32.xlu1 %v1879_v48, %s3758_s24  ;;  %s3799_s24 = smov 125   ;;  %vm882_vm10 = vcmask 1043456   ;;  %v2161_v48 = vld [vmem:[%s3618_s0 + $0xc] ss:$0 sps:$4 sm:$0xff]  }
 0x168   :  { %v1911_v51 = vld [vmem:[%s3618_s0 + $0x8] sm:$0xf] }
 0x169   :  { %v865_v54 = vpop.permute.xlu1 %864  ;;  %v751_v55 = vpop.permute.xlu0 %750 }
 0x16a   :  { %867 = vst.msk [vmem:[#allocation2 + $0x48] sm:$0xf] %vm3795_vm8, %v865_v54  ;;  %1055 = vrot.lane.b32.xlu0 %v2149_v52, %s3799_s24  ;;  %s3801_s24 = smov 100   ;;  %vm3803_vm8 = vcmask 113668   ;;  %v2162_v52 = vld [vmem:[%s3618_s0 + $0x8] ss:$0 sps:$4 sm:$0xff]  }
 0x16b   :  { %753 = vst.msk [vmem:[#allocation2 + $0x30] sm:$0xf0] %vm3796_vm9, %v751_v55  ;;  %1164 = vrot.lane.b32.xlu1 %v1909_v53, %s3798_s27  ;;  %vm3809_vm9 = vmmov %vm3803_vm8 }
 0x16c   :  { %754 = vst.msk [vmem:[#allocation2 + $0x38] sm:$0xf0] %vm3797_vm14, %v751_v55  ;;  %vm878_vm14 = vcmask 293888   ;;  %v2160_v55 = vld [vmem:[%s3618_s0 + $0x8] ss:$0 sps:$4 sm:$0xff]  }
 0x16d   :  { %v780_v58 = vpop.permute.xlu1 %779  ;;  %v759_v59 = vpop.permute.xlu0 %758 }
 0x16e   :  { %761 = vst.msk [vmem:[#allocation2 + $0x38] sm:$0xf0] %vm205_vm15, %v759_v59  ;;  %1253 = vrot.lane.b32.xlu0 %v2150_v56, %s3759_s25  ;;  %v1941_v59 = vld [vmem:[%s3618_s0 + $0xc] sm:$0xf] }
 0x16f   :  { %1360 = vrot.lane.b32.xlu1 %v1939_v57, %s3800_s22  ;;  %v1916_v57 = vld [vmem:[%s3618_s0 + $0xc] sm:$0xf] }
 0x171   :  { %v1705_v61 = vpop.permute.xlu1 %1704  ;;  %v877_v62 = vld [vmem:[#allocation2 + $0x48] sm:$0xf]  ;;  %v766_v0 = vpop.permute.xlu0 %765 }
 0x172   :  { %1875 = vmatprep.subr.msk.mxu0 %vm882_vm10, %v877_v62  ;;  %768 = vst.msk [vmem:[#allocation2 + $0x38] sm:$0xf0] %vm213_vm13, %v766_v0  ;;  %1391 = vrot.lane.b32.xlu0 %v1944_v63, %s3802_s7  ;;  %v874_v4 = vld [vmem:[#allocation2 + $0x30] sm:$0xff]  ;;  %v2163_v63 = vld [vmem:[%s3618_s0 + $0xc] ss:$0 sps:$4 sm:$0xff]   ;;  %s3830_s7 = smov 96  }
 0x173   :  { %1451 = vrot.lane.b32.xlu1 %v2148_v60, %s3801_s24  ;;  %1876 = vmatpush1.msk.msra.mxu0 %vm882_vm10, %v876_v1  ;;  %v2164_v60 = vld [vmem:[%s3618_s0 + $0xc] ss:$0 sps:$4 sm:$0xff]  }
 0x174   :  { %v1946_v1 = vld [vmem:[%s3618_s0 + $0xc] sm:$0xf] }
 0x175   :  { %v1601_v6 = vpop.permute.xlu1 %1600  ;;  %v773_v7 = vpop.permute.xlu0 %772 }
 0x176   :  { %1603 = vst.msk [vmem:[#allocation2 + $0x30] sm:$0xf0] %vm3803_vm8, %v1601_v6  ;;  %1487 = vrot.lane.b32.xlu0 %v2152_v3, %s3805_s11  ;;  %vm3812_vm8 = vcmask 228468   ;;  %v1882_v3 = vld [vmem:[%s3618_s0 + $0x8] sm:$0xf] }
 0x177   :  { %775 = vst.msk [vmem:[#allocation2 + $0x38] sm:$0xf0] %vm221_vm11, %v773_v7  ;;  %1556 = vrot.lane.b32.xlu1 %v1969_v2, %s3804_s13  ;;  %s3816_s13 = smov 98  }
 0x178   :  { %782 = vst.msk [vmem:[#allocation2 + $0x38] sm:$0xf0] %vm229_vm12, %v780_v58 }
 0x179   :  { %v1521_v9 = vpop.permute.xlu1 %1520  ;;  %v1699_v11 = vpop.permute.xlu0 %1698 }
 0x17a   :  { %1701 = vst.msk [vmem:[#allocation2 + $0x40] sm:$0xf] %vm22_vm0, %v1699_v11  ;;  %1587 = vrot.lane.b32.xlu0 %v1974_v10, %s3807_s12  ;;  %v1887_v10 = vld [vmem:[%s3618_s0 + $0xc] sm:$0xf] }
 0x17b   :  { %1649 = vrot.lane.b32.xlu1 %v2151_v8, %s3806_s21  ;;  %1707 = vst.msk [vmem:[#allocation2 + $0x40] sm:$0xf] %vm29_vm1, %v1705_v61  ;;  %s3808_s21 = smov 71   ;;  %v2165_v8 = vld [vmem:[%s3618_s0 + $0x8] ss:$0 sps:$4 sm:$0xff]  }
 0x17d   :  { %v1717_v14 = vpop.permute.xlu1 %1716  ;;  %v1515_v15 = vpop.permute.xlu0 %1514 }
 0x17e   :  { %1517 = vst.msk [vmem:[#allocation2 + $0x30] sm:$0xf] %vm22_vm0, %v1515_v15  ;;  %1685 = vrot.lane.b32.xlu0 %v2154_v13, %s3808_s21  ;;  %s3815_s21 = smov 94   ;;  %v2168_v13 = vld [vmem:[%s3618_s0 + $0xc] ss:$0 sps:$4 sm:$0xff]  }
 0x17f   :  { %974 = vrot.lane.b32.xlu1 %v1880_v12, %s3765_s15  ;;  %v875_v16 = vld [vmem:[#allocation2 + $0x38] sm:$0xff]  ;;  %1523 = vst.msk [vmem:[#allocation2 + $0x30] sm:$0xf] %vm29_vm1, %v1521_v9  ;;  %s3819_s15 = smov 88   ;;  %v1912_v12 = vld [vmem:[%s3618_s0 + $0x8] sm:$0xf] }
 0x180   :  { %913 = vmatprep.subr.mxu0 %v875_v16  ;;  %v2167_v16 = vld [vmem:[%s3618_s0 + $0x8] ss:$0 sps:$4 sm:$0xff]  }
 0x181   :  { %v1417_v20 = vpop.permute.xlu1 %1416  ;;  %914 = vmatpush1.msra.mxu0 %v874_v4  ;;  %v1711_v22 = vpop.permute.xlu0 %1710  ;;  %v2166_v4 = vld [vmem:[%s3618_s0 + $0xc] ss:$0 sps:$4 sm:$0xff]  }
 0x182   :  { %1419 = vst.msk [vmem:[#allocation2 + $0x20] sm:$0xf0] %vm3809_vm9, %v1417_v20  ;;  %915 = vmatprep.subr.mxu0 %v873_v21  ;;  %1062 = vrot.lane.b32.xlu0 %v2155_v18, %s3811_s4  ;;  %vm3813_vm9 = vcmask 343268   ;;  %s3814_s4 = smov 99   ;;  %v1917_v18 = vld [vmem:[%s3618_s0 + $0xc] sm:$0xf] }
 0x183   :  { %1713 = vst.msk [vmem:[#allocation2 + $0x40] sm:$0xf] %vm36_vm2, %v1711_v22  ;;  %1170 = vrot.lane.b32.xlu1 %v1910_v17, %s3810_s16  ;;  %916 = vmatpush1.msra.mxu0 %v872_v19  ;;  %v1942_v20 = vld [vmem:[%s3618_s0 + $0xc] sm:$0xf] }
 0x184   :  { %1719 = vst.msk [vmem:[#allocation2 + $0x40] sm:$0xf] %vm43_vm3, %v1717_v14  ;;  %917 = vmatprep.subr.mxu0 %v871_v23  ;;  %v2170_v21 = vld [vmem:[%s3618_s0 + $0xc] ss:$0 sps:$4 sm:$0xff]  }
 0x185   :  { %v1615_v26 = vpop.permute.xlu1 %1614  ;;  %918 = vmatpush1.msra.mxu0 %v870_v25  ;;  %v1608_v30 = vpop.permute.xlu0 %1607 }
 0x186   :  { %919 = vmatprep.subr.mxu0 %v869_v27  ;;  %1610 = vst.msk [vmem:[#allocation2 + $0x30] sm:$0xf0] %vm3812_vm8, %v1608_v30  ;;  %1200 = vrot.lane.b32.xlu0 %v1915_v29, %s3754_s2  ;;  %v1883_v29 = vld [vmem:[%s3618_s0 + $0x8] sm:$0xf]  ;;  %v2172_v30 = vld [vmem:[%s3618_s0 + $0xc] ss:$0 sps:$4 sm:$0xff]  }
 0x187   :  { %1260 = vrot.lane.b32.xlu1 %v2153_v24, %s3768_s10  ;;  %920 = vmatpush1.msra.mxu0 %v3073_v34  ;;  %1617 = vst.msk [vmem:[#allocation2 + $0x30] sm:$0xf0] %vm3813_vm9, %v1615_v26  ;;  %vm3818_vm9 = vcmask 458068   ;;  %v2169_v24 = vld [vmem:[%s3618_s0 + $0xc] ss:$0 sps:$4 sm:$0xff]  }
 0x188   :  { %1877 = vmatmul.mubr.msk.f32.vlgmr.msra.gmra.mxu0 %vm878_vm14, %v3203_v28  ;;  %v1947_v26 = vld [vmem:[%s3618_s0 + $0xc] sm:$0xf] }
 0x189   :  { %v3221_v33 = vpop.permute.xlu1 %1752  ;;  %v1331_v34 = vpop.permute.xlu0 %1330 }
 0x18a   :  { %1756 = vst.msk [vmem:[#allocation2 + $0x48] sm:$0xf] %vm87_vm4, %v3221_v33  ;;  %1295 = vrot.lane.b32.xlu0 %v2157_v32, %s3815_s21 }
 0x18b   :  { %1333 = vst.msk [vmem:[#allocation2 + $0x20] sm:$0xf] %vm22_vm0, %v1331_v34  ;;  %1366 = vrot.lane.b32.xlu1 %v1940_v31, %s3814_s4  ;;  %s3817_s4 = smov 89   ;;  %v2171_v34 = vld [vmem:[%s3618_s0 + $0x8] ss:$0 sps:$4 sm:$0xff]  }
 0x18d   :  { %v1424_v36 = vpop.permute.xlu1 %1423  ;;  %v1527_v38 = vpop.permute.xlu0 %1526 }
 0x18e   :  { %1426 = vst.msk [vmem:[#allocation2 + $0x20] sm:$0xf0] %vm3812_vm8, %v1424_v36  ;;  %1397 = vrot.lane.b32.xlu0 %v1945_v37, %s3817_s4  ;;  %vm3820_vm8 = vcmask 207968   ;;  %v1888_v36 = vld [vmem:[%s3618_s0 + $0xc] sm:$0xf]  ;;  %s3847_s4 = smov 117  }
 0x18f   :  { %1529 = vst.msk [vmem:[#allocation2 + $0x30] sm:$0xf] %vm36_vm2, %v1527_v38  ;;  %1458 = vrot.lane.b32.xlu1 %v2156_v35, %s3816_s13  ;;  %v1913_v38 = vld [vmem:[%s3618_s0 + $0x8] sm:$0xf] }
 0x191   :  { %v1622_v41 = vpop.permute.xlu1 %1621  ;;  %v1723_v42 = vpop.permute.xlu0 %1722 }
 0x192   :  { %1624 = vst.msk [vmem:[#allocation2 + $0x30] sm:$0xf0] %vm3818_vm9, %v1622_v41  ;;  %1494 = vrot.lane.b32.xlu0 %v2159_v40, %s3819_s15  ;;  %vm3822_vm9 = vcmask 113668  }
 0x193   :  { %1725 = vst.msk [vmem:[#allocation2 + $0x40] sm:$0xf] %vm50_vm5, %v1723_v42  ;;  %1562 = vrot.lane.b32.xlu1 %v1970_v39, %s3778_s17  ;;  %s3825_s17 = smov 116   ;;  %v2174_v39 = vld [vmem:[%s3618_s0 + $0xc] ss:$0 sps:$4 sm:$0xff]  }
 0x194   :  { %v2173_v42 = vld [vmem:[%s3618_s0 + $0xc] ss:$0 sps:$4 sm:$0xff]  }
 0x195   :  { %v1760_v44 = vpop.permute.xlu1 %1759  ;;  %v1337_v46 = vpop.permute.xlu0 %1336 }
 0x196   :  { %1762 = vst.msk [vmem:[#allocation2 + $0x48] sm:$0xf] %vm3820_vm8, %v1760_v44  ;;  %1593 = vrot.lane.b32.xlu0 %v1975_v45, %s3777_s29  ;;  %vm3824_vm8 = vcmask 343268   ;;  %s3839_s29 = smov 114   ;;  %v1918_v44 = vld [vmem:[%s3618_s0 + $0xc] sm:$0xf] }
 0x197   :  { %1339 = vst.msk [vmem:[#allocation2 + $0x20] sm:$0xf] %vm29_vm1, %v1337_v46  ;;  %1656 = vrot.lane.b32.xlu1 %v2158_v43, %s3821_s23  ;;  %s3823_s23 = smov 69   ;;  %v1884_v46 = vld [vmem:[%s3618_s0 + $0x8] sm:$0xf] }
 0x199   :  { %v1233_v49 = vpop.permute.xlu1 %1232  ;;  %v1533_v50 = vpop.permute.xlu0 %1532 }
 0x19a   :  { %1235 = vst.msk [vmem:[#allocation2 + $0x10] sm:$0xf0] %vm3822_vm9, %v1233_v49  ;;  %1692 = vrot.lane.b32.xlu0 %v2161_v48, %s3823_s23  ;;  %vm3827_vm9 = vcmask 97284   ;;  %s3834_s23 = smov 86  }
 0x19b   :  { %1535 = vst.msk [vmem:[#allocation2 + $0x30] sm:$0xf] %vm43_vm3, %v1533_v50  ;;  %980 = vrot.lane.b32.xlu1 %v1881_v47, %s3779_s30  ;;  %s3828_s30 = smov 97   ;;  %v2176_v47 = vld [vmem:[%s3618_s0 + $0xc] ss:$0 sps:$4 sm:$0xff]  }
 0x19c   :  { %v2175_v50 = vld [vmem:[%s3618_s0 + $0x8] ss:$0 sps:$4 sm:$0xff]  }
 0x19d   :  { %v1431_v53 = vpop.permute.xlu1 %1430  ;;  %v1729_v54 = vpop.permute.xlu0 %1728 }
 0x19e   :  { %1433 = vst.msk [vmem:[#allocation2 + $0x20] sm:$0xf0] %vm3824_vm8, %v1431_v53  ;;  %1069 = vrot.lane.b32.xlu0 %v2162_v52, %s3826_s1  ;;  %vm3832_vm8 = vcmask 228468   ;;  %v1889_v52 = vld [vmem:[%s3618_s0 + $0xc] sm:$0xf] }
 0x19f   :  { %1731 = vst.msk [vmem:[#allocation2 + $0x40] sm:$0xf] %vm57_vm6, %v1729_v54  ;;  %1176 = vrot.lane.b32.xlu1 %v1911_v51, %s3825_s17  ;;  %v2178_v54 = vld [vmem:[%s3618_s0 + $0xc] ss:$0 sps:$4 sm:$0xff]  }
 0x1a1   :  { %v3281_v56 = vpop.permute.xlu1 %1568  ;;  %v1147_v58 = vpop.permute.xlu0 %1146 }
 0x1a2   :  { %1572 = vst.msk [vmem:[#allocation2 + $0x38] sm:$0xf] %vm87_vm4, %v3281_v56  ;;  %1207 = vrot.lane.b32.xlu0 %v1916_v57, %s3759_s25 }
 0x1a3   :  { %1149 = vst.msk [vmem:[#allocation2 + $0x10] sm:$0xf] %vm22_vm0, %v1147_v58  ;;  %1267 = vrot.lane.b32.xlu1 %v2160_v55, %s3784_s8  ;;  %vm3829_vm0 = vcmask 322768   ;;  %v2177_v58 = vld [vmem:[%s3618_s0 + $0xc] ss:$0 sps:$4 sm:$0xff]  }
 0x1a5   :  { %v3297_v61 = vpop.permute.xlu1 %1663  ;;  %v1343_v62 = vpop.permute.xlu0 %1342 }
 0x1a6   :  { %1667 = vst.msk [vmem:[#allocation2 + $0x38] sm:$0xf0] %vm3827_vm9, %v3297_v61  ;;  %1303 = vrot.lane.b32.xlu0 %v2164_v60, %s2217_s19  ;;  %vm3833_vm9 = vcmask 572868   ;;  %s3837_s19 = smov 110   ;;  %v1919_v60 = vld [vmem:[%s3618_s0 + $0xc] sm:$0xf] }
 0x1a7   :  { %1345 = vst.msk [vmem:[#allocation2 + $0x20] sm:$0xf] %vm36_vm2, %v1343_v62  ;;  %1372 = vrot.lane.b32.xlu1 %v1941_v59, %s3828_s30  ;;  %s3831_s30 = smov 87  }
 0x1a9   :  { %v1766_v0 = vpop.permute.xlu1 %1765  ;;  %v1539_v2 = vpop.permute.xlu0 %1538 }
 0x1aa   :  { %1768 = vst.msk [vmem:[#allocation2 + $0x48] sm:$0xf] %vm3829_vm0, %v1766_v0  ;;  %1403 = vrot.lane.b32.xlu0 %v1946_v1, %s3831_s30  ;;  %vm3835_vm0 = vcmask 458068   ;;  %s3836_s30 = smov 119   ;;  %v2180_v0 = vld [vmem:[%s3618_s0 + $0xc] ss:$0 sps:$4 sm:$0xff]  }
 0x1ab   :  { %1541 = vst.msk [vmem:[#allocation2 + $0x30] sm:$0xf] %vm50_vm5, %v1539_v2  ;;  %1465 = vrot.lane.b32.xlu1 %v2163_v63, %s3830_s7  ;;  %v1885_v63 = vld [vmem:[%s3618_s0 + $0x8] sm:$0xf] }
 0x1ad   :  { %v1240_v6 = vpop.permute.xlu1 %1239  ;;  %v1629_v7 = vpop.permute.xlu0 %1628 }
 0x1ae   :  { %1242 = vst.msk [vmem:[#allocation2 + $0x10] sm:$0xf0] %vm3832_vm8, %v1240_v6  ;;  %1501 = vrot.lane.b32.xlu0 %v2166_v4, %s3834_s23  ;;  %vm3838_vm8 = vcmask 207968   ;;  %v1890_v6 = vld [vmem:[%s3618_s0 + $0xc] sm:$0xf] }
 0x1af   :  { %1631 = vst.msk [vmem:[#allocation2 + $0x30] sm:$0xf0] %vm3833_vm9, %v1629_v7  ;;  %986 = vrot.lane.b32.xlu1 %v1882_v3, %s3798_s27  ;;  %vm3840_vm9 = vcmask 437568   ;;  %s3844_s27 = smov 84   ;;  %v2179_v3 = vld [vmem:[%s3618_s0 + $0x8] ss:$0 sps:$4 sm:$0xff]  }
 0x1b1   :  { %v1438_v9 = vpop.permute.xlu1 %1437  ;;  %v1735_v11 = vpop.permute.xlu0 %1734 }
 0x1b2   :  { %1440 = vst.msk [vmem:[#allocation2 + $0x20] sm:$0xf0] %vm3835_vm0, %v1438_v9  ;;  %1016 = vrot.lane.b32.xlu0 %v1887_v10, %s3837_s19  ;;  %vm3842_vm0 = vcmask 687668   ;;  %v1886_v10 = vld [vmem:[%s3618_s0 + $0xc] sm:$0xf] }
 0x1b3   :  { %1737 = vst.msk [vmem:[#allocation2 + $0x40] sm:$0xf] %vm64_vm7, %v1735_v11  ;;  %1076 = vrot.lane.b32.xlu1 %v2165_v8, %s3836_s30  ;;  %s3841_s30 = smov 95   ;;  %v2182_v11 = vld [vmem:[%s3618_s0 + $0xc] ss:$0 sps:$4 sm:$0xff]  }
 0x1b5   :  { %v1576_v14 = vpop.permute.xlu1 %1575  ;;  %v1153_v15 = vpop.permute.xlu0 %1152 }
 0x1b6   :  { %1578 = vst.msk [vmem:[#allocation2 + $0x38] sm:$0xf] %vm3838_vm8, %v1576_v14  ;;  %1111 = vrot.lane.b32.xlu0 %v2168_v13, %s3755_s5  ;;  %vm3843_vm8 = vcmask 913168   ;;  %s3854_s5 = smov 115   ;;  %v2181_v14 = vld [vmem:[%s3618_s0 + $0xc] ss:$0 sps:$4 sm:$0xff]  }
 0x1b7   :  { %1155 = vst.msk [vmem:[#allocation2 + $0x10] sm:$0xf] %vm29_vm1, %v1153_v15  ;;  %1182 = vrot.lane.b32.xlu1 %v1912_v12, %s3839_s29 }
 0x1b9   :  { %v1672_v17 = vpop.permute.xlu1 %1671  ;;  %v1349_v19 = vpop.permute.xlu0 %1348 }
 0x1ba   :  { %1674 = vst.msk [vmem:[#allocation2 + $0x38] sm:$0xf0] %vm205_vm15, %v1672_v17  ;;  %1213 = vrot.lane.b32.xlu0 %v1917_v18, %s3768_s10  ;;  %v2183_v18 = vld [vmem:[%s3618_s0 + $0xc] ss:$0 sps:$4 sm:$0xff]  }
 0x1bb   :  { %1351 = vst.msk [vmem:[#allocation2 + $0x20] sm:$0xf] %vm43_vm3, %v1349_v19  ;;  %1274 = vrot.lane.b32.xlu1 %v2167_v16, %s3801_s24  ;;  %v1891_v16 = vld [vmem:[%s3618_s0 + $0xc] sm:$0xf] }
 0x1bd   :  { %v1772_v22 = vpop.permute.xlu1 %1771  ;;  %v1545_v23 = vpop.permute.xlu0 %1544 }
 0x1be   :  { %1774 = vst.msk [vmem:[#allocation2 + $0x48] sm:$0xf] %vm3840_vm9, %v1772_v22  ;;  %1310 = vrot.lane.b32.xlu0 %v2170_v21, %s3805_s11  ;;  %vm3845_vm9 = vcmask 572868  }
 0x1bf   :  { %1547 = vst.msk [vmem:[#allocation2 + $0x30] sm:$0xf] %vm57_vm6, %v1545_v23  ;;  %1378 = vrot.lane.b32.xlu1 %v1942_v20, %s3841_s30 }
 0x1c1   :  { %v1159_v25 = vpop.permute.xlu1 %1158  ;;  %v1636_v27 = vpop.permute.xlu0 %1635 }
 0x1c2   :  { %1161 = vst.msk [vmem:[#allocation2 + $0x10] sm:$0xf] %vm36_vm2, %v1159_v25  ;;  %1409 = vrot.lane.b32.xlu0 %v1947_v26, %s3775_s14 }
 0x1c3   :  { %1638 = vst.msk [vmem:[#allocation2 + $0x30] sm:$0xf0] %vm3842_vm0, %v1636_v27  ;;  %1472 = vrot.lane.b32.xlu1 %v2169_v24, %s3815_s21  ;;  %vm3846_vm0 = vcmask 113668  }
 0x1c5   :  { %v1355_v31 = vpop.permute.xlu1 %1354  ;;  %v1741_v32 = vpop.permute.xlu0 %1740 }
 0x1c6   :  { %1357 = vst.msk [vmem:[#allocation2 + $0x20] sm:$0xf] %vm50_vm5, %v1355_v31  ;;  %1508 = vrot.lane.b32.xlu0 %v2172_v30, %s3844_s27 }
 0x1c7   :  { %1743 = vst.msk [vmem:[#allocation2 + $0x40] sm:$0xf] %vm3843_vm8, %v1741_v32  ;;  %992 = vrot.lane.b32.xlu1 %v1883_v29, %s3810_s16  ;;  %vm3848_vm8 = vcmask 343268  }
 0x1c9   :  { %v1445_v35 = vpop.permute.xlu1 %1444  ;;  %v1049_v37 = vpop.permute.xlu0 %1048 }
 0x1ca   :  { %1447 = vst.msk [vmem:[#allocation2 + $0x20] sm:$0xf0] %vm3845_vm9, %v1445_v35  ;;  %1023 = vrot.lane.b32.xlu0 %v1888_v36, %s3754_s2  ;;  %vm3849_vm9 = vcmask 802468  }
 0x1cb   :  { %1051 = vst.msk [vmem:[#allocation2] sm:$0xf0] %vm3846_vm0, %v1049_v37  ;;  %1083 = vrot.lane.b32.xlu1 %v2171_v34, %s3847_s4  ;;  %vm3850_vm0 = vcmask 1027968  }
 0x1cd   :  { %v1551_v40 = vpop.permute.xlu1 %1550  ;;  %v1247_v41 = vpop.permute.xlu0 %1246 }
 0x1ce   :  { %1553 = vst.msk [vmem:[#allocation2 + $0x30] sm:$0xf] %vm64_vm7, %v1551_v40  ;;  %1119 = vrot.lane.b32.xlu0 %v2174_v39, %s3760_s18 }
 0x1cf   :  { %1249 = vst.msk [vmem:[#allocation2 + $0x10] sm:$0xf0] %vm3848_vm8, %v1247_v41  ;;  %1188 = vrot.lane.b32.xlu1 %v1913_v38, %s3757_s6  ;;  %vm3851_vm8 = vcmask 1044464  }
 0x1d1   :  { %v1643_v43 = vpop.permute.xlu1 %1642  ;;  %v3411_v45 = vpop.permute.xlu0 %1384 }
 0x1d2   :  { %1645 = vst.msk [vmem:[#allocation2 + $0x30] sm:$0xf0] %vm3849_vm9, %v1643_v43  ;;  %1219 = vrot.lane.b32.xlu0 %v1918_v44, %s3784_s8  ;;  %vm3852_vm9 = vcmask 97284  }
 0x1d3   :  { %1388 = vst.msk [vmem:[#allocation2 + $0x28] sm:$0xf] %vm87_vm4, %v3411_v45  ;;  %1281 = vrot.lane.b32.xlu1 %v2173_v42, %s3816_s13  ;;  %s3860_s13 = smov 113  }
 0x1d5   :  { %v1747_v48 = vpop.permute.xlu1 %1746  ;;  %v3424_v49 = vpop.permute.xlu0 %1479 }
 0x1d6   :  { %1749 = vst.msk [vmem:[#allocation2 + $0x40] sm:$0xf] %vm3850_vm0, %v1747_v48  ;;  %1317 = vrot.lane.b32.xlu0 %v2176_v47, %s3819_s15  ;;  %vm3853_vm0 = vcmask 322768  }
 0x1d7   :  { %1755 = vst.msk [vmem:[#allocation2 + $0x40] sm:$0xf] %vm3851_vm8, %v3221_v33  ;;  %998 = vrot.lane.b32.xlu1 %v1884_v46, %s3825_s17  ;;  %v1914_v33 = vld [vmem:[%s3618_s0 + $0xc] sm:$0xf]  ;;  %vm3856_vm8 = vcmask 687668  }
 0x1d8   :  { %1483 = vst.msk [vmem:[#allocation2 + $0x28] sm:$0xf0] %vm3852_vm9, %v3424_v49  ;;  %vm3857_vm9 = vcmask 228468  }
 0x1d9   :  { %v969_v51 = vpop.permute.xlu1 %968  ;;  %v1582_v53 = vpop.permute.xlu0 %1581 }
 0x1da   :  { %971 = vst.msk [vmem:[#allocation2] sm:$0xf] %vm29_vm1, %v969_v51  ;;  %1029 = vrot.lane.b32.xlu0 %v1889_v52, %s3759_s25  ;;  %vm3855_vm1 = vcmask 552368  }
 0x1db   :  { %1584 = vst.msk [vmem:[#allocation2 + $0x38] sm:$0xf] %vm3853_vm0, %v1582_v53  ;;  %1090 = vrot.lane.b32.xlu1 %v2175_v50, %s3854_s5  ;;  %vm3858_vm0 = vcmask 913168  }
 0x1dd   :  { %v1165_v55 = vpop.permute.xlu1 %1164  ;;  %v1679_v57 = vpop.permute.xlu0 %1678 }
 0x1de   :  { %1167 = vst.msk [vmem:[#allocation2 + $0x10] sm:$0xf] %vm43_vm3, %v1165_v55  ;;  %1126 = vrot.lane.b32.xlu0 %v2178_v54, %s3769_s20  ;;  %v1789_v9 = vld [vmem:[#allocation2 + $0x40] sm:$0xf] }
 0x1df   :  { %1681 = vst.msk [vmem:[#allocation2 + $0x38] sm:$0xf0] %vm213_vm13, %v1679_v57  ;;  %1194 = vrot.lane.b32.xlu1 %v1914_v33, %s3837_s19 }
 0x1e1   :  { %v1361_v59 = vpop.permute.xlu1 %1360  ;;  %v1778_v62 = vpop.permute.xlu0 %1777 }
 0x1e2   :  { %1363 = vst.msk [vmem:[#allocation2 + $0x20] sm:$0xf] %vm57_vm6, %v1361_v59  ;;  %1225 = vrot.lane.b32.xlu0 %v1919_v60, %s3801_s24 }
 0x1e3   :  { %1780 = vst.msk [vmem:[#allocation2 + $0x48] sm:$0xf] %vm3855_vm1, %v1778_v62  ;;  %1288 = vrot.lane.b32.xlu1 %v2177_v58, %s3830_s7  ;;  %vm3859_vm1 = vcmask 458068  }
 0x1e5   :  { %v1452_v1 = vpop.permute.xlu1 %1451  ;;  %v1056_v2 = vpop.permute.xlu0 %1055 }
 0x1e6   :  { %1454 = vst.msk [vmem:[#allocation2 + $0x20] sm:$0xf0] %vm3856_vm8, %v1452_v1  ;;  %1324 = vrot.lane.b32.xlu0 %v2180_v0, %s3834_s23  ;;  %vm3861_vm8 = vcmask 917268  }
 0x1e7   :  { %1058 = vst.msk [vmem:[#allocation2] sm:$0xf0] %vm3857_vm9, %v1056_v2  ;;  %1004 = vrot.lane.b32.xlu1 %v1885_v63, %s3839_s29  ;;  %vm3862_vm9 = vcmask 207968  }
 0x1e9   :  { %v1557_v4 = vpop.permute.xlu1 %1556  ;;  %v1254_v7 = vpop.permute.xlu0 %1253 }
 0x1ea   :  { %1559 = vst.msk [vmem:[#allocation2 + $0x30] sm:$0xf] %vm3858_vm0, %v1557_v4  ;;  %v1790_v8 = vld [vmem:[#allocation2 + $0x48] sm:$0xf]  ;;  %1035 = vrot.lane.b32.xlu0 %v1890_v6, %s3768_s10  ;;  %vm3865_vm0 = vcmask 343268  }
 0x1eb   :  { %1256 = vst.msk [vmem:[#allocation2 + $0x10] sm:$0xf0] %vm3859_vm1, %v1254_v7  ;;  %1097 = vrot.lane.b32.xlu1 %v2179_v3, %s3860_s13  ;;  %2004 = vmatprep.subr.msk.mxu1 %vm882_vm10, %v1790_v8  ;;  %vm3866_vm1 = vcmask 802468  }
 0x1ec   :  { %2005 = vmatpush1.msk.msra.mxu1 %vm882_vm10, %v1789_v9  ;;  %vm3863_vm10 = vcmask 437568  }
 0x1ed   :  { %v1650_v12 = vpop.permute.xlu1 %1649  ;;  %v1392_v13 = vpop.permute.xlu0 %1391 }
 0x1ee   :  { %1652 = vst.msk [vmem:[#allocation2 + $0x30] sm:$0xf0] %vm3861_vm8, %v1650_v12  ;;  %1133 = vrot.lane.b32.xlu0 %v2182_v11, %s3721_s26  ;;  %vm3867_vm8 = vcmask 1027968  }
 0x1ef   :  { %1394 = vst.msk [vmem:[#allocation2 + $0x28] sm:$0xf] %vm3862_vm9, %v1392_v13  ;;  %1010 = vrot.lane.b32.xlu1 %v1886_v10, %s3757_s6  ;;  %vm3868_vm9 = vcmask 1044464  }
 0x1f1   :  { %v975_v15 = vpop.permute.xlu1 %974  ;;  %v1488_v17 = vpop.permute.xlu0 %1487 }
 0x1f2   :  { %977 = vst.msk [vmem:[#allocation2] sm:$0xf] %vm36_vm2, %v975_v15  ;;  %1041 = vrot.lane.b32.xlu0 %v1891_v16, %s3784_s8  ;;  %vm3864_vm2 = vcmask 572868  }
 0x1f3   :  { %1490 = vst.msk [vmem:[#allocation2 + $0x28] sm:$0xf0] %vm205_vm15, %v1488_v17  ;;  %1104 = vrot.lane.b32.xlu1 %v2181_v14, %s3746_s28 }
 0x1f5   :  { %v1171_v19 = vpop.permute.xlu1 %1170  ;;  %v1588_v20 = vpop.permute.xlu0 %1587 }
 0x1f6   :  { %1173 = vst.msk [vmem:[#allocation2 + $0x10] sm:$0xf] %vm50_vm5, %v1171_v19  ;;  %1140 = vrot.lane.b32.xlu0 %v2183_v18, %s3800_s22 }
 0x1f7   :  { %1590 = vst.msk [vmem:[#allocation2 + $0x38] sm:$0xf] %vm3863_vm10, %v1588_v20  ;;  %vm3869_vm10 = vcmask 97284  }
 0x1f9   :  { %v1261_v21 = vpop.permute.xlu1 %1260  ;;  %v1686_v22 = vpop.permute.xlu0 %1685 }
 0x1fa   :  { %1263 = vst.msk [vmem:[#allocation2 + $0x10] sm:$0xf0] %vm3864_vm2, %v1261_v21  ;;  %vm3870_vm2 = vcmask 1032068  }
 0x1fb   :  { %1688 = vst.msk [vmem:[#allocation2 + $0x38] sm:$0xf0] %vm221_vm11, %v1686_v22 }
 0x1fd   :  { %v1367_v23 = vpop.permute.xlu1 %1366  ;;  %v1063_v24 = vpop.permute.xlu0 %1062 }
 0x1fe   :  { %1369 = vst.msk [vmem:[#allocation2 + $0x20] sm:$0xf] %vm64_vm7, %v1367_v23 }
 0x1ff   :  { %1065 = vst.msk [vmem:[#allocation2] sm:$0xf0] %vm3865_vm0, %v1063_v24  ;;  %vm3871_vm0 = vcmask 1048564  }
 0x201   :  { %v1459_v25 = vpop.permute.xlu1 %1458  ;;  %v3515_v26 = vpop.permute.xlu0 %1200 }
 0x202   :  { %1461 = vst.msk [vmem:[#allocation2 + $0x20] sm:$0xf0] %vm3866_vm1, %v1459_v25  ;;  %vm3872_vm1 = vcmask 322768  }
 0x203   :  { %1204 = vst.msk [vmem:[#allocation2 + $0x18] sm:$0xf] %vm87_vm4, %v3515_v26 }
 0x205   :  { %v1563_v27 = vpop.permute.xlu1 %1562  ;;  %v3520_v29 = vpop.permute.xlu0 %1295 }
 0x206   :  { %1565 = vst.msk [vmem:[#allocation2 + $0x30] sm:$0xf] %vm3867_vm8, %v1563_v27  ;;  %vm3873_vm8 = vcmask 552368  }
 0x207   :  { %1571 = vst.msk [vmem:[#allocation2 + $0x30] sm:$0xf] %vm3868_vm9, %v3281_v56  ;;  %vm3874_vm9 = vcmask 687668  }
 0x208   :  { %1299 = vst.msk [vmem:[#allocation2 + $0x18] sm:$0xf0] %vm3869_vm10, %v3520_v29  ;;  %vm3875_vm10 = vcmask 913168  }
 0x209   :  { %v1657_v30 = vpop.permute.xlu1 %1656  ;;  %v1398_v31 = vpop.permute.xlu0 %1397 }
 0x20a   :  { %1659 = vst.msk [vmem:[#allocation2 + $0x30] sm:$0xf0] %vm3870_vm2, %v1657_v30  ;;  %vm3877_vm2 = vcmask 917268  }
 0x20b   :  { %1666 = vst.msk [vmem:[#allocation2 + $0x30] sm:$0xf0] %vm3871_vm0, %v3297_v61  ;;  %vm3878_vm0 = vcmask 207968  }
 0x20c   :  { %1400 = vst.msk [vmem:[#allocation2 + $0x28] sm:$0xf] %vm3872_vm1, %v1398_v31  ;;  %vm3879_vm1 = vcmask 572868  }
 0x20d   :  { %v981_v32 = vpop.permute.xlu1 %980  ;;  %v1495_v34 = vpop.permute.xlu0 %1494 }
 0x20e   :  { %983 = vst.msk [vmem:[#allocation2] sm:$0xf] %vm43_vm3, %v981_v32  ;;  %vm3876_vm3 = vcmask 458068  }
 0x20f   :  { %1497 = vst.msk [vmem:[#allocation2 + $0x28] sm:$0xf0] %vm213_vm13, %v1495_v34 }
 0x211   :  { %v1177_v35 = vpop.permute.xlu1 %1176  ;;  %v1594_v56 = vpop.permute.xlu0 %1593 }
 0x212   :  { %1179 = vst.msk [vmem:[#allocation2 + $0x10] sm:$0xf] %vm57_vm6, %v1177_v35  ;;  %v1787_v42 = vld [vmem:[#allocation2 + $0x30] sm:$0xff] }
 0x213   :  { %1596 = vst.msk [vmem:[#allocation2 + $0x38] sm:$0xf] %vm3873_vm8, %v1594_v56  ;;  %vm3880_vm8 = vcmask 437568  }
 0x215   :  { %v1268_v36 = vpop.permute.xlu1 %1267  ;;  %v1693_v37 = vpop.permute.xlu0 %1692 }
 0x216   :  { %1270 = vst.msk [vmem:[#allocation2 + $0x10] sm:$0xf0] %vm3874_vm9, %v1268_v36  ;;  %vm3881_vm9 = vcmask 802468  }
 0x217   :  { %1695 = vst.msk [vmem:[#allocation2 + $0x38] sm:$0xf0] %vm229_vm12, %v1693_v37 }
 0x219   :  { %v1373_v61 = vpop.permute.xlu1 %1372  ;;  %v1070_v38 = vpop.permute.xlu0 %1069 }
 0x21a   :  { %1375 = vst.msk [vmem:[#allocation2 + $0x20] sm:$0xf] %vm3875_vm10, %v1373_v61  ;;  %vm3883_vm10 = vcmask 1044464  }
 0x21b   :  { %1072 = vst.msk [vmem:[#allocation2] sm:$0xf0] %vm3876_vm3, %v1070_v38  ;;  %vm3884_vm3 = vcmask 97284  }
 0x21d   :  { %v1466_v39 = vpop.permute.xlu1 %1465  ;;  %v1208_v40 = vpop.permute.xlu0 %1207 }
 0x21e   :  { %1468 = vst.msk [vmem:[#allocation2 + $0x20] sm:$0xf0] %vm3877_vm2, %v1466_v39  ;;  %v1788_v41 = vld [vmem:[#allocation2 + $0x38] sm:$0xff]  ;;  %vm3885_vm2 = vcmask 1032068  }
 0x21f   :  { %1210 = vst.msk [vmem:[#allocation2 + $0x18] sm:$0xf] %vm3878_vm0, %v1208_v40  ;;  %1821 = vmatprep.subr.mxu1 %v1788_v41  ;;  %vm3886_vm0 = vcmask 1048564  }
 0x220   :  { %1822 = vmatpush1.msra.mxu1 %v1787_v42 }
 0x221   :  { %v987_v43 = vpop.permute.xlu1 %986  ;;  %v1304_v44 = vpop.permute.xlu0 %1303 }
 0x222   :  { %989 = vst.msk [vmem:[#allocation2] sm:$0xf] %vm50_vm5, %v987_v43  ;;  %vm3882_vm5 = vcmask 1027968  }
 0x223   :  { %1306 = vst.msk [vmem:[#allocation2 + $0x18] sm:$0xf0] %vm205_vm15, %v1304_v44 }
 0x225   :  { %v1077_v46 = vpop.permute.xlu1 %1076  ;;  %v1404_v47 = vpop.permute.xlu0 %1403 }
 0x226   :  { %1079 = vst.msk [vmem:[#allocation2] sm:$0xf0] %vm3879_vm1, %v1077_v46  ;;  %vm3887_vm1 = vcmask 322768  }
 0x227   :  { %1406 = vst.msk [vmem:[#allocation2 + $0x28] sm:$0xf] %vm3880_vm8, %v1404_v47  ;;  %vm3889_vm8 = vcmask 552368  }
 0x229   :  { %v1183_v48 = vpop.permute.xlu1 %1182  ;;  %v1502_v50 = vpop.permute.xlu0 %1501 }
 0x22a   :  { %1185 = vst.msk [vmem:[#allocation2 + $0x10] sm:$0xf] %vm64_vm7, %v1183_v48 }
 0x22b   :  { %1504 = vst.msk [vmem:[#allocation2 + $0x28] sm:$0xf0] %vm221_vm11, %v1502_v50 }
 0x22d   :  { %v1275_v51 = vpop.permute.xlu1 %1274  ;;  %v3547_v52 = vpop.permute.xlu0 %1016 }
 0x22e   :  { %1277 = vst.msk [vmem:[#allocation2 + $0x10] sm:$0xf0] %vm3881_vm9, %v1275_v51  ;;  %vm3890_vm9 = vcmask 913168  }
 0x22f   :  { %1020 = vst.msk [vmem:[#allocation2 + $0x8] sm:$0xf] %vm87_vm4, %v3547_v52  ;;  %vm3888_vm4 = vcmask 687668  }
 0x231   :  { %v1379_v53 = vpop.permute.xlu1 %1378  ;;  %v3552_v33 = vpop.permute.xlu0 %1111 }
 0x232   :  { %1381 = vst.msk [vmem:[#allocation2 + $0x20] sm:$0xf] %vm3882_vm5, %v1379_v53  ;;  %vm3891_vm5 = vcmask 917268  }
 0x233   :  { %1387 = vst.msk [vmem:[#allocation2 + $0x20] sm:$0xf] %vm3883_vm10, %v3411_v45  ;;  %vm961_vm10 = vcmask 556032  }
 0x234   :  { %1115 = vst.msk [vmem:[#allocation2 + $0x8] sm:$0xf0] %vm3884_vm3, %v3552_v33  ;;  %vm3894_vm3 = vcmask 437568  }
 0x235   :  { %v1473_v54 = vpop.permute.xlu1 %1472  ;;  %v1214_v55 = vpop.permute.xlu0 %1213 }
 0x236   :  { %1475 = vst.msk [vmem:[#allocation2 + $0x20] sm:$0xf0] %vm3885_vm2, %v1473_v54  ;;  %vm3895_vm2 = vcmask 1027968  }
 0x237   :  { %1482 = vst.msk [vmem:[#allocation2 + $0x20] sm:$0xf0] %vm3886_vm0, %v3424_v49  ;;  %vm3897_vm0 = vcmask 1032068  }
 0x238   :  { %1216 = vst.msk [vmem:[#allocation2 + $0x18] sm:$0xf] %vm3887_vm1, %v1214_v55  ;;  %vm3898_vm1 = vcmask 1048564  }
 0x239   :  { %v993_v57 = vpop.permute.xlu1 %992  ;;  %v1311_v58 = vpop.permute.xlu0 %1310 }
 0x23a   :  { %995 = vst.msk [vmem:[#allocation2] sm:$0xf] %vm57_vm6, %v993_v57  ;;  %vm3892_vm6 = vcmask 207968  }
 0x23b   :  { %1313 = vst.msk [vmem:[#allocation2 + $0x18] sm:$0xf0] %vm213_vm13, %v1311_v58 }
 0x23d   :  { %v1084_v59 = vpop.permute.xlu1 %1083  ;;  %v1410_v45 = vpop.permute.xlu0 %1409 }
 0x23e   :  { %1086 = vst.msk [vmem:[#allocation2] sm:$0xf0] %vm3888_vm4, %v1084_v59  ;;  %v1785_v8 = vld [vmem:[#allocation2 + $0x20] sm:$0xff]  ;;  %vm3899_vm4 = vcmask 322768  }
 0x23f   :  { %1412 = vst.msk [vmem:[#allocation2 + $0x28] sm:$0xf] %vm3889_vm8, %v1410_v45  ;;  %vm3900_vm8 = vmmov %vm3890_vm9 }
 0x241   :  { %v1189_v60 = vpop.permute.xlu1 %1188  ;;  %v1509_v62 = vpop.permute.xlu0 %1508 }
 0x242   :  { %1191 = vst.msk [vmem:[#allocation2 + $0x10] sm:$0xf] %vm3890_vm9, %v1189_v60  ;;  %vm3901_vm9 = vmmov %vm3891_vm5 }
 0x243   :  { %1511 = vst.msk [vmem:[#allocation2 + $0x28] sm:$0xf0] %vm229_vm12, %v1509_v62 }
 0x245   :  { %v1282_v49 = vpop.permute.xlu1 %1281  ;;  %v1024_v63 = vpop.permute.xlu0 %1023 }
 0x246   :  { %1284 = vst.msk [vmem:[#allocation2 + $0x10] sm:$0xf0] %vm3891_vm5, %v1282_v49  ;;  %vm3902_vm5 = vcmask 552368  }
 0x247   :  { %1026 = vst.msk [vmem:[#allocation2 + $0x8] sm:$0xf] %vm3892_vm6, %v1024_v63  ;;  %vm3903_vm6 = vmmov %vm3895_vm2 }
 0x248   :  { %v955_v0 = vpop.f32.mrf.mxu0 }
 0x249   :  { %v956_v1 = vadd.f32 %v955_v0, %v2523_v5  ;;  %v999_v2 = vpop.permute.xlu1 %998  ;;  %v1120_v3 = vpop.permute.xlu0 %1119 }
 0x24a   :  { %1001 = vst.msk [vmem:[#allocation2] sm:$0xf] %vm64_vm7, %v999_v2  ;;  %v957_v4 = vpop.f32.mrf.mxu0  ;;  %v1786_v6 = vld [vmem:[#allocation2 + $0x28] sm:$0xff]  ;;  %vm3893_vm7 = vcmask 802468  }
 0x24b   :  { %960 = vst [vmem:[%s3620_s3] sm:$0xff] %v956_v1  ;;  %1122 = vst.msk [vmem:[#allocation2 + $0x8] sm:$0xf0] %vm205_vm15, %v1120_v3  ;;  %v958_v7 = vadd.f32 %v957_v4, %v2523_v5  ;;  %1823 = vmatprep.subr.mxu1 %v1786_v6  ;;  %vm3896_vm15 = vcmask 1044464  }
 0x24c   :  { %1824 = vmatpush1.msra.mxu1 %v1785_v8 }
 0x24d   :  { %962 = vst.msk [vmem:[%s3620_s3 + $0x8] sm:$0xff] %vm961_vm10, %v958_v7  ;;  %v1091_v9 = vpop.permute.xlu1 %1090  ;;  %v1220_v10 = vpop.permute.xlu0 %1219 }
 0x24e   :  { %1093 = vst.msk [vmem:[#allocation2] sm:$0xf0] %vm3893_vm7, %v1091_v9  ;;  %vm3904_vm7 = vmmov %vm3896_vm15 }
 0x24f   :  { %1222 = vst.msk [vmem:[#allocation2 + $0x18] sm:$0xf] %vm3894_vm3, %v1220_v10  ;;  %vm3905_vm3 = vmmov %vm3897_vm0 }
 0x251   :  { %v1195_v11 = vpop.permute.xlu1 %1194  ;;  %v1318_v12 = vpop.permute.xlu0 %1317 }
 0x252   :  { %1197 = vst.msk [vmem:[#allocation2 + $0x10] sm:$0xf] %vm3895_vm2, %v1195_v11  ;;  %vm3907_vm2 = vcmask 437568  }
 0x253   :  { %1203 = vst.msk [vmem:[#allocation2 + $0x10] sm:$0xf] %vm3896_vm15, %v3515_v26  ;;  %vm3908_vm15 = vmmov %vm3902_vm5 }
 0x254   :  { %1320 = vst.msk [vmem:[#allocation2 + $0x18] sm:$0xf0] %vm221_vm11, %v1318_v12 }
 0x255   :  { %v1289_v13 = vpop.permute.xlu1 %1288  ;;  %v1030_v14 = vpop.permute.xlu0 %1029 }
 0x256   :  { %1291 = vst.msk [vmem:[#allocation2 + $0x10] sm:$0xf0] %vm3897_vm0, %v1289_v13 }
 0x257   :  { %1298 = vst.msk [vmem:[#allocation2 + $0x10] sm:$0xf0] %vm3898_vm1, %v3520_v29 }
 0x258   :  { %1032 = vst.msk [vmem:[#allocation2 + $0x8] sm:$0xf] %vm3899_vm4, %v1030_v14 }
 0x259   :  { %v1005_v15 = vpop.permute.xlu1 %1004  ;;  %v1127_v16 = vpop.permute.xlu0 %1126 }
 0x25a   :  { %1007 = vst.msk [vmem:[#allocation2] sm:$0xf] %vm3900_vm8, %v1005_v15 }
 0x25b   :  { %1129 = vst.msk [vmem:[#allocation2 + $0x8] sm:$0xf0] %vm213_vm13, %v1127_v16  ;;  %vm3906_vm13 = vmmov %vm3898_vm1 }
 0x25d   :  { %v1098_v17 = vpop.permute.xlu1 %1097  ;;  %v1226_v18 = vpop.permute.xlu0 %1225 }
 0x25e   :  { %1100 = vst.msk [vmem:[#allocation2] sm:$0xf0] %vm3901_vm9, %v1098_v17  ;;  %v1783_v25 = vld [vmem:[#allocation2 + $0x10] sm:$0xff] }
 0x25f   :  { %1228 = vst.msk [vmem:[#allocation2 + $0x18] sm:$0xf] %vm3902_vm5, %v1226_v18 }
 0x261   :  { %v1011_v19 = vpop.permute.xlu1 %1010  ;;  %v1325_v20 = vpop.permute.xlu0 %1324 }
 0x262   :  { %1013 = vst.msk [vmem:[#allocation2] sm:$0xf] %vm3903_vm6, %v1011_v19 }
 0x263   :  { %1019 = vst.msk [vmem:[#allocation2] sm:$0xf] %vm3904_vm7, %v3547_v52 }
 0x264   :  { %1327 = vst.msk [vmem:[#allocation2 + $0x18] sm:$0xf0] %vm229_vm12, %v1325_v20 }
 0x265   :  { %v1105_v21 = vpop.permute.xlu1 %1104  ;;  %v1036_v22 = vpop.permute.xlu0 %1035 }
 0x266   :  { %1107 = vst.msk [vmem:[#allocation2] sm:$0xf0] %vm3905_vm3, %v1105_v21 }
 0x267   :  { %1114 = vst.msk [vmem:[#allocation2] sm:$0xf0] %vm3906_vm13, %v3552_v33 }
 0x268   :  { %1038 = vst.msk [vmem:[#allocation2 + $0x8] sm:$0xf] %vm3907_vm2, %v1036_v22 }
 0x269   :  { %v1134_v23 = vpop.permute.xlu0 %1133 }
 0x26a   :  { %1136 = vst.msk [vmem:[#allocation2 + $0x8] sm:$0xf0] %vm221_vm11, %v1134_v23 }
 0x26b   :  { %v1784_v24 = vld [vmem:[#allocation2 + $0x18] sm:$0xff] }
 0x26c   :  { %1825 = vmatprep.subr.mxu1 %v1784_v24 }
 0x26d   :  { %1826 = vmatpush1.msra.mxu1 %v1783_v25  ;;  %v1042_v26 = vpop.permute.xlu0 %1041 }
 0x26e   :  { %1044 = vst.msk [vmem:[#allocation2 + $0x8] sm:$0xf] %vm3908_vm15, %v1042_v26  ;;  %v1781_v30 = vld [vmem:[#allocation2] sm:$0xff] }
 0x271   :  { %v1141_v27 = vpop.permute.xlu0 %1140 }
 0x272   :  { %1143 = vst.msk [vmem:[#allocation2 + $0x8] sm:$0xf0] %vm229_vm12, %v1141_v27 }
 0x279   :  { %v1782_v29 = vld [vmem:[#allocation2 + $0x8] sm:$0xff] }
 0x27a   :  { %1827 = vmatprep.subr.mxu1 %v1782_v29 }
 0x27b   :  { %1828 = vmatpush1.msra.mxu1 %v1781_v30 }
 0x27c   :  { %2006 = vmatmul.mubr.msk.f32.vlgmr.msra.gmra.mxu1 %vm878_vm14, %v3203_v28 }
 0x33c   :  { %v1863_v31 = vpop.f32.mrf.mxu1 }
 0x33d   :  { %v1864_v32 = vadd.f32 %v1863_v31, %v2523_v5 }
 0x33e   :  { %v1865_v34 = vpop.f32.mrf.mxu1 }
 0x33f   :  { %2007 = vst [vmem:[%s3620_s3 + $0x10] sm:$0xff] %v1864_v32  ;;  %v1866_v35 = vadd.f32 %v1865_v34, %v2523_v5 }
 0x341   :  { %2008 = vst.msk [vmem:[%s3620_s3 + $0x18] sm:$0xff] %vm961_vm10, %v1866_v35 }

</bundles_post_ra>
